<compile_context>
chip_gen: v7x
topology: tpu7x:2x2x1
jax: 0.10.0
libtpu: 0.0.40
codegen_flags: <defaults>
</compile_context>

<pallas_src>
import jax
import jax.numpy as jnp
from jax.experimental import pallas as pl
from jax.experimental.pallas import tpu as pltpu


_VMEM = pl.BlockSpec(memory_space=pltpu.MemorySpace.VMEM)
_ANY = pl.BlockSpec(memory_space=pl.ANY)


# ---------------------------------------------------------------------------
# Fused Pallas kernel: layer1 (bidir) -> layer2 (bidir, shortcut) -> fc
# ---------------------------------------------------------------------------

def _lstm_cell(pre, c, H):
    """LSTM cell update; gate columns pre-packed as [i | f | o | g] (4H)."""
    sg = jax.nn.sigmoid(pre[:, :3 * H])        # one EUP op: i, f, o together
    g = jnp.tanh(pre[:, 3 * H:])
    i = sg[:, :H]
    f = sg[:, H:2 * H]
    o = sg[:, 2 * H:3 * H]
    c_new = f * c + i * g
    h_new = o * jnp.tanh(c_new)
    return h_new, c_new


def brnn_fused_kernel(x_ref, w_ih1_ref, w_hh1_ref, b1_ref,
                      w_ih2f_hbm, w_ih2b_hbm, w_hh2f_hbm,
                      b2f_ref, b2b_ref, fc_w_ref, fc_b_ref,
                      out_ref,
                      xg1_scr, h1_scr, xg2_scr,
                      w_ih2f_v, w_ih2b_v, w_hh2f_v, dma_sem):
    """Whole BRNN forward in a single kernel.

    x_ref      : (T, B, Din)   time-major input                         [VMEM]
    w_ih1_ref  : (Din, 8H)     layer-1 input->gates  [fwd 4H | bwd 4H]  [VMEM]
    w_hh1_ref  : (H, 8H)       layer-1 recurrent     [fwd 4H | bwd 4H]  [VMEM]
    b1_ref     : (1, 8H)       layer-1 b_ih + b_hh   [fwd | bwd]        [VMEM]
    w_ih2f_hbm : (2H, 4H)      layer-2 fwd input->gates                 [HBM]
    w_ih2b_hbm : (2H, 4H)      layer-2 bwd input->gates                 [HBM]
    w_hh2f_hbm : (H, 4H)       layer-2 fwd recurrent (bwd one provably
                               never contributes to out[:, -1, :])      [HBM]
    b2f_ref    : (1, 4H), b2b_ref : (1, 4H)                             [VMEM]
    fc_w_ref   : (2H, C), fc_b_ref : (1, C)                             [VMEM]
    out_ref    : (B, C)
    scratch    : xg1 (T,B,8H), h1 (T,B,2H), xg2 (T,B,4H),
                 layer-2 weight VMEM buffers, DMA sems (3,)
    Gate column order inside every 4H block: [i | f | o | g].
    """
    T, B, Din = x_ref.shape
    H = w_hh2f_v.shape[0]
    G = 4 * H

    # Kick off layer-2 weight DMAs; they overlap with the layer-1 recurrence.
    cps = [
        pltpu.make_async_copy(w_ih2f_hbm, w_ih2f_v, dma_sem.at[0]),
        pltpu.make_async_copy(w_ih2b_hbm, w_ih2b_v, dma_sem.at[1]),
        pltpu.make_async_copy(w_hh2f_hbm, w_hh2f_v, dma_sem.at[2]),
    ]
    for cp in cps:
        cp.start()

    # -------- layer 1: hoisted input projection, bias folded in --------------
    x_flat = x_ref[...].reshape(T * B, Din)
    xg1 = (jnp.dot(x_flat, w_ih1_ref[...], preferred_element_type=jnp.float32)
           + b1_ref[...])
    xg1_scr[...] = xg1.reshape(T, B, 2 * G)

    w_hh1 = w_hh1_ref[...]                                   # (H, 8H) dense

    # h/c of both directions stacked along sublanes:
    #   rows [0:B]  = forward  state (time t)
    #   rows [B:2B] = backward state (time T-1-t)
    h_stk = jnp.zeros((2 * B, H), jnp.float32)
    c_stk = jnp.zeros((2 * B, H), jnp.float32)

    # Fully unrolled time loop (T static & small); per-step state is only
    # h_stk/c_stk, everything else is read from VMEM scratch.
    for t in range(T):
        rt = T - 1 - t
        # One (2B,H)@(H,8H) matmul covers both directions; keep the two
        # valid quadrants (fwd rows x fwd cols, bwd rows x bwd cols).
        rec = jnp.dot(h_stk, w_hh1, preferred_element_type=jnp.float32)
        pre_f = rec[:B, :G] + xg1_scr[t, :, :G]
        pre_b = rec[B:, G:] + xg1_scr[rt, :, G:]
        pre = jnp.concatenate([pre_f, pre_b], axis=0)        # (2B, 4H)
        h_stk, c_stk = _lstm_cell(pre, c_stk, H)
        h1_scr[t, :, :H] = h_stk[:B]                         # lane-aligned stores
        h1_scr[rt, :, H:] = h_stk[B:]

    # -------- layer-2 weights must now be resident ---------------------------
    for cp in cps:
        cp.wait()

    # -------- layer 2: only what out[:, -1, :] needs --------------------------
    h1_flat = h1_scr[...].reshape(T * B, 2 * H)
    xg2 = (jnp.dot(h1_flat, w_ih2f_v[...], preferred_element_type=jnp.float32)
           + b2f_ref[...])
    xg2_scr[...] = xg2.reshape(T, B, G)
    # backward direction: only its first (reversed-time) step at t = T-1 matters
    xg2b_last = (jnp.dot(h1_scr[T - 1], w_ih2b_v[...],
                         preferred_element_type=jnp.float32) + b2b_ref[...])

    w_hh2f = w_hh2f_v[...]
    h2f = jnp.zeros((B, H), jnp.float32)
    c2f = jnp.zeros((B, H), jnp.float32)
    for t in range(T):
        pre = (jnp.dot(h2f, w_hh2f, preferred_element_type=jnp.float32)
               + xg2_scr[t])
        h2f, c2f = _lstm_cell(pre, c2f, H)

    # layer-2 backward at time T-1: one cell step with zero (h, c); its
    # recurrent weight contributes h0 @ w_hh = 0, so it is never needed.
    h2b, _ = _lstm_cell(xg2b_last, jnp.zeros((B, H), jnp.float32), H)

    # -------- fc head ---------------------------------------------------------
    last = jnp.concatenate([h2f, h2b], axis=-1)              # (B, 2H)
    out_ref[...] = (jnp.dot(last, fc_w_ref[...], preferred_element_type=jnp.float32)
                    + fc_b_ref[...]).astype(out_ref.dtype)


# ---------------------------------------------------------------------------
# Parameter packing (done ONCE, outside the jitted forward)
# ---------------------------------------------------------------------------

def _reorder_gates(w):
    """Reorder last-dim gate blocks from PyTorch [i,f,g,o] to kernel [i,f,o,g]."""
    H = w.shape[-1] // 4
    i, f, g, o = (w[..., :H], w[..., H:2 * H], w[..., 2 * H:3 * H], w[..., 3 * H:])
    return jnp.concatenate([i, f, o, g], axis=-1)


def pack_params(params):
    ro = _reorder_gates
    (wif1, whf1, bf1) = params["lstm"][0]["fwd"]
    (wib1, whb1, bb1) = params["lstm"][0]["bwd"]
    (wif2, whf2, bf2) = params["lstm"][1]["fwd"]
    (wib2, _whb2, bb2) = params["lstm"][1]["bwd"]   # layer-2 bwd recurrent unused
    return dict(
        w_ih1=jnp.concatenate([ro(wif1), ro(wib1)], axis=1),   # (Din, 8H)
        w_hh1=jnp.concatenate([ro(whf1), ro(whb1)], axis=1),   # (H, 8H) dense
        b1=jnp.concatenate([ro(bf1), ro(bb1)], axis=1),        # (1, 8H)
        w_ih2f=ro(wif2), w_ih2b=ro(wib2),                      # (2H, 4H) each
        w_hh2f=ro(whf2),                                       # (H, 4H)
        b2f=ro(bf2), b2b=ro(bb2),                              # (1, 4H) each
        fc_w=params["fc_w"], fc_b=params["fc_b"],
    )


# ---------------------------------------------------------------------------
# Wrapper
# ---------------------------------------------------------------------------

@jax.jit
def brnn_forward(x, pk):
    """x: (B, T, input_size) batch-first, same as the PyTorch module. -> (B, C)."""
    x_tm = jnp.transpose(x, (1, 0, 2))                  # (T, B, input_size)
    T, B, _ = x_tm.shape
    H = pk["w_hh2f"].shape[0]
    G = 4 * H
    C = pk["fc_w"].shape[1]

    return pl.pallas_call(
        brnn_fused_kernel,
        out_shape=jax.ShapeDtypeStruct((B, C), jnp.float32),
        in_specs=[_VMEM, _VMEM, _VMEM, _VMEM,     # x, w_ih1, w_hh1, b1
                  _ANY, _ANY, _ANY,               # w_ih2f, w_ih2b, w_hh2f (HBM)
                  _VMEM, _VMEM, _VMEM, _VMEM],    # b2f, b2b, fc_w, fc_b
        out_specs=_VMEM,
        scratch_shapes=[
            pltpu.VMEM((T, B, 2 * G), jnp.float32),   # xg1 (layer-1 input proj)
            pltpu.VMEM((T, B, 2 * H), jnp.float32),   # h1  (layer-1 outputs)
            pltpu.VMEM((T, B, G), jnp.float32),       # xg2 fwd (layer-2 input proj)
            pltpu.VMEM((2 * H, G), jnp.float32),      # w_ih2f staging
            pltpu.VMEM((2 * H, G), jnp.float32),      # w_ih2b staging
            pltpu.VMEM((H, G), jnp.float32),          # w_hh2f staging
            pltpu.SemaphoreType.DMA((3,)),
        ],
    )(x_tm, pk["w_ih1"], pk["w_hh1"], pk["b1"],
      pk["w_ih2f"], pk["w_ih2b"], pk["w_hh2f"],
      pk["b2f"], pk["b2b"], pk["fc_w"], pk["fc_b"])


# ---------------------------------------------------------------------------
# Deterministic parameter init (PyTorch-style uniform(-1/sqrt(H), 1/sqrt(H)))
# ---------------------------------------------------------------------------

def init_params(key, input_size, hidden_size, num_layers, num_classes):
    k = 1.0 / jnp.sqrt(hidden_size)

    def uniform(key, shape, lim):
        return jax.random.uniform(key, shape, jnp.float32, -lim, lim)

    params = {"lstm": []}
    for layer in range(num_layers):
        din = input_size if layer == 0 else 2 * hidden_size
        layer_params = {}
        for direction in ("fwd", "bwd"):
            key, k1, k2, k3, k4 = jax.random.split(key, 5)
            w_ih = uniform(k1, (din, 4 * hidden_size), k)           # (Din, 4H)
            w_hh = uniform(k2, (hidden_size, 4 * hidden_size), k)   # (H, 4H)
            b = uniform(k3, (1, 4 * hidden_size), k) + uniform(k4, (1, 4 * hidden_size), k)
            layer_params[direction] = (w_ih, w_hh, b)
        params["lstm"].append(layer_params)

    key, k1, k2 = jax.random.split(key, 3)
    kf = 1.0 / jnp.sqrt(2 * hidden_size)
    params["fc_w"] = jax.random.uniform(k1, (2 * hidden_size, num_classes), jnp.float32, -kf, kf)
    params["fc_b"] = jax.random.uniform(k2, (1, num_classes), jnp.float32, -kf, kf)
    return params


# ---------------------------------------------------------------------------
# Pure-JAX reference (unfused, matches PyTorch semantics exactly)
# ---------------------------------------------------------------------------

def _lstm_layer_ref(x_tm, w_ih, w_hh, b):
    T, B, _ = x_tm.shape
    H = w_hh.shape[0]
    h = jnp.zeros((B, H), jnp.float32)
    c = jnp.zeros((B, H), jnp.float32)
    outs = []
    for t in range(T):
        gates = x_tm[t] @ w_ih + h @ w_hh + b
        i = jax.nn.sigmoid(gates[:, :H])
        f = jax.nn.sigmoid(gates[:, H:2 * H])
        g = jnp.tanh(gates[:, 2 * H:3 * H])
        o = jax.nn.sigmoid(gates[:, 3 * H:4 * H])
        c = f * c + i * g
        h = o * jnp.tanh(c)
        outs.append(h)
    return jnp.stack(outs)


def _brnn_ref(x, params):
    h = jnp.transpose(x, (1, 0, 2))
    for layer in params["lstm"]:
        fwd = _lstm_layer_ref(h, *layer["fwd"])
        bwd = _lstm_layer_ref(h[::-1], *layer["bwd"])[::-1]
        h = jnp.concatenate([fwd, bwd], axis=-1)
    return h[-1] @ params["fc_w"] + params["fc_b"]


# ---------------------------------------------------------------------------

if __name__ == "__main__":
    # Small shapes consistent with the module (MNIST-row style sequences).
    # hidden_size is a multiple of 128 so gate slices / stores are lane-dense.
    batch = 8
    seq_len = 8
    input_size = 28
    hidden_size = 128
    num_layers = 2
    num_classes = 10

    key = jax.random.PRNGKey(0)
    key, pkey, xkey = jax.random.split(key, 3)
    params = init_params(pkey, input_size, hidden_size, num_layers, num_classes)
    packed = pack_params(params)          # packing done once, outside jit
    x = jax.random.normal(xkey, (batch, seq_len, input_size), jnp.float32)

    out = jax.block_until_ready(brnn_forward(x, packed))

    ref = _brnn_ref(x, params)
    assert out.shape == (batch, num_classes)
    err = float(jnp.max(jnp.abs(out - ref)))
    assert jnp.allclose(out, ref, atol=1e-3, rtol=1e-3), err

    print("KERNEL_OK")
</pallas_src>

<mosaic_0001>
module attributes {stable_mosaic.version = 11 : i64} {
  func.func @brnn_fused_kernel(%arg0: memref<8x8x28xf32, #tpu.memory_space<vmem>>, %arg1: memref<28x1024xf32, #tpu.memory_space<vmem>>, %arg2: memref<128x1024xf32, #tpu.memory_space<vmem>>, %arg3: memref<1x1024xf32, #tpu.memory_space<vmem>>, %arg4: memref<256x512xf32, #tpu.memory_space<any>>, %arg5: memref<256x512xf32, #tpu.memory_space<any>>, %arg6: memref<128x512xf32, #tpu.memory_space<any>>, %arg7: memref<1x512xf32, #tpu.memory_space<vmem>>, %arg8: memref<1x512xf32, #tpu.memory_space<vmem>>, %arg9: memref<256x10xf32, #tpu.memory_space<vmem>>, %arg10: memref<1x10xf32, #tpu.memory_space<vmem>>, %arg11: memref<8x10xf32, #tpu.memory_space<vmem>>, %arg12: memref<8x8x1024xf32, #tpu.memory_space<vmem>>, %arg13: memref<8x8x256xf32, #tpu.memory_space<vmem>>, %arg14: memref<8x8x512xf32, #tpu.memory_space<vmem>>, %arg15: memref<256x512xf32, #tpu.memory_space<vmem>>, %arg16: memref<256x512xf32, #tpu.memory_space<vmem>>, %arg17: memref<128x512xf32, #tpu.memory_space<vmem>>, %arg18: memref<3x!tpu.dma_semaphore, #tpu.memory_space<semaphore_mem>>) attributes {dimension_semantics = [], scalar_prefetch = 0 : i64, scratch_operands = 7 : i64, tpu.core_type = #tpu.core_type<tc>} {
    %c0_i32 = arith.constant 0 : i32
    %0 = tpu.memref_slice %arg18[%c0_i32] : memref<3x!tpu.dma_semaphore, #tpu.memory_space<semaphore_mem>> -> memref<1x!tpu.dma_semaphore, #tpu.memory_space<semaphore_mem>>
    %1 = tpu.memref_squeeze %0 : memref<1x!tpu.dma_semaphore, #tpu.memory_space<semaphore_mem>> -> memref<!tpu.dma_semaphore, #tpu.memory_space<semaphore_mem>>
    tpu.enqueue_dma source(%arg4 : memref<256x512xf32, #tpu.memory_space<any>>) target(%arg15 : memref<256x512xf32, #tpu.memory_space<vmem>>) target_semaphore(%1 : memref<!tpu.dma_semaphore, #tpu.memory_space<semaphore_mem>>)
    %c1_i32 = arith.constant 1 : i32
    %2 = tpu.memref_slice %arg18[%c1_i32] : memref<3x!tpu.dma_semaphore, #tpu.memory_space<semaphore_mem>> -> memref<1x!tpu.dma_semaphore, #tpu.memory_space<semaphore_mem>>
    %3 = tpu.memref_squeeze %2 : memref<1x!tpu.dma_semaphore, #tpu.memory_space<semaphore_mem>> -> memref<!tpu.dma_semaphore, #tpu.memory_space<semaphore_mem>>
    tpu.enqueue_dma source(%arg5 : memref<256x512xf32, #tpu.memory_space<any>>) target(%arg16 : memref<256x512xf32, #tpu.memory_space<vmem>>) target_semaphore(%3 : memref<!tpu.dma_semaphore, #tpu.memory_space<semaphore_mem>>)
    %c2_i32 = arith.constant 2 : i32
    %4 = tpu.memref_slice %arg18[%c2_i32] : memref<3x!tpu.dma_semaphore, #tpu.memory_space<semaphore_mem>> -> memref<1x!tpu.dma_semaphore, #tpu.memory_space<semaphore_mem>>
    %5 = tpu.memref_squeeze %4 : memref<1x!tpu.dma_semaphore, #tpu.memory_space<semaphore_mem>> -> memref<!tpu.dma_semaphore, #tpu.memory_space<semaphore_mem>>
    tpu.enqueue_dma source(%arg6 : memref<128x512xf32, #tpu.memory_space<any>>) target(%arg17 : memref<128x512xf32, #tpu.memory_space<vmem>>) target_semaphore(%5 : memref<!tpu.dma_semaphore, #tpu.memory_space<semaphore_mem>>)
    %c0 = arith.constant 0 : index
    %c0_0 = arith.constant 0 : index
    %c0_1 = arith.constant 0 : index
    %6 = vector.load %arg0[%c0, %c0_0, %c0_1] : memref<8x8x28xf32, #tpu.memory_space<vmem>>, vector<8x8x28xf32>
    %7 = vector.shape_cast %6 : vector<8x8x28xf32> to vector<64x28xf32>
    %c0_2 = arith.constant 0 : index
    %c0_3 = arith.constant 0 : index
    %8 = vector.load %arg1[%c0_2, %c0_3] : memref<28x1024xf32, #tpu.memory_space<vmem>>, vector<28x1024xf32>
    %cst = arith.constant dense<0.000000e+00> : vector<64x1024xf32>
    %9 = tpu.matmul %7, %8, %cst {dimension_numbers = #tpu.dot_dimension_numbers<[1], [0], [0], [1], [0, 0, 1, 1], [], []>} : vector<64x28xf32>, vector<28x1024xf32>, vector<64x1024xf32> -> vector<64x1024xf32>
    %c0_4 = arith.constant 0 : index
    %c0_5 = arith.constant 0 : index
    %10 = vector.load %arg3[%c0_4, %c0_5] : memref<1x1024xf32, #tpu.memory_space<vmem>>, vector<1x1024xf32>
    %11 = vector.broadcast %10 : vector<1x1024xf32> to vector<64x1024xf32>
    %12 = arith.addf %9, %11 : vector<64x1024xf32>
    %13 = vector.shape_cast %12 : vector<64x1024xf32> to vector<8x8x1024xf32>
    %c0_6 = arith.constant 0 : index
    %c0_7 = arith.constant 0 : index
    %c0_8 = arith.constant 0 : index
    %14 = vector.load %arg12[%c0_6, %c0_7, %c0_8] : memref<8x8x1024xf32, #tpu.memory_space<vmem>>, vector<8x8x1024xf32>
    tpu.vector_store %arg12[%c0_6, %c0_7, %c0_8], %13 {strides = array<i32>} : memref<8x8x1024xf32, #tpu.memory_space<vmem>>, vector<8x8x1024xf32>,
    %c0_9 = arith.constant 0 : index
    %c0_10 = arith.constant 0 : index
    %15 = vector.load %arg2[%c0_9, %c0_10] : memref<128x1024xf32, #tpu.memory_space<vmem>>, vector<128x1024xf32>
    %cst_11 = arith.constant 0.000000e+00 : f32
    %16 = vector.broadcast %cst_11 : f32 to vector<16x128xf32>
    %cst_12 = arith.constant 0.000000e+00 : f32
    %17 = vector.broadcast %cst_12 : f32 to vector<16x128xf32>
    %cst_13 = arith.constant dense<0.000000e+00> : vector<16x1024xf32>
    %18 = tpu.matmul %16, %15, %cst_13 {dimension_numbers = #tpu.dot_dimension_numbers<[1], [0], [0], [1], [0, 0, 1, 1], [], []>} : vector<16x128xf32>, vector<128x1024xf32>, vector<16x1024xf32> -> vector<16x1024xf32>
    %19 = vector.extract_strided_slice %18 {offsets = [0, 0], sizes = [8, 512], strides = [1, 1]} : vector<16x1024xf32> to vector<8x512xf32>
    %c0_14 = arith.constant 0 : index
    %c0_15 = arith.constant 0 : index
    %c0_16 = arith.constant 0 : index
    %20 = vector.load %arg12[%c0_14, %c0_15, %c0_16] : memref<8x8x1024xf32, #tpu.memory_space<vmem>>, vector<1x8x512xf32>
    %21 = vector.shape_cast %20 : vector<1x8x512xf32> to vector<8x512xf32>
    %22 = arith.addf %19, %21 : vector<8x512xf32>
    %23 = vector.extract_strided_slice %18 {offsets = [8, 512], sizes = [8, 512], strides = [1, 1]} : vector<16x1024xf32> to vector<8x512xf32>
    %c7 = arith.constant 7 : index
    %c0_17 = arith.constant 0 : index
    %c512 = arith.constant 512 : index
    %24 = vector.load %arg12[%c7, %c0_17, %c512] : memref<8x8x1024xf32, #tpu.memory_space<vmem>>, vector<1x8x512xf32>
    %25 = vector.shape_cast %24 : vector<1x8x512xf32> to vector<8x512xf32>
    %26 = arith.addf %23, %25 : vector<8x512xf32>
    %27 = tpu.concatenate %22, %26 in 0 : vector<8x512xf32>, vector<8x512xf32> -> vector<16x512xf32>
    %28 = vector.extract_strided_slice %27 {offsets = [0, 0], sizes = [16, 384], strides = [1, 1]} : vector<16x512xf32> to vector<16x384xf32>
    %29 = arith.negf %28 : vector<16x384xf32>
    %30 = math.exp %29 : vector<16x384xf32>
    %cst_18 = arith.constant 1.000000e+00 : f32
    %31 = vector.broadcast %cst_18 : f32 to vector<16x384xf32>
    %32 = arith.addf %31, %30 : vector<16x384xf32>
    %33 = arith.divf %31, %32 : vector<16x384xf32>
    %34 = vector.extract_strided_slice %27 {offsets = [0, 384], sizes = [16, 128], strides = [1, 1]} : vector<16x512xf32> to vector<16x128xf32>
    %35 = math.tanh %34 : vector<16x128xf32>
    %36 = vector.extract_strided_slice %33 {offsets = [0, 0], sizes = [16, 128], strides = [1, 1]} : vector<16x384xf32> to vector<16x128xf32>
    %37 = vector.extract_strided_slice %33 {offsets = [0, 128], sizes = [16, 128], strides = [1, 1]} : vector<16x384xf32> to vector<16x128xf32>
    %38 = vector.extract_strided_slice %33 {offsets = [0, 256], sizes = [16, 128], strides = [1, 1]} : vector<16x384xf32> to vector<16x128xf32>
    %39 = arith.mulf %37, %17 : vector<16x128xf32>
    %40 = arith.mulf %36, %35 : vector<16x128xf32>
    %41 = arith.addf %39, %40 : vector<16x128xf32>
    %42 = math.tanh %41 : vector<16x128xf32>
    %43 = arith.mulf %38, %42 : vector<16x128xf32>
    %44 = vector.extract_strided_slice %43 {offsets = [0, 0], sizes = [8, 128], strides = [1, 1]} : vector<16x128xf32> to vector<8x128xf32>
    %c0_19 = arith.constant 0 : index
    %c0_20 = arith.constant 0 : index
    %c0_21 = arith.constant 0 : index
    %45 = vector.load %arg13[%c0_19, %c0_20, %c0_21] : memref<8x8x256xf32, #tpu.memory_space<vmem>>, vector<1x8x128xf32>
    %46 = vector.shape_cast %45 : vector<1x8x128xf32> to vector<8x128xf32>
    %47 = vector.shape_cast %44 : vector<8x128xf32> to vector<1x8x128xf32>
    tpu.vector_store %arg13[%c0_19, %c0_20, %c0_21], %47 {strides = array<i32>} : memref<8x8x256xf32, #tpu.memory_space<vmem>>, vector<1x8x128xf32>,
    %48 = vector.extract_strided_slice %43 {offsets = [8, 0], sizes = [8, 128], strides = [1, 1]} : vector<16x128xf32> to vector<8x128xf32>
    %c7_22 = arith.constant 7 : index
    %c0_23 = arith.constant 0 : index
    %c128 = arith.constant 128 : index
    %49 = vector.load %arg13[%c7_22, %c0_23, %c128] : memref<8x8x256xf32, #tpu.memory_space<vmem>>, vector<1x8x128xf32>
    %50 = vector.shape_cast %49 : vector<1x8x128xf32> to vector<8x128xf32>
    %51 = vector.shape_cast %48 : vector<8x128xf32> to vector<1x8x128xf32>
    tpu.vector_store %arg13[%c7_22, %c0_23, %c128], %51 {strides = array<i32>} : memref<8x8x256xf32, #tpu.memory_space<vmem>>, vector<1x8x128xf32>,
    %cst_24 = arith.constant dense<0.000000e+00> : vector<16x1024xf32>
    %52 = tpu.matmul %43, %15, %cst_24 {dimension_numbers = #tpu.dot_dimension_numbers<[1], [0], [0], [1], [0, 0, 1, 1], [], []>} : vector<16x128xf32>, vector<128x1024xf32>, vector<16x1024xf32> -> vector<16x1024xf32>
    %53 = vector.extract_strided_slice %52 {offsets = [0, 0], sizes = [8, 512], strides = [1, 1]} : vector<16x1024xf32> to vector<8x512xf32>
    %c1 = arith.constant 1 : index
    %c0_25 = arith.constant 0 : index
    %c0_26 = arith.constant 0 : index
    %54 = vector.load %arg12[%c1, %c0_25, %c0_26] : memref<8x8x1024xf32, #tpu.memory_space<vmem>>, vector<1x8x512xf32>
    %55 = vector.shape_cast %54 : vector<1x8x512xf32> to vector<8x512xf32>
    %56 = arith.addf %53, %55 : vector<8x512xf32>
    %57 = vector.extract_strided_slice %52 {offsets = [8, 512], sizes = [8, 512], strides = [1, 1]} : vector<16x1024xf32> to vector<8x512xf32>
    %c6 = arith.constant 6 : index
    %c0_27 = arith.constant 0 : index
    %c512_28 = arith.constant 512 : index
    %58 = vector.load %arg12[%c6, %c0_27, %c512_28] : memref<8x8x1024xf32, #tpu.memory_space<vmem>>, vector<1x8x512xf32>
    %59 = vector.shape_cast %58 : vector<1x8x512xf32> to vector<8x512xf32>
    %60 = arith.addf %57, %59 : vector<8x512xf32>
    %61 = tpu.concatenate %56, %60 in 0 : vector<8x512xf32>, vector<8x512xf32> -> vector<16x512xf32>
    %62 = vector.extract_strided_slice %61 {offsets = [0, 0], sizes = [16, 384], strides = [1, 1]} : vector<16x512xf32> to vector<16x384xf32>
    %63 = arith.negf %62 : vector<16x384xf32>
    %64 = math.exp %63 : vector<16x384xf32>
    %cst_29 = arith.constant 1.000000e+00 : f32
    %65 = vector.broadcast %cst_29 : f32 to vector<16x384xf32>
    %66 = arith.addf %65, %64 : vector<16x384xf32>
    %67 = arith.divf %65, %66 : vector<16x384xf32>
    %68 = vector.extract_strided_slice %61 {offsets = [0, 384], sizes = [16, 128], strides = [1, 1]} : vector<16x512xf32> to vector<16x128xf32>
    %69 = math.tanh %68 : vector<16x128xf32>
    %70 = vector.extract_strided_slice %67 {offsets = [0, 0], sizes = [16, 128], strides = [1, 1]} : vector<16x384xf32> to vector<16x128xf32>
    %71 = vector.extract_strided_slice %67 {offsets = [0, 128], sizes = [16, 128], strides = [1, 1]} : vector<16x384xf32> to vector<16x128xf32>
    %72 = vector.extract_strided_slice %67 {offsets = [0, 256], sizes = [16, 128], strides = [1, 1]} : vector<16x384xf32> to vector<16x128xf32>
    %73 = arith.mulf %71, %41 : vector<16x128xf32>
    %74 = arith.mulf %70, %69 : vector<16x128xf32>
    %75 = arith.addf %73, %74 : vector<16x128xf32>
    %76 = math.tanh %75 : vector<16x128xf32>
    %77 = arith.mulf %72, %76 : vector<16x128xf32>
    %78 = vector.extract_strided_slice %77 {offsets = [0, 0], sizes = [8, 128], strides = [1, 1]} : vector<16x128xf32> to vector<8x128xf32>
    %c1_30 = arith.constant 1 : index
    %c0_31 = arith.constant 0 : index
    %c0_32 = arith.constant 0 : index
    %79 = vector.load %arg13[%c1_30, %c0_31, %c0_32] : memref<8x8x256xf32, #tpu.memory_space<vmem>>, vector<1x8x128xf32>
    %80 = vector.shape_cast %79 : vector<1x8x128xf32> to vector<8x128xf32>
    %81 = vector.shape_cast %78 : vector<8x128xf32> to vector<1x8x128xf32>
    tpu.vector_store %arg13[%c1_30, %c0_31, %c0_32], %81 {strides = array<i32>} : memref<8x8x256xf32, #tpu.memory_space<vmem>>, vector<1x8x128xf32>,
    %82 = vector.extract_strided_slice %77 {offsets = [8, 0], sizes = [8, 128], strides = [1, 1]} : vector<16x128xf32> to vector<8x128xf32>
    %c6_33 = arith.constant 6 : index
    %c0_34 = arith.constant 0 : index
    %c128_35 = arith.constant 128 : index
    %83 = vector.load %arg13[%c6_33, %c0_34, %c128_35] : memref<8x8x256xf32, #tpu.memory_space<vmem>>, vector<1x8x128xf32>
    %84 = vector.shape_cast %83 : vector<1x8x128xf32> to vector<8x128xf32>
    %85 = vector.shape_cast %82 : vector<8x128xf32> to vector<1x8x128xf32>
    tpu.vector_store %arg13[%c6_33, %c0_34, %c128_35], %85 {strides = array<i32>} : memref<8x8x256xf32, #tpu.memory_space<vmem>>, vector<1x8x128xf32>,
    %cst_36 = arith.constant dense<0.000000e+00> : vector<16x1024xf32>
    %86 = tpu.matmul %77, %15, %cst_36 {dimension_numbers = #tpu.dot_dimension_numbers<[1], [0], [0], [1], [0, 0, 1, 1], [], []>} : vector<16x128xf32>, vector<128x1024xf32>, vector<16x1024xf32> -> vector<16x1024xf32>
    %87 = vector.extract_strided_slice %86 {offsets = [0, 0], sizes = [8, 512], strides = [1, 1]} : vector<16x1024xf32> to vector<8x512xf32>
    %c2 = arith.constant 2 : index
    %c0_37 = arith.constant 0 : index
    %c0_38 = arith.constant 0 : index
    %88 = vector.load %arg12[%c2, %c0_37, %c0_38] : memref<8x8x1024xf32, #tpu.memory_space<vmem>>, vector<1x8x512xf32>
    %89 = vector.shape_cast %88 : vector<1x8x512xf32> to vector<8x512xf32>
    %90 = arith.addf %87, %89 : vector<8x512xf32>
    %91 = vector.extract_strided_slice %86 {offsets = [8, 512], sizes = [8, 512], strides = [1, 1]} : vector<16x1024xf32> to vector<8x512xf32>
    %c5 = arith.constant 5 : index
    %c0_39 = arith.constant 0 : index
    %c512_40 = arith.constant 512 : index
    %92 = vector.load %arg12[%c5, %c0_39, %c512_40] : memref<8x8x1024xf32, #tpu.memory_space<vmem>>, vector<1x8x512xf32>
    %93 = vector.shape_cast %92 : vector<1x8x512xf32> to vector<8x512xf32>
    %94 = arith.addf %91, %93 : vector<8x512xf32>
    %95 = tpu.concatenate %90, %94 in 0 : vector<8x512xf32>, vector<8x512xf32> -> vector<16x512xf32>
    %96 = vector.extract_strided_slice %95 {offsets = [0, 0], sizes = [16, 384], strides = [1, 1]} : vector<16x512xf32> to vector<16x384xf32>
    %97 = arith.negf %96 : vector<16x384xf32>
    %98 = math.exp %97 : vector<16x384xf32>
    %cst_41 = arith.constant 1.000000e+00 : f32
    %99 = vector.broadcast %cst_41 : f32 to vector<16x384xf32>
    %100 = arith.addf %99, %98 : vector<16x384xf32>
    %101 = arith.divf %99, %100 : vector<16x384xf32>
    %102 = vector.extract_strided_slice %95 {offsets = [0, 384], sizes = [16, 128], strides = [1, 1]} : vector<16x512xf32> to vector<16x128xf32>
    %103 = math.tanh %102 : vector<16x128xf32>
    %104 = vector.extract_strided_slice %101 {offsets = [0, 0], sizes = [16, 128], strides = [1, 1]} : vector<16x384xf32> to vector<16x128xf32>
    %105 = vector.extract_strided_slice %101 {offsets = [0, 128], sizes = [16, 128], strides = [1, 1]} : vector<16x384xf32> to vector<16x128xf32>
    %106 = vector.extract_strided_slice %101 {offsets = [0, 256], sizes = [16, 128], strides = [1, 1]} : vector<16x384xf32> to vector<16x128xf32>
    %107 = arith.mulf %105, %75 : vector<16x128xf32>
    %108 = arith.mulf %104, %103 : vector<16x128xf32>
    %109 = arith.addf %107, %108 : vector<16x128xf32>
    %110 = math.tanh %109 : vector<16x128xf32>
    %111 = arith.mulf %106, %110 : vector<16x128xf32>
    %112 = vector.extract_strided_slice %111 {offsets = [0, 0], sizes = [8, 128], strides = [1, 1]} : vector<16x128xf32> to vector<8x128xf32>
    %c2_42 = arith.constant 2 : index
    %c0_43 = arith.constant 0 : index
    %c0_44 = arith.constant 0 : index
    %113 = vector.load %arg13[%c2_42, %c0_43, %c0_44] : memref<8x8x256xf32, #tpu.memory_space<vmem>>, vector<1x8x128xf32>
    %114 = vector.shape_cast %113 : vector<1x8x128xf32> to vector<8x128xf32>
    %115 = vector.shape_cast %112 : vector<8x128xf32> to vector<1x8x128xf32>
    tpu.vector_store %arg13[%c2_42, %c0_43, %c0_44], %115 {strides = array<i32>} : memref<8x8x256xf32, #tpu.memory_space<vmem>>, vector<1x8x128xf32>,
    %116 = vector.extract_strided_slice %111 {offsets = [8, 0], sizes = [8, 128], strides = [1, 1]} : vector<16x128xf32> to vector<8x128xf32>
    %c5_45 = arith.constant 5 : index
    %c0_46 = arith.constant 0 : index
    %c128_47 = arith.constant 128 : index
    %117 = vector.load %arg13[%c5_45, %c0_46, %c128_47] : memref<8x8x256xf32, #tpu.memory_space<vmem>>, vector<1x8x128xf32>
    %118 = vector.shape_cast %117 : vector<1x8x128xf32> to vector<8x128xf32>
    %119 = vector.shape_cast %116 : vector<8x128xf32> to vector<1x8x128xf32>
    tpu.vector_store %arg13[%c5_45, %c0_46, %c128_47], %119 {strides = array<i32>} : memref<8x8x256xf32, #tpu.memory_space<vmem>>, vector<1x8x128xf32>,
    %cst_48 = arith.constant dense<0.000000e+00> : vector<16x1024xf32>
    %120 = tpu.matmul %111, %15, %cst_48 {dimension_numbers = #tpu.dot_dimension_numbers<[1], [0], [0], [1], [0, 0, 1, 1], [], []>} : vector<16x128xf32>, vector<128x1024xf32>, vector<16x1024xf32> -> vector<16x1024xf32>
    %121 = vector.extract_strided_slice %120 {offsets = [0, 0], sizes = [8, 512], strides = [1, 1]} : vector<16x1024xf32> to vector<8x512xf32>
    %c3 = arith.constant 3 : index
    %c0_49 = arith.constant 0 : index
    %c0_50 = arith.constant 0 : index
    %122 = vector.load %arg12[%c3, %c0_49, %c0_50] : memref<8x8x1024xf32, #tpu.memory_space<vmem>>, vector<1x8x512xf32>
    %123 = vector.shape_cast %122 : vector<1x8x512xf32> to vector<8x512xf32>
    %124 = arith.addf %121, %123 : vector<8x512xf32>
    %125 = vector.extract_strided_slice %120 {offsets = [8, 512], sizes = [8, 512], strides = [1, 1]} : vector<16x1024xf32> to vector<8x512xf32>
    %c4 = arith.constant 4 : index
    %c0_51 = arith.constant 0 : index
    %c512_52 = arith.constant 512 : index
    %126 = vector.load %arg12[%c4, %c0_51, %c512_52] : memref<8x8x1024xf32, #tpu.memory_space<vmem>>, vector<1x8x512xf32>
    %127 = vector.shape_cast %126 : vector<1x8x512xf32> to vector<8x512xf32>
    %128 = arith.addf %125, %127 : vector<8x512xf32>
    %129 = tpu.concatenate %124, %128 in 0 : vector<8x512xf32>, vector<8x512xf32> -> vector<16x512xf32>
    %130 = vector.extract_strided_slice %129 {offsets = [0, 0], sizes = [16, 384], strides = [1, 1]} : vector<16x512xf32> to vector<16x384xf32>
    %131 = arith.negf %130 : vector<16x384xf32>
    %132 = math.exp %131 : vector<16x384xf32>
    %cst_53 = arith.constant 1.000000e+00 : f32
    %133 = vector.broadcast %cst_53 : f32 to vector<16x384xf32>
    %134 = arith.addf %133, %132 : vector<16x384xf32>
    %135 = arith.divf %133, %134 : vector<16x384xf32>
    %136 = vector.extract_strided_slice %129 {offsets = [0, 384], sizes = [16, 128], strides = [1, 1]} : vector<16x512xf32> to vector<16x128xf32>
    %137 = math.tanh %136 : vector<16x128xf32>
    %138 = vector.extract_strided_slice %135 {offsets = [0, 0], sizes = [16, 128], strides = [1, 1]} : vector<16x384xf32> to vector<16x128xf32>
    %139 = vector.extract_strided_slice %135 {offsets = [0, 128], sizes = [16, 128], strides = [1, 1]} : vector<16x384xf32> to vector<16x128xf32>
    %140 = vector.extract_strided_slice %135 {offsets = [0, 256], sizes = [16, 128], strides = [1, 1]} : vector<16x384xf32> to vector<16x128xf32>
    %141 = arith.mulf %139, %109 : vector<16x128xf32>
    %142 = arith.mulf %138, %137 : vector<16x128xf32>
    %143 = arith.addf %141, %142 : vector<16x128xf32>
    %144 = math.tanh %143 : vector<16x128xf32>
    %145 = arith.mulf %140, %144 : vector<16x128xf32>
    %146 = vector.extract_strided_slice %145 {offsets = [0, 0], sizes = [8, 128], strides = [1, 1]} : vector<16x128xf32> to vector<8x128xf32>
    %c3_54 = arith.constant 3 : index
    %c0_55 = arith.constant 0 : index
    %c0_56 = arith.constant 0 : index
    %147 = vector.load %arg13[%c3_54, %c0_55, %c0_56] : memref<8x8x256xf32, #tpu.memory_space<vmem>>, vector<1x8x128xf32>
    %148 = vector.shape_cast %147 : vector<1x8x128xf32> to vector<8x128xf32>
    %149 = vector.shape_cast %146 : vector<8x128xf32> to vector<1x8x128xf32>
    tpu.vector_store %arg13[%c3_54, %c0_55, %c0_56], %149 {strides = array<i32>} : memref<8x8x256xf32, #tpu.memory_space<vmem>>, vector<1x8x128xf32>,
    %150 = vector.extract_strided_slice %145 {offsets = [8, 0], sizes = [8, 128], strides = [1, 1]} : vector<16x128xf32> to vector<8x128xf32>
    %c4_57 = arith.constant 4 : index
    %c0_58 = arith.constant 0 : index
    %c128_59 = arith.constant 128 : index
    %151 = vector.load %arg13[%c4_57, %c0_58, %c128_59] : memref<8x8x256xf32, #tpu.memory_space<vmem>>, vector<1x8x128xf32>
    %152 = vector.shape_cast %151 : vector<1x8x128xf32> to vector<8x128xf32>
    %153 = vector.shape_cast %150 : vector<8x128xf32> to vector<1x8x128xf32>
    tpu.vector_store %arg13[%c4_57, %c0_58, %c128_59], %153 {strides = array<i32>} : memref<8x8x256xf32, #tpu.memory_space<vmem>>, vector<1x8x128xf32>,
    %cst_60 = arith.constant dense<0.000000e+00> : vector<16x1024xf32>
    %154 = tpu.matmul %145, %15, %cst_60 {dimension_numbers = #tpu.dot_dimension_numbers<[1], [0], [0], [1], [0, 0, 1, 1], [], []>} : vector<16x128xf32>, vector<128x1024xf32>, vector<16x1024xf32> -> vector<16x1024xf32>
    %155 = vector.extract_strided_slice %154 {offsets = [0, 0], sizes = [8, 512], strides = [1, 1]} : vector<16x1024xf32> to vector<8x512xf32>
    %c4_61 = arith.constant 4 : index
    %c0_62 = arith.constant 0 : index
    %c0_63 = arith.constant 0 : index
    %156 = vector.load %arg12[%c4_61, %c0_62, %c0_63] : memref<8x8x1024xf32, #tpu.memory_space<vmem>>, vector<1x8x512xf32>
    %157 = vector.shape_cast %156 : vector<1x8x512xf32> to vector<8x512xf32>
    %158 = arith.addf %155, %157 : vector<8x512xf32>
    %159 = vector.extract_strided_slice %154 {offsets = [8, 512], sizes = [8, 512], strides = [1, 1]} : vector<16x1024xf32> to vector<8x512xf32>
    %c3_64 = arith.constant 3 : index
    %c0_65 = arith.constant 0 : index
    %c512_66 = arith.constant 512 : index
    %160 = vector.load %arg12[%c3_64, %c0_65, %c512_66] : memref<8x8x1024xf32, #tpu.memory_space<vmem>>, vector<1x8x512xf32>
    %161 = vector.shape_cast %160 : vector<1x8x512xf32> to vector<8x512xf32>
    %162 = arith.addf %159, %161 : vector<8x512xf32>
    %163 = tpu.concatenate %158, %162 in 0 : vector<8x512xf32>, vector<8x512xf32> -> vector<16x512xf32>
    %164 = vector.extract_strided_slice %163 {offsets = [0, 0], sizes = [16, 384], strides = [1, 1]} : vector<16x512xf32> to vector<16x384xf32>
    %165 = arith.negf %164 : vector<16x384xf32>
    %166 = math.exp %165 : vector<16x384xf32>
    %cst_67 = arith.constant 1.000000e+00 : f32
    %167 = vector.broadcast %cst_67 : f32 to vector<16x384xf32>
    %168 = arith.addf %167, %166 : vector<16x384xf32>
    %169 = arith.divf %167, %168 : vector<16x384xf32>
    %170 = vector.extract_strided_slice %163 {offsets = [0, 384], sizes = [16, 128], strides = [1, 1]} : vector<16x512xf32> to vector<16x128xf32>
    %171 = math.tanh %170 : vector<16x128xf32>
    %172 = vector.extract_strided_slice %169 {offsets = [0, 0], sizes = [16, 128], strides = [1, 1]} : vector<16x384xf32> to vector<16x128xf32>
    %173 = vector.extract_strided_slice %169 {offsets = [0, 128], sizes = [16, 128], strides = [1, 1]} : vector<16x384xf32> to vector<16x128xf32>
    %174 = vector.extract_strided_slice %169 {offsets = [0, 256], sizes = [16, 128], strides = [1, 1]} : vector<16x384xf32> to vector<16x128xf32>
    %175 = arith.mulf %173, %143 : vector<16x128xf32>
    %176 = arith.mulf %172, %171 : vector<16x128xf32>
    %177 = arith.addf %175, %176 : vector<16x128xf32>
    %178 = math.tanh %177 : vector<16x128xf32>
    %179 = arith.mulf %174, %178 : vector<16x128xf32>
    %180 = vector.extract_strided_slice %179 {offsets = [0, 0], sizes = [8, 128], strides = [1, 1]} : vector<16x128xf32> to vector<8x128xf32>
    %c4_68 = arith.constant 4 : index
    %c0_69 = arith.constant 0 : index
    %c0_70 = arith.constant 0 : index
    %181 = vector.load %arg13[%c4_68, %c0_69, %c0_70] : memref<8x8x256xf32, #tpu.memory_space<vmem>>, vector<1x8x128xf32>
    %182 = vector.shape_cast %181 : vector<1x8x128xf32> to vector<8x128xf32>
    %183 = vector.shape_cast %180 : vector<8x128xf32> to vector<1x8x128xf32>
    tpu.vector_store %arg13[%c4_68, %c0_69, %c0_70], %183 {strides = array<i32>} : memref<8x8x256xf32, #tpu.memory_space<vmem>>, vector<1x8x128xf32>,
    %184 = vector.extract_strided_slice %179 {offsets = [8, 0], sizes = [8, 128], strides = [1, 1]} : vector<16x128xf32> to vector<8x128xf32>
    %c3_71 = arith.constant 3 : index
    %c0_72 = arith.constant 0 : index
    %c128_73 = arith.constant 128 : index
    %185 = vector.load %arg13[%c3_71, %c0_72, %c128_73] : memref<8x8x256xf32, #tpu.memory_space<vmem>>, vector<1x8x128xf32>
    %186 = vector.shape_cast %185 : vector<1x8x128xf32> to vector<8x128xf32>
    %187 = vector.shape_cast %184 : vector<8x128xf32> to vector<1x8x128xf32>
    tpu.vector_store %arg13[%c3_71, %c0_72, %c128_73], %187 {strides = array<i32>} : memref<8x8x256xf32, #tpu.memory_space<vmem>>, vector<1x8x128xf32>,
    %cst_74 = arith.constant dense<0.000000e+00> : vector<16x1024xf32>
    %188 = tpu.matmul %179, %15, %cst_74 {dimension_numbers = #tpu.dot_dimension_numbers<[1], [0], [0], [1], [0, 0, 1, 1], [], []>} : vector<16x128xf32>, vector<128x1024xf32>, vector<16x1024xf32> -> vector<16x1024xf32>
    %189 = vector.extract_strided_slice %188 {offsets = [0, 0], sizes = [8, 512], strides = [1, 1]} : vector<16x1024xf32> to vector<8x512xf32>
    %c5_75 = arith.constant 5 : index
    %c0_76 = arith.constant 0 : index
    %c0_77 = arith.constant 0 : index
    %190 = vector.load %arg12[%c5_75, %c0_76, %c0_77] : memref<8x8x1024xf32, #tpu.memory_space<vmem>>, vector<1x8x512xf32>
    %191 = vector.shape_cast %190 : vector<1x8x512xf32> to vector<8x512xf32>
    %192 = arith.addf %189, %191 : vector<8x512xf32>
    %193 = vector.extract_strided_slice %188 {offsets = [8, 512], sizes = [8, 512], strides = [1, 1]} : vector<16x1024xf32> to vector<8x512xf32>
    %c2_78 = arith.constant 2 : index
    %c0_79 = arith.constant 0 : index
    %c512_80 = arith.constant 512 : index
    %194 = vector.load %arg12[%c2_78, %c0_79, %c512_80] : memref<8x8x1024xf32, #tpu.memory_space<vmem>>, vector<1x8x512xf32>
    %195 = vector.shape_cast %194 : vector<1x8x512xf32> to vector<8x512xf32>
    %196 = arith.addf %193, %195 : vector<8x512xf32>
    %197 = tpu.concatenate %192, %196 in 0 : vector<8x512xf32>, vector<8x512xf32> -> vector<16x512xf32>
    %198 = vector.extract_strided_slice %197 {offsets = [0, 0], sizes = [16, 384], strides = [1, 1]} : vector<16x512xf32> to vector<16x384xf32>
    %199 = arith.negf %198 : vector<16x384xf32>
    %200 = math.exp %199 : vector<16x384xf32>
    %cst_81 = arith.constant 1.000000e+00 : f32
    %201 = vector.broadcast %cst_81 : f32 to vector<16x384xf32>
    %202 = arith.addf %201, %200 : vector<16x384xf32>
    %203 = arith.divf %201, %202 : vector<16x384xf32>
    %204 = vector.extract_strided_slice %197 {offsets = [0, 384], sizes = [16, 128], strides = [1, 1]} : vector<16x512xf32> to vector<16x128xf32>
    %205 = math.tanh %204 : vector<16x128xf32>
    %206 = vector.extract_strided_slice %203 {offsets = [0, 0], sizes = [16, 128], strides = [1, 1]} : vector<16x384xf32> to vector<16x128xf32>
    %207 = vector.extract_strided_slice %203 {offsets = [0, 128], sizes = [16, 128], strides = [1, 1]} : vector<16x384xf32> to vector<16x128xf32>
    %208 = vector.extract_strided_slice %203 {offsets = [0, 256], sizes = [16, 128], strides = [1, 1]} : vector<16x384xf32> to vector<16x128xf32>
    %209 = arith.mulf %207, %177 : vector<16x128xf32>
    %210 = arith.mulf %206, %205 : vector<16x128xf32>
    %211 = arith.addf %209, %210 : vector<16x128xf32>
    %212 = math.tanh %211 : vector<16x128xf32>
    %213 = arith.mulf %208, %212 : vector<16x128xf32>
    %214 = vector.extract_strided_slice %213 {offsets = [0, 0], sizes = [8, 128], strides = [1, 1]} : vector<16x128xf32> to vector<8x128xf32>
    %c5_82 = arith.constant 5 : index
    %c0_83 = arith.constant 0 : index
    %c0_84 = arith.constant 0 : index
    %215 = vector.load %arg13[%c5_82, %c0_83, %c0_84] : memref<8x8x256xf32, #tpu.memory_space<vmem>>, vector<1x8x128xf32>
    %216 = vector.shape_cast %215 : vector<1x8x128xf32> to vector<8x128xf32>
    %217 = vector.shape_cast %214 : vector<8x128xf32> to vector<1x8x128xf32>
    tpu.vector_store %arg13[%c5_82, %c0_83, %c0_84], %217 {strides = array<i32>} : memref<8x8x256xf32, #tpu.memory_space<vmem>>, vector<1x8x128xf32>,
    %218 = vector.extract_strided_slice %213 {offsets = [8, 0], sizes = [8, 128], strides = [1, 1]} : vector<16x128xf32> to vector<8x128xf32>
    %c2_85 = arith.constant 2 : index
    %c0_86 = arith.constant 0 : index
    %c128_87 = arith.constant 128 : index
    %219 = vector.load %arg13[%c2_85, %c0_86, %c128_87] : memref<8x8x256xf32, #tpu.memory_space<vmem>>, vector<1x8x128xf32>
    %220 = vector.shape_cast %219 : vector<1x8x128xf32> to vector<8x128xf32>
    %221 = vector.shape_cast %218 : vector<8x128xf32> to vector<1x8x128xf32>
    tpu.vector_store %arg13[%c2_85, %c0_86, %c128_87], %221 {strides = array<i32>} : memref<8x8x256xf32, #tpu.memory_space<vmem>>, vector<1x8x128xf32>,
    %cst_88 = arith.constant dense<0.000000e+00> : vector<16x1024xf32>
    %222 = tpu.matmul %213, %15, %cst_88 {dimension_numbers = #tpu.dot_dimension_numbers<[1], [0], [0], [1], [0, 0, 1, 1], [], []>} : vector<16x128xf32>, vector<128x1024xf32>, vector<16x1024xf32> -> vector<16x1024xf32>
    %223 = vector.extract_strided_slice %222 {offsets = [0, 0], sizes = [8, 512], strides = [1, 1]} : vector<16x1024xf32> to vector<8x512xf32>
    %c6_89 = arith.constant 6 : index
    %c0_90 = arith.constant 0 : index
    %c0_91 = arith.constant 0 : index
    %224 = vector.load %arg12[%c6_89, %c0_90, %c0_91] : memref<8x8x1024xf32, #tpu.memory_space<vmem>>, vector<1x8x512xf32>
    %225 = vector.shape_cast %224 : vector<1x8x512xf32> to vector<8x512xf32>
    %226 = arith.addf %223, %225 : vector<8x512xf32>
    %227 = vector.extract_strided_slice %222 {offsets = [8, 512], sizes = [8, 512], strides = [1, 1]} : vector<16x1024xf32> to vector<8x512xf32>
    %c1_92 = arith.constant 1 : index
    %c0_93 = arith.constant 0 : index
    %c512_94 = arith.constant 512 : index
    %228 = vector.load %arg12[%c1_92, %c0_93, %c512_94] : memref<8x8x1024xf32, #tpu.memory_space<vmem>>, vector<1x8x512xf32>
    %229 = vector.shape_cast %228 : vector<1x8x512xf32> to vector<8x512xf32>
    %230 = arith.addf %227, %229 : vector<8x512xf32>
    %231 = tpu.concatenate %226, %230 in 0 : vector<8x512xf32>, vector<8x512xf32> -> vector<16x512xf32>
    %232 = vector.extract_strided_slice %231 {offsets = [0, 0], sizes = [16, 384], strides = [1, 1]} : vector<16x512xf32> to vector<16x384xf32>
    %233 = arith.negf %232 : vector<16x384xf32>
    %234 = math.exp %233 : vector<16x384xf32>
    %cst_95 = arith.constant 1.000000e+00 : f32
    %235 = vector.broadcast %cst_95 : f32 to vector<16x384xf32>
    %236 = arith.addf %235, %234 : vector<16x384xf32>
    %237 = arith.divf %235, %236 : vector<16x384xf32>
    %238 = vector.extract_strided_slice %231 {offsets = [0, 384], sizes = [16, 128], strides = [1, 1]} : vector<16x512xf32> to vector<16x128xf32>
    %239 = math.tanh %238 : vector<16x128xf32>
    %240 = vector.extract_strided_slice %237 {offsets = [0, 0], sizes = [16, 128], strides = [1, 1]} : vector<16x384xf32> to vector<16x128xf32>
    %241 = vector.extract_strided_slice %237 {offsets = [0, 128], sizes = [16, 128], strides = [1, 1]} : vector<16x384xf32> to vector<16x128xf32>
    %242 = vector.extract_strided_slice %237 {offsets = [0, 256], sizes = [16, 128], strides = [1, 1]} : vector<16x384xf32> to vector<16x128xf32>
    %243 = arith.mulf %241, %211 : vector<16x128xf32>
    %244 = arith.mulf %240, %239 : vector<16x128xf32>
    %245 = arith.addf %243, %244 : vector<16x128xf32>
    %246 = math.tanh %245 : vector<16x128xf32>
    %247 = arith.mulf %242, %246 : vector<16x128xf32>
    %248 = vector.extract_strided_slice %247 {offsets = [0, 0], sizes = [8, 128], strides = [1, 1]} : vector<16x128xf32> to vector<8x128xf32>
    %c6_96 = arith.constant 6 : index
    %c0_97 = arith.constant 0 : index
    %c0_98 = arith.constant 0 : index
    %249 = vector.load %arg13[%c6_96, %c0_97, %c0_98] : memref<8x8x256xf32, #tpu.memory_space<vmem>>, vector<1x8x128xf32>
    %250 = vector.shape_cast %249 : vector<1x8x128xf32> to vector<8x128xf32>
    %251 = vector.shape_cast %248 : vector<8x128xf32> to vector<1x8x128xf32>
    tpu.vector_store %arg13[%c6_96, %c0_97, %c0_98], %251 {strides = array<i32>} : memref<8x8x256xf32, #tpu.memory_space<vmem>>, vector<1x8x128xf32>,
    %252 = vector.extract_strided_slice %247 {offsets = [8, 0], sizes = [8, 128], strides = [1, 1]} : vector<16x128xf32> to vector<8x128xf32>
    %c1_99 = arith.constant 1 : index
    %c0_100 = arith.constant 0 : index
    %c128_101 = arith.constant 128 : index
    %253 = vector.load %arg13[%c1_99, %c0_100, %c128_101] : memref<8x8x256xf32, #tpu.memory_space<vmem>>, vector<1x8x128xf32>
    %254 = vector.shape_cast %253 : vector<1x8x128xf32> to vector<8x128xf32>
    %255 = vector.shape_cast %252 : vector<8x128xf32> to vector<1x8x128xf32>
    tpu.vector_store %arg13[%c1_99, %c0_100, %c128_101], %255 {strides = array<i32>} : memref<8x8x256xf32, #tpu.memory_space<vmem>>, vector<1x8x128xf32>,
    %cst_102 = arith.constant dense<0.000000e+00> : vector<16x1024xf32>
    %256 = tpu.matmul %247, %15, %cst_102 {dimension_numbers = #tpu.dot_dimension_numbers<[1], [0], [0], [1], [0, 0, 1, 1], [], []>} : vector<16x128xf32>, vector<128x1024xf32>, vector<16x1024xf32> -> vector<16x1024xf32>
    %257 = vector.extract_strided_slice %256 {offsets = [0, 0], sizes = [8, 512], strides = [1, 1]} : vector<16x1024xf32> to vector<8x512xf32>
    %c7_103 = arith.constant 7 : index
    %c0_104 = arith.constant 0 : index
    %c0_105 = arith.constant 0 : index
    %258 = vector.load %arg12[%c7_103, %c0_104, %c0_105] : memref<8x8x1024xf32, #tpu.memory_space<vmem>>, vector<1x8x512xf32>
    %259 = vector.shape_cast %258 : vector<1x8x512xf32> to vector<8x512xf32>
    %260 = arith.addf %257, %259 : vector<8x512xf32>
    %261 = vector.extract_strided_slice %256 {offsets = [8, 512], sizes = [8, 512], strides = [1, 1]} : vector<16x1024xf32> to vector<8x512xf32>
    %c0_106 = arith.constant 0 : index
    %c0_107 = arith.constant 0 : index
    %c512_108 = arith.constant 512 : index
    %262 = vector.load %arg12[%c0_106, %c0_107, %c512_108] : memref<8x8x1024xf32, #tpu.memory_space<vmem>>, vector<1x8x512xf32>
    %263 = vector.shape_cast %262 : vector<1x8x512xf32> to vector<8x512xf32>
    %264 = arith.addf %261, %263 : vector<8x512xf32>
    %265 = tpu.concatenate %260, %264 in 0 : vector<8x512xf32>, vector<8x512xf32> -> vector<16x512xf32>
    %266 = vector.extract_strided_slice %265 {offsets = [0, 0], sizes = [16, 384], strides = [1, 1]} : vector<16x512xf32> to vector<16x384xf32>
    %267 = arith.negf %266 : vector<16x384xf32>
    %268 = math.exp %267 : vector<16x384xf32>
    %cst_109 = arith.constant 1.000000e+00 : f32
    %269 = vector.broadcast %cst_109 : f32 to vector<16x384xf32>
    %270 = arith.addf %269, %268 : vector<16x384xf32>
    %271 = arith.divf %269, %270 : vector<16x384xf32>
    %272 = vector.extract_strided_slice %265 {offsets = [0, 384], sizes = [16, 128], strides = [1, 1]} : vector<16x512xf32> to vector<16x128xf32>
    %273 = math.tanh %272 : vector<16x128xf32>
    %274 = vector.extract_strided_slice %271 {offsets = [0, 0], sizes = [16, 128], strides = [1, 1]} : vector<16x384xf32> to vector<16x128xf32>
    %275 = vector.extract_strided_slice %271 {offsets = [0, 128], sizes = [16, 128], strides = [1, 1]} : vector<16x384xf32> to vector<16x128xf32>
    %276 = vector.extract_strided_slice %271 {offsets = [0, 256], sizes = [16, 128], strides = [1, 1]} : vector<16x384xf32> to vector<16x128xf32>
    %277 = arith.mulf %275, %245 : vector<16x128xf32>
    %278 = arith.mulf %274, %273 : vector<16x128xf32>
    %279 = arith.addf %277, %278 : vector<16x128xf32>
    %280 = math.tanh %279 : vector<16x128xf32>
    %281 = arith.mulf %276, %280 : vector<16x128xf32>
    %282 = vector.extract_strided_slice %281 {offsets = [0, 0], sizes = [8, 128], strides = [1, 1]} : vector<16x128xf32> to vector<8x128xf32>
    %c7_110 = arith.constant 7 : index
    %c0_111 = arith.constant 0 : index
    %c0_112 = arith.constant 0 : index
    %283 = vector.load %arg13[%c7_110, %c0_111, %c0_112] : memref<8x8x256xf32, #tpu.memory_space<vmem>>, vector<1x8x128xf32>
    %284 = vector.shape_cast %283 : vector<1x8x128xf32> to vector<8x128xf32>
    %285 = vector.shape_cast %282 : vector<8x128xf32> to vector<1x8x128xf32>
    tpu.vector_store %arg13[%c7_110, %c0_111, %c0_112], %285 {strides = array<i32>} : memref<8x8x256xf32, #tpu.memory_space<vmem>>, vector<1x8x128xf32>,
    %286 = vector.extract_strided_slice %281 {offsets = [8, 0], sizes = [8, 128], strides = [1, 1]} : vector<16x128xf32> to vector<8x128xf32>
    %c0_113 = arith.constant 0 : index
    %c0_114 = arith.constant 0 : index
    %c128_115 = arith.constant 128 : index
    %287 = vector.load %arg13[%c0_113, %c0_114, %c128_115] : memref<8x8x256xf32, #tpu.memory_space<vmem>>, vector<1x8x128xf32>
    %288 = vector.shape_cast %287 : vector<1x8x128xf32> to vector<8x128xf32>
    %289 = vector.shape_cast %286 : vector<8x128xf32> to vector<1x8x128xf32>
    tpu.vector_store %arg13[%c0_113, %c0_114, %c128_115], %289 {strides = array<i32>} : memref<8x8x256xf32, #tpu.memory_space<vmem>>, vector<1x8x128xf32>,
    %c0_i32_116 = arith.constant 0 : i32
    %290 = tpu.memref_slice %arg18[%c0_i32_116] : memref<3x!tpu.dma_semaphore, #tpu.memory_space<semaphore_mem>> -> memref<1x!tpu.dma_semaphore, #tpu.memory_space<semaphore_mem>>
    %291 = tpu.memref_squeeze %290 : memref<1x!tpu.dma_semaphore, #tpu.memory_space<semaphore_mem>> -> memref<!tpu.dma_semaphore, #tpu.memory_space<semaphore_mem>>
    tpu.wait_dma2 semaphore(%291 : memref<!tpu.dma_semaphore, #tpu.memory_space<semaphore_mem>>) src(%arg4 : memref<256x512xf32, #tpu.memory_space<any>>) dst(%arg15 : memref<256x512xf32, #tpu.memory_space<vmem>>)
    %c1_i32_117 = arith.constant 1 : i32
    %292 = tpu.memref_slice %arg18[%c1_i32_117] : memref<3x!tpu.dma_semaphore, #tpu.memory_space<semaphore_mem>> -> memref<1x!tpu.dma_semaphore, #tpu.memory_space<semaphore_mem>>
    %293 = tpu.memref_squeeze %292 : memref<1x!tpu.dma_semaphore, #tpu.memory_space<semaphore_mem>> -> memref<!tpu.dma_semaphore, #tpu.memory_space<semaphore_mem>>
    tpu.wait_dma2 semaphore(%293 : memref<!tpu.dma_semaphore, #tpu.memory_space<semaphore_mem>>) src(%arg5 : memref<256x512xf32, #tpu.memory_space<any>>) dst(%arg16 : memref<256x512xf32, #tpu.memory_space<vmem>>)
    %c2_i32_118 = arith.constant 2 : i32
    %294 = tpu.memref_slice %arg18[%c2_i32_118] : memref<3x!tpu.dma_semaphore, #tpu.memory_space<semaphore_mem>> -> memref<1x!tpu.dma_semaphore, #tpu.memory_space<semaphore_mem>>
    %295 = tpu.memref_squeeze %294 : memref<1x!tpu.dma_semaphore, #tpu.memory_space<semaphore_mem>> -> memref<!tpu.dma_semaphore, #tpu.memory_space<semaphore_mem>>
    tpu.wait_dma2 semaphore(%295 : memref<!tpu.dma_semaphore, #tpu.memory_space<semaphore_mem>>) src(%arg6 : memref<128x512xf32, #tpu.memory_space<any>>) dst(%arg17 : memref<128x512xf32, #tpu.memory_space<vmem>>)
    %c0_119 = arith.constant 0 : index
    %c0_120 = arith.constant 0 : index
    %c0_121 = arith.constant 0 : index
    %296 = vector.load %arg13[%c0_119, %c0_120, %c0_121] : memref<8x8x256xf32, #tpu.memory_space<vmem>>, vector<8x8x256xf32>
    %297 = vector.shape_cast %296 : vector<8x8x256xf32> to vector<64x256xf32>
    %c0_122 = arith.constant 0 : index
    %c0_123 = arith.constant 0 : index
    %298 = vector.load %arg15[%c0_122, %c0_123] : memref<256x512xf32, #tpu.memory_space<vmem>>, vector<256x512xf32>
    %cst_124 = arith.constant dense<0.000000e+00> : vector<64x512xf32>
    %299 = tpu.matmul %297, %298, %cst_124 {dimension_numbers = #tpu.dot_dimension_numbers<[1], [0], [0], [1], [0, 0, 1, 1], [], []>} : vector<64x256xf32>, vector<256x512xf32>, vector<64x512xf32> -> vector<64x512xf32>
    %c0_125 = arith.constant 0 : index
    %c0_126 = arith.constant 0 : index
    %300 = vector.load %arg7[%c0_125, %c0_126] : memref<1x512xf32, #tpu.memory_space<vmem>>, vector<1x512xf32>
    %301 = vector.broadcast %300 : vector<1x512xf32> to vector<64x512xf32>
    %302 = arith.addf %299, %301 : vector<64x512xf32>
    %303 = vector.shape_cast %302 : vector<64x512xf32> to vector<8x8x512xf32>
    %c0_127 = arith.constant 0 : index
    %c0_128 = arith.constant 0 : index
    %c0_129 = arith.constant 0 : index
    %304 = vector.load %arg14[%c0_127, %c0_128, %c0_129] : memref<8x8x512xf32, #tpu.memory_space<vmem>>, vector<8x8x512xf32>
    tpu.vector_store %arg14[%c0_127, %c0_128, %c0_129], %303 {strides = array<i32>} : memref<8x8x512xf32, #tpu.memory_space<vmem>>, vector<8x8x512xf32>,
    %c7_130 = arith.constant 7 : index
    %c0_131 = arith.constant 0 : index
    %c0_132 = arith.constant 0 : index
    %305 = vector.load %arg13[%c7_130, %c0_131, %c0_132] : memref<8x8x256xf32, #tpu.memory_space<vmem>>, vector<1x8x256xf32>
    %306 = vector.shape_cast %305 : vector<1x8x256xf32> to vector<8x256xf32>
    %c0_133 = arith.constant 0 : index
    %c0_134 = arith.constant 0 : index
    %307 = vector.load %arg16[%c0_133, %c0_134] : memref<256x512xf32, #tpu.memory_space<vmem>>, vector<256x512xf32>
    %cst_135 = arith.constant dense<0.000000e+00> : vector<8x512xf32>
    %308 = tpu.matmul %306, %307, %cst_135 {dimension_numbers = #tpu.dot_dimension_numbers<[1], [0], [0], [1], [0, 0, 1, 1], [], []>} : vector<8x256xf32>, vector<256x512xf32>, vector<8x512xf32> -> vector<8x512xf32>
    %c0_136 = arith.constant 0 : index
    %c0_137 = arith.constant 0 : index
    %309 = vector.load %arg8[%c0_136, %c0_137] : memref<1x512xf32, #tpu.memory_space<vmem>>, vector<1x512xf32>
    %310 = vector.broadcast %309 : vector<1x512xf32> to vector<8x512xf32>
    %311 = arith.addf %308, %310 : vector<8x512xf32>
    %c0_138 = arith.constant 0 : index
    %c0_139 = arith.constant 0 : index
    %312 = vector.load %arg17[%c0_138, %c0_139] : memref<128x512xf32, #tpu.memory_space<vmem>>, vector<128x512xf32>
    %cst_140 = arith.constant 0.000000e+00 : f32
    %313 = vector.broadcast %cst_140 : f32 to vector<8x128xf32>
    %cst_141 = arith.constant 0.000000e+00 : f32
    %314 = vector.broadcast %cst_141 : f32 to vector<8x128xf32>
    %cst_142 = arith.constant dense<0.000000e+00> : vector<8x512xf32>
    %315 = tpu.matmul %313, %312, %cst_142 {dimension_numbers = #tpu.dot_dimension_numbers<[1], [0], [0], [1], [0, 0, 1, 1], [], []>} : vector<8x128xf32>, vector<128x512xf32>, vector<8x512xf32> -> vector<8x512xf32>
    %c0_143 = arith.constant 0 : index
    %c0_144 = arith.constant 0 : index
    %c0_145 = arith.constant 0 : index
    %316 = vector.load %arg14[%c0_143, %c0_144, %c0_145] : memref<8x8x512xf32, #tpu.memory_space<vmem>>, vector<1x8x512xf32>
    %317 = vector.shape_cast %316 : vector<1x8x512xf32> to vector<8x512xf32>
    %318 = arith.addf %315, %317 : vector<8x512xf32>
    %319 = vector.extract_strided_slice %318 {offsets = [0, 0], sizes = [8, 384], strides = [1, 1]} : vector<8x512xf32> to vector<8x384xf32>
    %320 = arith.negf %319 : vector<8x384xf32>
    %321 = math.exp %320 : vector<8x384xf32>
    %cst_146 = arith.constant 1.000000e+00 : f32
    %322 = vector.broadcast %cst_146 : f32 to vector<8x384xf32>
    %323 = arith.addf %322, %321 : vector<8x384xf32>
    %324 = arith.divf %322, %323 : vector<8x384xf32>
    %325 = vector.extract_strided_slice %318 {offsets = [0, 384], sizes = [8, 128], strides = [1, 1]} : vector<8x512xf32> to vector<8x128xf32>
    %326 = math.tanh %325 : vector<8x128xf32>
    %327 = vector.extract_strided_slice %324 {offsets = [0, 0], sizes = [8, 128], strides = [1, 1]} : vector<8x384xf32> to vector<8x128xf32>
    %328 = vector.extract_strided_slice %324 {offsets = [0, 128], sizes = [8, 128], strides = [1, 1]} : vector<8x384xf32> to vector<8x128xf32>
    %329 = vector.extract_strided_slice %324 {offsets = [0, 256], sizes = [8, 128], strides = [1, 1]} : vector<8x384xf32> to vector<8x128xf32>
    %330 = arith.mulf %328, %314 : vector<8x128xf32>
    %331 = arith.mulf %327, %326 : vector<8x128xf32>
    %332 = arith.addf %330, %331 : vector<8x128xf32>
    %333 = math.tanh %332 : vector<8x128xf32>
    %334 = arith.mulf %329, %333 : vector<8x128xf32>
    %cst_147 = arith.constant dense<0.000000e+00> : vector<8x512xf32>
    %335 = tpu.matmul %334, %312, %cst_147 {dimension_numbers = #tpu.dot_dimension_numbers<[1], [0], [0], [1], [0, 0, 1, 1], [], []>} : vector<8x128xf32>, vector<128x512xf32>, vector<8x512xf32> -> vector<8x512xf32>
    %c1_148 = arith.constant 1 : index
    %c0_149 = arith.constant 0 : index
    %c0_150 = arith.constant 0 : index
    %336 = vector.load %arg14[%c1_148, %c0_149, %c0_150] : memref<8x8x512xf32, #tpu.memory_space<vmem>>, vector<1x8x512xf32>
    %337 = vector.shape_cast %336 : vector<1x8x512xf32> to vector<8x512xf32>
    %338 = arith.addf %335, %337 : vector<8x512xf32>
    %339 = vector.extract_strided_slice %338 {offsets = [0, 0], sizes = [8, 384], strides = [1, 1]} : vector<8x512xf32> to vector<8x384xf32>
    %340 = arith.negf %339 : vector<8x384xf32>
    %341 = math.exp %340 : vector<8x384xf32>
    %cst_151 = arith.constant 1.000000e+00 : f32
    %342 = vector.broadcast %cst_151 : f32 to vector<8x384xf32>
    %343 = arith.addf %342, %341 : vector<8x384xf32>
    %344 = arith.divf %342, %343 : vector<8x384xf32>
    %345 = vector.extract_strided_slice %338 {offsets = [0, 384], sizes = [8, 128], strides = [1, 1]} : vector<8x512xf32> to vector<8x128xf32>
    %346 = math.tanh %345 : vector<8x128xf32>
    %347 = vector.extract_strided_slice %344 {offsets = [0, 0], sizes = [8, 128], strides = [1, 1]} : vector<8x384xf32> to vector<8x128xf32>
    %348 = vector.extract_strided_slice %344 {offsets = [0, 128], sizes = [8, 128], strides = [1, 1]} : vector<8x384xf32> to vector<8x128xf32>
    %349 = vector.extract_strided_slice %344 {offsets = [0, 256], sizes = [8, 128], strides = [1, 1]} : vector<8x384xf32> to vector<8x128xf32>
    %350 = arith.mulf %348, %332 : vector<8x128xf32>
    %351 = arith.mulf %347, %346 : vector<8x128xf32>
    %352 = arith.addf %350, %351 : vector<8x128xf32>
    %353 = math.tanh %352 : vector<8x128xf32>
    %354 = arith.mulf %349, %353 : vector<8x128xf32>
    %cst_152 = arith.constant dense<0.000000e+00> : vector<8x512xf32>
    %355 = tpu.matmul %354, %312, %cst_152 {dimension_numbers = #tpu.dot_dimension_numbers<[1], [0], [0], [1], [0, 0, 1, 1], [], []>} : vector<8x128xf32>, vector<128x512xf32>, vector<8x512xf32> -> vector<8x512xf32>
    %c2_153 = arith.constant 2 : index
    %c0_154 = arith.constant 0 : index
    %c0_155 = arith.constant 0 : index
    %356 = vector.load %arg14[%c2_153, %c0_154, %c0_155] : memref<8x8x512xf32, #tpu.memory_space<vmem>>, vector<1x8x512xf32>
    %357 = vector.shape_cast %356 : vector<1x8x512xf32> to vector<8x512xf32>
    %358 = arith.addf %355, %357 : vector<8x512xf32>
    %359 = vector.extract_strided_slice %358 {offsets = [0, 0], sizes = [8, 384], strides = [1, 1]} : vector<8x512xf32> to vector<8x384xf32>
    %360 = arith.negf %359 : vector<8x384xf32>
    %361 = math.exp %360 : vector<8x384xf32>
    %cst_156 = arith.constant 1.000000e+00 : f32
    %362 = vector.broadcast %cst_156 : f32 to vector<8x384xf32>
    %363 = arith.addf %362, %361 : vector<8x384xf32>
    %364 = arith.divf %362, %363 : vector<8x384xf32>
    %365 = vector.extract_strided_slice %358 {offsets = [0, 384], sizes = [8, 128], strides = [1, 1]} : vector<8x512xf32> to vector<8x128xf32>
    %366 = math.tanh %365 : vector<8x128xf32>
    %367 = vector.extract_strided_slice %364 {offsets = [0, 0], sizes = [8, 128], strides = [1, 1]} : vector<8x384xf32> to vector<8x128xf32>
    %368 = vector.extract_strided_slice %364 {offsets = [0, 128], sizes = [8, 128], strides = [1, 1]} : vector<8x384xf32> to vector<8x128xf32>
    %369 = vector.extract_strided_slice %364 {offsets = [0, 256], sizes = [8, 128], strides = [1, 1]} : vector<8x384xf32> to vector<8x128xf32>
    %370 = arith.mulf %368, %352 : vector<8x128xf32>
    %371 = arith.mulf %367, %366 : vector<8x128xf32>
    %372 = arith.addf %370, %371 : vector<8x128xf32>
    %373 = math.tanh %372 : vector<8x128xf32>
    %374 = arith.mulf %369, %373 : vector<8x128xf32>
    %cst_157 = arith.constant dense<0.000000e+00> : vector<8x512xf32>
    %375 = tpu.matmul %374, %312, %cst_157 {dimension_numbers = #tpu.dot_dimension_numbers<[1], [0], [0], [1], [0, 0, 1, 1], [], []>} : vector<8x128xf32>, vector<128x512xf32>, vector<8x512xf32> -> vector<8x512xf32>
    %c3_158 = arith.constant 3 : index
    %c0_159 = arith.constant 0 : index
    %c0_160 = arith.constant 0 : index
    %376 = vector.load %arg14[%c3_158, %c0_159, %c0_160] : memref<8x8x512xf32, #tpu.memory_space<vmem>>, vector<1x8x512xf32>
    %377 = vector.shape_cast %376 : vector<1x8x512xf32> to vector<8x512xf32>
    %378 = arith.addf %375, %377 : vector<8x512xf32>
    %379 = vector.extract_strided_slice %378 {offsets = [0, 0], sizes = [8, 384], strides = [1, 1]} : vector<8x512xf32> to vector<8x384xf32>
    %380 = arith.negf %379 : vector<8x384xf32>
    %381 = math.exp %380 : vector<8x384xf32>
    %cst_161 = arith.constant 1.000000e+00 : f32
    %382 = vector.broadcast %cst_161 : f32 to vector<8x384xf32>
    %383 = arith.addf %382, %381 : vector<8x384xf32>
    %384 = arith.divf %382, %383 : vector<8x384xf32>
    %385 = vector.extract_strided_slice %378 {offsets = [0, 384], sizes = [8, 128], strides = [1, 1]} : vector<8x512xf32> to vector<8x128xf32>
    %386 = math.tanh %385 : vector<8x128xf32>
    %387 = vector.extract_strided_slice %384 {offsets = [0, 0], sizes = [8, 128], strides = [1, 1]} : vector<8x384xf32> to vector<8x128xf32>
    %388 = vector.extract_strided_slice %384 {offsets = [0, 128], sizes = [8, 128], strides = [1, 1]} : vector<8x384xf32> to vector<8x128xf32>
    %389 = vector.extract_strided_slice %384 {offsets = [0, 256], sizes = [8, 128], strides = [1, 1]} : vector<8x384xf32> to vector<8x128xf32>
    %390 = arith.mulf %388, %372 : vector<8x128xf32>
    %391 = arith.mulf %387, %386 : vector<8x128xf32>
    %392 = arith.addf %390, %391 : vector<8x128xf32>
    %393 = math.tanh %392 : vector<8x128xf32>
    %394 = arith.mulf %389, %393 : vector<8x128xf32>
    %cst_162 = arith.constant dense<0.000000e+00> : vector<8x512xf32>
    %395 = tpu.matmul %394, %312, %cst_162 {dimension_numbers = #tpu.dot_dimension_numbers<[1], [0], [0], [1], [0, 0, 1, 1], [], []>} : vector<8x128xf32>, vector<128x512xf32>, vector<8x512xf32> -> vector<8x512xf32>
    %c4_163 = arith.constant 4 : index
    %c0_164 = arith.constant 0 : index
    %c0_165 = arith.constant 0 : index
    %396 = vector.load %arg14[%c4_163, %c0_164, %c0_165] : memref<8x8x512xf32, #tpu.memory_space<vmem>>, vector<1x8x512xf32>
    %397 = vector.shape_cast %396 : vector<1x8x512xf32> to vector<8x512xf32>
    %398 = arith.addf %395, %397 : vector<8x512xf32>
    %399 = vector.extract_strided_slice %398 {offsets = [0, 0], sizes = [8, 384], strides = [1, 1]} : vector<8x512xf32> to vector<8x384xf32>
    %400 = arith.negf %399 : vector<8x384xf32>
    %401 = math.exp %400 : vector<8x384xf32>
    %cst_166 = arith.constant 1.000000e+00 : f32
    %402 = vector.broadcast %cst_166 : f32 to vector<8x384xf32>
    %403 = arith.addf %402, %401 : vector<8x384xf32>
    %404 = arith.divf %402, %403 : vector<8x384xf32>
    %405 = vector.extract_strided_slice %398 {offsets = [0, 384], sizes = [8, 128], strides = [1, 1]} : vector<8x512xf32> to vector<8x128xf32>
    %406 = math.tanh %405 : vector<8x128xf32>
    %407 = vector.extract_strided_slice %404 {offsets = [0, 0], sizes = [8, 128], strides = [1, 1]} : vector<8x384xf32> to vector<8x128xf32>
    %408 = vector.extract_strided_slice %404 {offsets = [0, 128], sizes = [8, 128], strides = [1, 1]} : vector<8x384xf32> to vector<8x128xf32>
    %409 = vector.extract_strided_slice %404 {offsets = [0, 256], sizes = [8, 128], strides = [1, 1]} : vector<8x384xf32> to vector<8x128xf32>
    %410 = arith.mulf %408, %392 : vector<8x128xf32>
    %411 = arith.mulf %407, %406 : vector<8x128xf32>
    %412 = arith.addf %410, %411 : vector<8x128xf32>
    %413 = math.tanh %412 : vector<8x128xf32>
    %414 = arith.mulf %409, %413 : vector<8x128xf32>
    %cst_167 = arith.constant dense<0.000000e+00> : vector<8x512xf32>
    %415 = tpu.matmul %414, %312, %cst_167 {dimension_numbers = #tpu.dot_dimension_numbers<[1], [0], [0], [1], [0, 0, 1, 1], [], []>} : vector<8x128xf32>, vector<128x512xf32>, vector<8x512xf32> -> vector<8x512xf32>
    %c5_168 = arith.constant 5 : index
    %c0_169 = arith.constant 0 : index
    %c0_170 = arith.constant 0 : index
    %416 = vector.load %arg14[%c5_168, %c0_169, %c0_170] : memref<8x8x512xf32, #tpu.memory_space<vmem>>, vector<1x8x512xf32>
    %417 = vector.shape_cast %416 : vector<1x8x512xf32> to vector<8x512xf32>
    %418 = arith.addf %415, %417 : vector<8x512xf32>
    %419 = vector.extract_strided_slice %418 {offsets = [0, 0], sizes = [8, 384], strides = [1, 1]} : vector<8x512xf32> to vector<8x384xf32>
    %420 = arith.negf %419 : vector<8x384xf32>
    %421 = math.exp %420 : vector<8x384xf32>
    %cst_171 = arith.constant 1.000000e+00 : f32
    %422 = vector.broadcast %cst_171 : f32 to vector<8x384xf32>
    %423 = arith.addf %422, %421 : vector<8x384xf32>
    %424 = arith.divf %422, %423 : vector<8x384xf32>
    %425 = vector.extract_strided_slice %418 {offsets = [0, 384], sizes = [8, 128], strides = [1, 1]} : vector<8x512xf32> to vector<8x128xf32>
    %426 = math.tanh %425 : vector<8x128xf32>
    %427 = vector.extract_strided_slice %424 {offsets = [0, 0], sizes = [8, 128], strides = [1, 1]} : vector<8x384xf32> to vector<8x128xf32>
    %428 = vector.extract_strided_slice %424 {offsets = [0, 128], sizes = [8, 128], strides = [1, 1]} : vector<8x384xf32> to vector<8x128xf32>
    %429 = vector.extract_strided_slice %424 {offsets = [0, 256], sizes = [8, 128], strides = [1, 1]} : vector<8x384xf32> to vector<8x128xf32>
    %430 = arith.mulf %428, %412 : vector<8x128xf32>
    %431 = arith.mulf %427, %426 : vector<8x128xf32>
    %432 = arith.addf %430, %431 : vector<8x128xf32>
    %433 = math.tanh %432 : vector<8x128xf32>
    %434 = arith.mulf %429, %433 : vector<8x128xf32>
    %cst_172 = arith.constant dense<0.000000e+00> : vector<8x512xf32>
    %435 = tpu.matmul %434, %312, %cst_172 {dimension_numbers = #tpu.dot_dimension_numbers<[1], [0], [0], [1], [0, 0, 1, 1], [], []>} : vector<8x128xf32>, vector<128x512xf32>, vector<8x512xf32> -> vector<8x512xf32>
    %c6_173 = arith.constant 6 : index
    %c0_174 = arith.constant 0 : index
    %c0_175 = arith.constant 0 : index
    %436 = vector.load %arg14[%c6_173, %c0_174, %c0_175] : memref<8x8x512xf32, #tpu.memory_space<vmem>>, vector<1x8x512xf32>
    %437 = vector.shape_cast %436 : vector<1x8x512xf32> to vector<8x512xf32>
    %438 = arith.addf %435, %437 : vector<8x512xf32>
    %439 = vector.extract_strided_slice %438 {offsets = [0, 0], sizes = [8, 384], strides = [1, 1]} : vector<8x512xf32> to vector<8x384xf32>
    %440 = arith.negf %439 : vector<8x384xf32>
    %441 = math.exp %440 : vector<8x384xf32>
    %cst_176 = arith.constant 1.000000e+00 : f32
    %442 = vector.broadcast %cst_176 : f32 to vector<8x384xf32>
    %443 = arith.addf %442, %441 : vector<8x384xf32>
    %444 = arith.divf %442, %443 : vector<8x384xf32>
    %445 = vector.extract_strided_slice %438 {offsets = [0, 384], sizes = [8, 128], strides = [1, 1]} : vector<8x512xf32> to vector<8x128xf32>
    %446 = math.tanh %445 : vector<8x128xf32>
    %447 = vector.extract_strided_slice %444 {offsets = [0, 0], sizes = [8, 128], strides = [1, 1]} : vector<8x384xf32> to vector<8x128xf32>
    %448 = vector.extract_strided_slice %444 {offsets = [0, 128], sizes = [8, 128], strides = [1, 1]} : vector<8x384xf32> to vector<8x128xf32>
    %449 = vector.extract_strided_slice %444 {offsets = [0, 256], sizes = [8, 128], strides = [1, 1]} : vector<8x384xf32> to vector<8x128xf32>
    %450 = arith.mulf %448, %432 : vector<8x128xf32>
    %451 = arith.mulf %447, %446 : vector<8x128xf32>
    %452 = arith.addf %450, %451 : vector<8x128xf32>
    %453 = math.tanh %452 : vector<8x128xf32>
    %454 = arith.mulf %449, %453 : vector<8x128xf32>
    %cst_177 = arith.constant dense<0.000000e+00> : vector<8x512xf32>
    %455 = tpu.matmul %454, %312, %cst_177 {dimension_numbers = #tpu.dot_dimension_numbers<[1], [0], [0], [1], [0, 0, 1, 1], [], []>} : vector<8x128xf32>, vector<128x512xf32>, vector<8x512xf32> -> vector<8x512xf32>
    %c7_178 = arith.constant 7 : index
    %c0_179 = arith.constant 0 : index
    %c0_180 = arith.constant 0 : index
    %456 = vector.load %arg14[%c7_178, %c0_179, %c0_180] : memref<8x8x512xf32, #tpu.memory_space<vmem>>, vector<1x8x512xf32>
    %457 = vector.shape_cast %456 : vector<1x8x512xf32> to vector<8x512xf32>
    %458 = arith.addf %455, %457 : vector<8x512xf32>
    %459 = vector.extract_strided_slice %458 {offsets = [0, 0], sizes = [8, 384], strides = [1, 1]} : vector<8x512xf32> to vector<8x384xf32>
    %460 = arith.negf %459 : vector<8x384xf32>
    %461 = math.exp %460 : vector<8x384xf32>
    %cst_181 = arith.constant 1.000000e+00 : f32
    %462 = vector.broadcast %cst_181 : f32 to vector<8x384xf32>
    %463 = arith.addf %462, %461 : vector<8x384xf32>
    %464 = arith.divf %462, %463 : vector<8x384xf32>
    %465 = vector.extract_strided_slice %458 {offsets = [0, 384], sizes = [8, 128], strides = [1, 1]} : vector<8x512xf32> to vector<8x128xf32>
    %466 = math.tanh %465 : vector<8x128xf32>
    %467 = vector.extract_strided_slice %464 {offsets = [0, 0], sizes = [8, 128], strides = [1, 1]} : vector<8x384xf32> to vector<8x128xf32>
    %468 = vector.extract_strided_slice %464 {offsets = [0, 128], sizes = [8, 128], strides = [1, 1]} : vector<8x384xf32> to vector<8x128xf32>
    %469 = vector.extract_strided_slice %464 {offsets = [0, 256], sizes = [8, 128], strides = [1, 1]} : vector<8x384xf32> to vector<8x128xf32>
    %470 = arith.mulf %468, %452 : vector<8x128xf32>
    %471 = arith.mulf %467, %466 : vector<8x128xf32>
    %472 = arith.addf %470, %471 : vector<8x128xf32>
    %473 = math.tanh %472 : vector<8x128xf32>
    %474 = arith.mulf %469, %473 : vector<8x128xf32>
    %cst_182 = arith.constant 0.000000e+00 : f32
    %475 = vector.broadcast %cst_182 : f32 to vector<8x128xf32>
    %476 = vector.extract_strided_slice %311 {offsets = [0, 0], sizes = [8, 384], strides = [1, 1]} : vector<8x512xf32> to vector<8x384xf32>
    %477 = arith.negf %476 : vector<8x384xf32>
    %478 = math.exp %477 : vector<8x384xf32>
    %cst_183 = arith.constant 1.000000e+00 : f32
    %479 = vector.broadcast %cst_183 : f32 to vector<8x384xf32>
    %480 = arith.addf %479, %478 : vector<8x384xf32>
    %481 = arith.divf %479, %480 : vector<8x384xf32>
    %482 = vector.extract_strided_slice %311 {offsets = [0, 384], sizes = [8, 128], strides = [1, 1]} : vector<8x512xf32> to vector<8x128xf32>
    %483 = math.tanh %482 : vector<8x128xf32>
    %484 = vector.extract_strided_slice %481 {offsets = [0, 0], sizes = [8, 128], strides = [1, 1]} : vector<8x384xf32> to vector<8x128xf32>
    %485 = vector.extract_strided_slice %481 {offsets = [0, 128], sizes = [8, 128], strides = [1, 1]} : vector<8x384xf32> to vector<8x128xf32>
    %486 = vector.extract_strided_slice %481 {offsets = [0, 256], sizes = [8, 128], strides = [1, 1]} : vector<8x384xf32> to vector<8x128xf32>
    %487 = arith.mulf %485, %475 : vector<8x128xf32>
    %488 = arith.mulf %484, %483 : vector<8x128xf32>
    %489 = arith.addf %487, %488 : vector<8x128xf32>
    %490 = math.tanh %489 : vector<8x128xf32>
    %491 = arith.mulf %486, %490 : vector<8x128xf32>
    %492 = tpu.concatenate %474, %491 in 1 : vector<8x128xf32>, vector<8x128xf32> -> vector<8x256xf32>
    %c0_184 = arith.constant 0 : index
    %c0_185 = arith.constant 0 : index
    %493 = vector.load %arg9[%c0_184, %c0_185] : memref<256x10xf32, #tpu.memory_space<vmem>>, vector<256x10xf32>
    %cst_186 = arith.constant dense<0.000000e+00> : vector<8x10xf32>
    %494 = tpu.matmul %492, %493, %cst_186 {dimension_numbers = #tpu.dot_dimension_numbers<[1], [0], [0], [1], [0, 0, 1, 1], [], []>} : vector<8x256xf32>, vector<256x10xf32>, vector<8x10xf32> -> vector<8x10xf32>
    %c0_187 = arith.constant 0 : index
    %c0_188 = arith.constant 0 : index
    %495 = vector.load %arg10[%c0_187, %c0_188] : memref<1x10xf32, #tpu.memory_space<vmem>>, vector<1x10xf32>
    %496 = vector.broadcast %495 : vector<1x10xf32> to vector<8x10xf32>
    %497 = arith.addf %494, %496 : vector<8x10xf32>
    %c0_189 = arith.constant 0 : index
    %c0_190 = arith.constant 0 : index
    %498 = vector.load %arg11[%c0_189, %c0_190] : memref<8x10xf32, #tpu.memory_space<vmem>>, vector<8x10xf32>
    tpu.vector_store %arg11[%c0_189, %c0_190], %497 {strides = array<i32>} : memref<8x10xf32, #tpu.memory_space<vmem>>, vector<8x10xf32>,
    return
  }
}

</mosaic_0001>

<bundles_post_ra>
// kernel: brnn_forward.1
= control target key start
LH: loop header
LB: loop body
LE: loop exit
PB: predicated region body
PF: predicated region fallthrough
CT: control target
= control target key end

     0   :  { %16 = vsyncpa [#allocation10], 0  ;;  %s10806_s0 = inlined_call_operand.vmem [shape: f32[8,8,28], index: 0, kind: input, shape index: {}]   ;;  %s10807_s1 = inlined_call_operand.vmem [shape: f32[28,1024], index: 1, kind: input, shape index: {}]   ;;  %s10808_s2 = inlined_call_operand.hbm [shape: f32[128,1024], index: 2, kind: input, shape index: {}]   ;;  %s10809_s3 = inlined_call_operand.vmem [shape: f32[1,1024], index: 3, kind: input, shape index: {}]   ;;  %s10810_s4 = inlined_call_operand.hbm [shape: f32[256,512], index: 4, kind: input, shape index: {}]   ;;  %s10811_s5 = inlined_call_operand.hbm [shape: f32[256,512], index: 5, kind: input, shape index: {}]   ;;  %s10812_s6 = inlined_call_operand.hbm [shape: f32[128,512], index: 6, kind: input, shape index: {}]   ;;  %s10813_s7 = inlined_call_operand.vmem [shape: f32[1,512], index: 7, kind: input, shape index: {}]   ;;  %s10814_s8 = inlined_call_operand.vmem [shape: f32[1,512], index: 8, kind: input, shape index: {}]   ;;  %s10815_s9 = inlined_call_operand.vmem [shape: f32[256,10], index: 9, kind: input, shape index: {}]   ;;  %s10816_s10 = inlined_call_operand.vmem [shape: f32[1,10], index: 10, kind: input, shape index: {}]   ;;  %s10817_s11 = inlined_call_operand.hbm [shape: f32[8,10], index: 11, kind: output, shape index: {}]  }
   0x1   :  { %17 = vsyncpa [#allocation11], 0  ;;  %s8872_s17 = smov [#allocation9]   ;;  %s8752_s21 = scalar_lea.hbm %s10808_s2, 16384 }
   0x2   :  { %s27_s18 = sshll.u32 %s8872_s17, 4  ;;  %p8753_p0 = scmp.ne.s32.totalorder %s10808_s2, %s8752_s21  ;;  %s28_s18 = int_to_ptr.vmem [resolvable:$true] %s27_s18 }
   0x3   :  { %p8756_p1 = scmp.lt.u32.totalorder %s8752_s21, %s10808_s2 }
   0x5   :  { %p8758_p2 = pnand %p8756_p1, %p8753_p0 }
   0x7   :  { %8761 = shalt.err (!%p8758_p2)
}
   0x8   :  { %s8762_s26 = scalar_lea.vmem %s28_s18, 16384  ;;  %p8767_p4 = scmp.lt.s32.totalorder %s28_s18, %s28_s18 }
   0x9   :  { %p8763_p3 = scmp.ne.s32.totalorder %s28_s18, %s8762_s26  ;;  %p8768_p5 = scmp.lt.s32.totalorder %s8762_s26, %s8762_s26 }
   0xb   :  { %p8769_p6 = por %p8768_p5, %p8767_p4 }
   0xd   :  { %p8770_p7 = pnand %p8769_p6, %p8763_p3 }
   0xf   :  { %8773 = shalt.err (!%p8770_p7)
}
  0x10   :  { %s8873_s27 = smov 1024   ;;  %s8874_s28 = smov 64  }
  0x11   :  { %33 = dma.hbm_to_vmem [thread:$0]  %s10808_s2, 16384, %s28_s18, [#allocation10], %s8873_s27, %s8873_s27, %s8874_s28  }
  0x12   :  { %8862 = dma.done.wait [#allocation10], 16384  }
  0x13   :  { %8863 = vsyncadd [#allocation10], 4294950912  ;;  %v10822_v0 = vmov 0.0   ;;  %vm189_vm0 = vcmask 1043456   ;;  %v91_v1 = vld [vmem:[%s10807_s1 + $0x8] sm:$0xff]  ;;  %v90_v3 = vld [vmem:[%s10807_s1] sm:$0xff] }
  0x14   :  { %278 = vmatprep.mubr.f32.mxu0 %v10822_v0  ;;  %302 = vmatprep.mubr.f32.mxu1 %v10822_v0  ;;  %v99_v2 = vld [vmem:[%s10807_s1 + $0x48] sm:$0xff]  ;;  %v98_v5 = vld [vmem:[%s10807_s1 + $0x40] sm:$0xff]  ;;  %vm8876_vm1 = vmmov 1   ;;  %v93_v13 = vld [vmem:[%s10807_s1 + $0x18] sm:$0xff]  ;;  %vm164_vm3 = vcmask 228352   ;;  %s8878_s13 = smov [#allocation6]  }
  0x15   :  { %v6283_v4 = vpack.c.bf16 %v99_v2, %v91_v1  ;;  %v107_v6 = vld [vmem:[%s10807_s1 + $0x88] sm:$0xff]  ;;  %v6285_v8 = vpack.c.bf16 %v98_v5, %v90_v3  ;;  %vm8973_vm2 = vmpackc.low %vm189_vm0, %vm8876_vm1  ;;  %v106_v11 = vld [vmem:[%s10807_s1 + $0x80] sm:$0xff]  ;;  %s66_s14 = sshll.u32 %s8878_s13, 4  ;;  %s8774_s17 = scalar_lea.hbm %s10810_s4, 16384  ;;  %s67_s14 = int_to_ptr.vmem [resolvable:$true] %s66_s14 }
  0x16   :  { %v115_v7 = vld [vmem:[%s10807_s1 + $0xc8] sm:$0xf]  ;;  %v114_v12 = vld [vmem:[%s10807_s1 + $0xc0] sm:$0xf]  ;;  %v101_v14 = vld [vmem:[%s10807_s1 + $0x58] sm:$0xff]  ;;  %p8775_p8 = scmp.ne.s32.totalorder %s10810_s4, %s8774_s17  ;;  %p8778_p9 = scmp.lt.u32.totalorder %s8774_s17, %s10810_s4 }
  0x17   :  { %v6287_v9 = vpack.c.bf16 %v115_v7, %v107_v6  ;;  %6284 = vmatprep.subr.bf16.mxu0 %v6283_v4  ;;  %8147 = vmatprep.subr.bf16.mxu1 %v6283_v4  ;;  %v6290_v15 = vpack.c.bf16 %v114_v12, %v106_v11  ;;  %v92_v16 = vld [vmem:[%s10807_s1 + $0x10] sm:$0xff]  ;;  %v6293_v17 = vpack.c.bf16 %v101_v14, %v93_v13  ;;  %v95_v19 = vld [vmem:[%s10807_s1 + $0x28] sm:$0xff]  ;;  %v109_v22 = vld [vmem:[%s10807_s1 + $0x98] sm:$0xff] }
  0x18   :  { %6286 = vmatpush1.bf16.msra.mxu0 %v6285_v8  ;;  %8149 = vmatpush1.bf16.msra.mxu1 %v6285_v8  ;;  %v100_v18 = vld [vmem:[%s10807_s1 + $0x50] sm:$0xff]  ;;  %v103_v20 = vld [vmem:[%s10807_s1 + $0x68] sm:$0xff]  ;;  %v117_v23 = vld [vmem:[%s10807_s1 + $0xd8] sm:$0xf]  ;;  %p8780_p10 = pnand %p8778_p9, %p8775_p8 }
  0x19   :  { %6289 = vmatprep.subr.msk.bf16.mxu0 %vm8973_vm2, %v6287_v9  ;;  %8148 = vmatprep.subr.msk.bf16.mxu1 %vm8973_vm2, %v6287_v9  ;;  %v6303_v21 = vpack.c.bf16 %v103_v20, %v95_v19  ;;  %v94_v24 = vld [vmem:[%s10807_s1 + $0x20] sm:$0xff]  ;;  %v6295_v28 = vpack.c.bf16 %v100_v18, %v92_v16  ;;  %v6297_v29 = vpack.c.bf16 %v117_v23, %v109_v22  ;;  %v108_v30 = vld [vmem:[%s10807_s1 + $0x90] sm:$0xff]  ;;  %v111_v33 = vld [vmem:[%s10807_s1 + $0xa8] sm:$0xff] }
  0x1a   :  { %v102_v25 = vld [vmem:[%s10807_s1 + $0x60] sm:$0xff]  ;;  %v116_v31 = vld [vmem:[%s10807_s1 + $0xd0] sm:$0xf]  ;;  %v119_v34 = vld [vmem:[%s10807_s1 + $0xe8] sm:$0xf] }
  0x1b   :  { %v9024_v26 = vld [vmem:[%s10806_s0] sm:$0xff]  ;;  %v6305_v32 = vpack.c.bf16 %v102_v25, %v94_v24  ;;  %v97_v37 = vld [vmem:[%s10807_s1 + $0x38] sm:$0xff]  ;;  %v9063_v39 = vld [vmem:[%s10806_s0 + $0x8] sm:$0xff]  ;;  %v6300_v41 = vpack.c.bf16 %v116_v31, %v108_v30  ;;  %v6307_v42 = vpack.c.bf16 %v119_v34, %v111_v33 }
  0x1c   :  { %6292 = vmatpush1.bf16.msk.msra.mxu0 %vm8973_vm2, %v6290_v15  ;;  %8150 = vmatpush1.bf16.msk.msra.mxu1 %vm8973_vm2, %v6290_v15  ;;  %v9029_v27 = vld [vmem:[%s10806_s0 + $0x20] sm:$0xff]  ;;  %v105_v38 = vld [vmem:[%s10807_s1 + $0x78] sm:$0xff]  ;;  %v9068_v40 = vld [vmem:[%s10806_s0 + $0x28] sm:$0xff] }
  0x1d   :  { %6294 = vmatprep.subr.bf16.mxu1 %v6293_v17  ;;  %6304 = vmatprep.subr.bf16.mxu0 %v6303_v21  ;;  %v110_v35 = vld [vmem:[%s10807_s1 + $0xa0] sm:$0xff]  ;;  %v731_v44 = vld [vmem:[#allocation9 + $0x8] sm:$0xff]  ;;  %v6313_v46 = vpack.c.bf16 %v105_v38, %v97_v37  ;;  %v9082_v47 = vld [vmem:[%s10806_s0 + $0x10] sm:$0xff] }
  0x1e   :  { %v118_v36 = vld [vmem:[%s10807_s1 + $0xe0] sm:$0xf]  ;;  %v739_v45 = vld [vmem:[#allocation9 + $0x48] sm:$0xff]  ;;  %v9087_v48 = vld [vmem:[%s10806_s0 + $0x30] sm:$0xff] }
  0x1f   :  { %6131 = vmatmul.mubr.msk.f32.vlgmr.msra.gmra.mrb[0].mxu0 %vm164_vm3, %v9024_v26  ;;  %6135 = vmatmul.mubr.msk.f32.vlgmr.msra.gmra.mrb[0].mxu1 %vm164_vm3, %v9029_v27  ;;  %v6310_v43 = vpack.c.bf16 %v118_v36, %v110_v35  ;;  %v9093_v49 = vpack.c.bf16 %v739_v45, %v731_v44  ;;  %v9106_v50 = vld [vmem:[%s10806_s0 + $0x18] sm:$0xff]  ;;  %v730_v52 = vld [vmem:[#allocation9] sm:$0xff]  ;;  %v96_v54 = vld [vmem:[%s10807_s1 + $0x30] sm:$0xff] }
  0x20   :  { %6296 = vmatpush1.bf16.msra.mxu1 %v6295_v28  ;;  %284 = vmatprep.mubr.f32.mxu0 %v10822_v0  ;;  %v9111_v51 = vld [vmem:[%s10806_s0 + $0x38] sm:$0xff]  ;;  %v738_v53 = vld [vmem:[#allocation9 + $0x40] sm:$0xff]  ;;  %v104_v55 = vld [vmem:[%s10807_s1 + $0x70] sm:$0xff] }
  0x21   :  { %308 = vmatprep.mubr.f32.mxu1 %v10822_v0  ;;  %6299 = vmatprep.subr.msk.bf16.mxu1 %vm8973_vm2, %v6297_v29  ;;  %v747_v56 = vld [vmem:[#allocation9 + $0x88] sm:$0xff]  ;;  %v113_v58 = vld [vmem:[%s10807_s1 + $0xb8] sm:$0xff]  ;;  %v9132_v60 = vpack.c.bf16 %v738_v53, %v730_v52  ;;  %v6315_v61 = vpack.c.bf16 %v104_v55, %v96_v54  ;;  %v746_v62 = vld [vmem:[#allocation9 + $0x80] sm:$0xff] }
  0x22   :  { %6306 = vmatpush1.bf16.msra.mxu0 %v6305_v32  ;;  %v755_v57 = vld [vmem:[#allocation9 + $0xc8] sm:$0xff]  ;;  %v121_v59 = vld [vmem:[%s10807_s1 + $0xf8] sm:$0xf]  ;;  %v754_v63 = vld [vmem:[#allocation9 + $0xc0] sm:$0xff] }
  0x23   :  { %6132 = vmatmul.mubr.msk.f32.gmra.mrb[2].mxu0 %vm164_vm3, %v9063_v39  ;;  %6136 = vmatmul.mubr.msk.f32.gmra.mrb[2].mxu1 %vm164_vm3, %v9068_v40  ;;  %10919 = vst [vmem:[#allocation26_spill] sm:$0xff] %v9132_v60  ;;  %v9134_v1 = vpack.c.bf16 %v755_v57, %v747_v56  ;;  %v763_v2 = vld [vmem:[#allocation9 + $0x108] sm:$0xff]  ;;  %v6317_v4 = vpack.c.bf16 %v121_v59, %v113_v58  ;;  %v112_v5 = vld [vmem:[%s10807_s1 + $0xb0] sm:$0xff]  ;;  %v762_v9 = vld [vmem:[#allocation9 + $0x100] sm:$0xff] }
  0x24   :  { %290 = vmatprep.mubr.f32.mxu0 %v10822_v0  ;;  %314 = vmatprep.mubr.f32.mxu1 %v10822_v0  ;;  %v771_v3 = vld [vmem:[#allocation9 + $0x148] sm:$0xff]  ;;  %v120_v6 = vld [vmem:[%s10807_s1 + $0xf0] sm:$0xf]  ;;  %v9147_v7 = vpack.c.bf16 %v754_v63, %v746_v62  ;;  %v770_v11 = vld [vmem:[#allocation9 + $0x140] sm:$0xff] }
  0x25   :  { %6302 = vmatpush1.bf16.msk.msra.mxu1 %vm8973_vm2, %v6300_v41  ;;  %6309 = vmatprep.subr.msk.bf16.mxu0 %vm8973_vm2, %v6307_v42  ;;  %10920 = vst [vmem:[#allocation27_spill] sm:$0xff] %v9134_v1  ;;  %v9151_v8 = vpack.c.bf16 %v771_v3, %v763_v2  ;;  %v779_v12 = vld [vmem:[#allocation9 + $0x188] sm:$0xff]  ;;  %v6320_v14 = vpack.c.bf16 %v120_v6, %v112_v5  ;;  %v733_v15 = vld [vmem:[#allocation9 + $0x18] sm:$0xff]  ;;  %v778_v19 = vld [vmem:[#allocation9 + $0x180] sm:$0xff] }
  0x26   :  { %6312 = vmatpush1.bf16.msk.msra.mxu0 %vm8973_vm2, %v6310_v43  ;;  %6314 = vmatprep.subr.bf16.mxu1 %v6313_v46  ;;  %v787_v13 = vld [vmem:[#allocation9 + $0x1c8] sm:$0xff]  ;;  %v741_v16 = vld [vmem:[#allocation9 + $0x58] sm:$0xff]  ;;  %v9162_v17 = vpack.c.bf16 %v770_v11, %v762_v9  ;;  %v786_v20 = vld [vmem:[#allocation9 + $0x1c0] sm:$0xff] }
  0x27   :  { %6133 = vmatmul.mubr.msk.f32.gmra.mrb[4].mxu0 %vm164_vm3, %v9082_v47  ;;  %6137 = vmatmul.mubr.msk.f32.gmra.mrb[4].mxu1 %vm164_vm3, %v9087_v48  ;;  %10921 = vst [vmem:[#allocation28_spill] sm:$0xff] %v9151_v8  ;;  %v9166_v18 = vpack.c.bf16 %v787_v13, %v779_v12  ;;  %v795_v21 = vld [vmem:[#allocation9 + $0x208] sm:$0xff]  ;;  %v9170_v23 = vpack.c.bf16 %v741_v16, %v733_v15  ;;  %v794_v25 = vld [vmem:[#allocation9 + $0x200] sm:$0xff]  ;;  %v732_v57 = vld [vmem:[#allocation9 + $0x10] sm:$0xff] }
  0x28   :  { %296 = vmatprep.mubr.f32.mxu0 %v10822_v0  ;;  %320 = vmatprep.mubr.f32.mxu1 %v10822_v0  ;;  %10922 = vst [vmem:[#allocation29_spill] sm:$0xff] %v9162_v17  ;;  %v803_v22 = vld [vmem:[#allocation9 + $0x248] sm:$0xff]  ;;  %v9178_v24 = vpack.c.bf16 %v786_v20, %v778_v19  ;;  %v802_v28 = vld [vmem:[#allocation9 + $0x240] sm:$0xff]  ;;  %v740_v59 = vld [vmem:[#allocation9 + $0x50] sm:$0xff] }
  0x29   :  { %6324 = vmatprep.subr.bf16.mxu0 %v9093_v49  ;;  %10923 = vst [vmem:[#allocation30_spill] sm:$0xff] %v9166_v18  ;;  %v9182_v10 = vpack.c.bf16 %v803_v22, %v795_v21  ;;  %v811_v29 = vld [vmem:[#allocation9 + $0x288] sm:$0xff]  ;;  %v9191_v31 = vpack.c.bf16 %v802_v28, %v794_v25  ;;  %v810_v33 = vld [vmem:[#allocation9 + $0x280] sm:$0xff]  ;;  %v749_v63 = vld [vmem:[#allocation9 + $0x98] sm:$0xff]  ;;  %v9239_v5 = vpack.c.bf16 %v740_v59, %v732_v57 }
  0x2a   :  { %10924 = vst [vmem:[#allocation31_spill] sm:$0xff] %v9178_v24  ;;  %v819_v30 = vld [vmem:[#allocation9 + $0x2c8] sm:$0xff]  ;;  %v818_v34 = vld [vmem:[#allocation9 + $0x2c0] sm:$0xff]  ;;  %v757_v2 = vld [vmem:[#allocation9 + $0xd8] sm:$0xff] }
  0x2b   :  { %6134 = vmatmul.mubr.msk.f32.gmra.mrb[6].mxu0 %vm164_vm3, %v9106_v50  ;;  %6138 = vmatmul.mubr.msk.f32.gmra.mrb[6].mxu1 %vm164_vm3, %v9111_v51  ;;  %10925 = vst [vmem:[#allocation32_spill] sm:$0xff] %v9182_v10  ;;  %10926 = vst [vmem:[#allocation33_spill] sm:$0xff] %v9191_v31  ;;  %v9195_v32 = vpack.c.bf16 %v819_v30, %v811_v29  ;;  %v827_v35 = vld [vmem:[#allocation9 + $0x308] sm:$0xff]  ;;  %v9203_v37 = vpack.c.bf16 %v818_v34, %v810_v33  ;;  %v826_v41 = vld [vmem:[#allocation9 + $0x300] sm:$0xff] }
  0x2c   :  { %391 = vmatprep.mubr.f32.mxu1 %v10822_v0  ;;  %504 = vmatprep.mubr.f32.mxu0 %v10822_v0  ;;  %v835_v36 = vld [vmem:[#allocation9 + $0x348] sm:$0xff]  ;;  %v834_v42 = vld [vmem:[#allocation9 + $0x340] sm:$0xff]  ;;  %v748_v9 = vld [vmem:[#allocation9 + $0x90] sm:$0xff]  ;;  %v9245_v11 = vpack.c.bf16 %v757_v2, %v749_v63 }
  0x2d   :  { %10927 = vst [vmem:[#allocation34_spill] sm:$0xff] %v9195_v32  ;;  %10928 = vst [vmem:[#allocation35_spill] sm:$0xff] %v9203_v37  ;;  %v9207_v38 = vpack.c.bf16 %v835_v36, %v827_v35  ;;  %v843_v43 = vld [vmem:[#allocation9 + $0x388] sm:$0xff]  ;;  %v9215_v45 = vpack.c.bf16 %v834_v42, %v826_v41  ;;  %v842_v52 = vld [vmem:[#allocation9 + $0x380] sm:$0xff] }
  0x2e   :  { %v851_v44 = vld [vmem:[#allocation9 + $0x3c8] sm:$0xff]  ;;  %v850_v53 = vld [vmem:[#allocation9 + $0x3c0] sm:$0xff]  ;;  %v756_v12 = vld [vmem:[#allocation9 + $0xd0] sm:$0xff] }
  0x2f   :  { %6141 = vmatmul.mubr.msk.f32.vlgmr.msra.gmra.mrb[8].mxu1 %vm164_vm3, %v9024_v26  ;;  %6151 = vmatmul.mubr.msk.f32.vlgmr.msra.gmra.mrb[8].mxu0 %vm164_vm3, %v9024_v26  ;;  %10929 = vst [vmem:[#allocation36_spill] sm:$0xff] %v9207_v38  ;;  %10930 = vst [vmem:[#allocation37_spill] sm:$0xff] %v9215_v45  ;;  %v9219_v46 = vpack.c.bf16 %v851_v44, %v843_v43  ;;  %v735_v54 = vld [vmem:[#allocation9 + $0x28] sm:$0xff]  ;;  %v9227_v56 = vpack.c.bf16 %v850_v53, %v842_v52  ;;  %v742_v62 = vld [vmem:[#allocation9 + $0x60] sm:$0xff] }
  0x30   :  { %6326 = vmatpush1.bf16.msra.mxu0 %v9132_v60  ;;  %6316 = vmatpush1.bf16.msra.mxu1 %v6315_v61  ;;  %v743_v55 = vld [vmem:[#allocation9 + $0x68] sm:$0xff]  ;;  %v734_v61 = vld [vmem:[#allocation9 + $0x20] sm:$0xff]  ;;  %v765_v16 = vld [vmem:[#allocation9 + $0x118] sm:$0xff]  ;;  %v9254_v22 = vpack.c.bf16 %v756_v12, %v748_v9 }
  0x31   :  { %397 = vmatprep.mubr.f32.mxu1 %v10822_v0  ;;  %510 = vmatprep.mubr.f32.mxu0 %v10822_v0  ;;  %10931 = vst [vmem:[#allocation38_spill] sm:$0xff] %v9219_v46  ;;  %10932 = vst [vmem:[#allocation39_spill] sm:$0xff] %v9227_v56  ;;  %v9231_v58 = vpack.c.bf16 %v743_v55, %v735_v54  ;;  %v751_v3 = vld [vmem:[#allocation9 + $0xa8] sm:$0xff]  ;;  %v9241_v6 = vpack.c.bf16 %v742_v62, %v734_v61  ;;  %v750_v13 = vld [vmem:[#allocation9 + $0xa0] sm:$0xff] }
  0x32   :  { %6328 = vmatprep.subr.bf16.mxu0 %v9134_v1  ;;  %6319 = vmatprep.subr.msk.bf16.mxu1 %vm8973_vm2, %v6317_v4  ;;  %v759_v4 = vld [vmem:[#allocation9 + $0xe8] sm:$0xff]  ;;  %v773_v19 = vld [vmem:[#allocation9 + $0x158] sm:$0xff]  ;;  %10934 = vst [vmem:[#allocation41_spill] sm:$0xff] %v9254_v22  ;;  %v764_v28 = vld [vmem:[#allocation9 + $0x110] sm:$0xff] }
  0x33   :  { %6142 = vmatmul.mubr.msk.f32.gmra.mrb[10].mxu1 %vm164_vm3, %v9063_v39  ;;  %6152 = vmatmul.mubr.msk.f32.gmra.mrb[10].mxu0 %vm164_vm3, %v9063_v39  ;;  %10933 = vst [vmem:[#allocation40_spill] sm:$0xff] %v9231_v58  ;;  %v9247_v15 = vpack.c.bf16 %v759_v4, %v751_v3  ;;  %v767_v20 = vld [vmem:[#allocation9 + $0x128] sm:$0xff]  ;;  %v9260_v29 = vpack.c.bf16 %v773_v19, %v765_v16  ;;  %v766_v30 = vld [vmem:[#allocation9 + $0x120] sm:$0xff]  ;;  %v781_v35 = vld [vmem:[#allocation9 + $0x198] sm:$0xff] }
  0x34   :  { %6330 = vmatpush1.bf16.msra.mxu0 %v9147_v7  ;;  %403 = vmatprep.mubr.f32.mxu1 %v10822_v0  ;;  %v775_v21 = vld [vmem:[#allocation9 + $0x168] sm:$0xff]  ;;  %v774_v33 = vld [vmem:[#allocation9 + $0x160] sm:$0xff]  ;;  %v789_v36 = vld [vmem:[#allocation9 + $0x1d8] sm:$0xff] }
  0x35   :  { %516 = vmatprep.mubr.f32.mxu0 %v10822_v0  ;;  %6332 = vmatprep.subr.bf16.mxu0 %v9151_v8  ;;  %10935 = vst [vmem:[#allocation42_spill] sm:$0xff] %v9260_v29  ;;  %v9263_v34 = vpack.c.bf16 %v775_v21, %v767_v20  ;;  %v783_v41 = vld [vmem:[#allocation9 + $0x1a8] sm:$0xff]  ;;  %v9273_v44 = vpack.c.bf16 %v774_v33, %v766_v30  ;;  %v780_v52 = vld [vmem:[#allocation9 + $0x190] sm:$0xff]  ;;  %v782_v54 = vld [vmem:[#allocation9 + $0x1a0] sm:$0xff] }
  0x36   :  { %6322 = vmatpush1.bf16.msk.msra.mxu1 %vm8973_vm2, %v6320_v14  ;;  %v758_v14 = vld [vmem:[#allocation9 + $0xe0] sm:$0xff]  ;;  %v791_v42 = vld [vmem:[#allocation9 + $0x1e8] sm:$0xff]  ;;  %v9277_v53 = vpack.c.bf16 %v789_v36, %v781_v35  ;;  %v797_v59 = vld [vmem:[#allocation9 + $0x218] sm:$0xff] }
  0x37   :  { %6143 = vmatmul.mubr.msk.f32.gmra.mrb[12].mxu1 %vm164_vm3, %v9082_v47  ;;  %6153 = vmatmul.mubr.msk.f32.gmra.mrb[12].mxu0 %vm164_vm3, %v9082_v47  ;;  %v9256_v25 = vpack.c.bf16 %v758_v14, %v750_v13  ;;  %v790_v55 = vld [vmem:[#allocation9 + $0x1e0] sm:$0xff]  ;;  %v9280_v57 = vpack.c.bf16 %v791_v42, %v783_v41  ;;  %v805_v61 = vld [vmem:[#allocation9 + $0x258] sm:$0xff]  ;;  %v799_v62 = vld [vmem:[#allocation9 + $0x228] sm:$0xff] }
  0x38   :  { %6334 = vmatpush1.bf16.msra.mxu0 %v9162_v17  ;;  %409 = vmatprep.mubr.f32.mxu1 %v10822_v0  ;;  %10937 = vst [vmem:[#allocation44_spill] sm:$0xff] %v9277_v53  ;;  %v807_v63 = vld [vmem:[#allocation9 + $0x268] sm:$0xff]  ;;  %v9289_v3 = vpack.c.bf16 %v790_v55, %v782_v54  ;;  %v796_v4 = vld [vmem:[#allocation9 + $0x210] sm:$0xff]  ;;  %v9293_v9 = vpack.c.bf16 %v805_v61, %v797_v59  ;;  %v798_v13 = vld [vmem:[#allocation9 + $0x220] sm:$0xff] }
  0x39   :  { %522 = vmatprep.mubr.f32.mxu0 %v10822_v0  ;;  %6336 = vmatprep.subr.bf16.mxu0 %v9166_v18  ;;  %v804_v12 = vld [vmem:[#allocation9 + $0x250] sm:$0xff]  ;;  %v9296_v14 = vpack.c.bf16 %v807_v63, %v799_v62  ;;  %v813_v16 = vld [vmem:[#allocation9 + $0x298] sm:$0xff]  ;;  %v815_v20 = vld [vmem:[#allocation9 + $0x2a8] sm:$0xff] }
  0x3a   :  { %6356 = vmatprep.subr.bf16.mxu1 %v9170_v23  ;;  %10939 = vst [vmem:[#allocation46_spill] sm:$0xff] %v9293_v9  ;;  %v821_v19 = vld [vmem:[#allocation9 + $0x2d8] sm:$0xff]  ;;  %v823_v21 = vld [vmem:[#allocation9 + $0x2e8] sm:$0xff]  ;;  %v812_v30 = vld [vmem:[#allocation9 + $0x290] sm:$0xff] }
  0x3b   :  { %6144 = vmatmul.mubr.msk.f32.gmra.mrb[14].mxu1 %vm164_vm3, %v9106_v50  ;;  %6154 = vmatmul.mubr.msk.f32.gmra.mrb[14].mxu0 %vm164_vm3, %v9106_v50  ;;  %v9308_v33 = vpack.c.bf16 %v821_v19, %v813_v16  ;;  %v820_v35 = vld [vmem:[#allocation9 + $0x2d0] sm:$0xff]  ;;  %v814_v36 = vld [vmem:[#allocation9 + $0x2a0] sm:$0xff]  ;;  %v9311_v41 = vpack.c.bf16 %v823_v21, %v815_v20  ;;  %v829_v42 = vld [vmem:[#allocation9 + $0x318] sm:$0xff] }
  0x3c   :  { %6338 = vmatpush1.bf16.msra.mxu0 %v9178_v24  ;;  %415 = vmatprep.mubr.f32.mxu1 %v10822_v0  ;;  %v839_v54 = vld [vmem:[#allocation9 + $0x368] sm:$0xff]  ;;  %v9317_v55 = vpack.c.bf16 %v820_v35, %v812_v30  ;;  %v828_v61 = vld [vmem:[#allocation9 + $0x310] sm:$0xff] }
  0x3d   :  { %528 = vmatprep.mubr.f32.mxu0 %v10822_v0  ;;  %6340 = vmatprep.subr.bf16.mxu0 %v9182_v10  ;;  %10941 = vst [vmem:[#allocation48_spill] sm:$0xff] %v9308_v33  ;;  %v836_v63 = vld [vmem:[#allocation9 + $0x350] sm:$0xff]  ;;  %v847_v16 = vld [vmem:[#allocation9 + $0x3a8] sm:$0xff] }
  0x3e   :  { %10942 = vst [vmem:[#allocation49_spill] sm:$0xff] %v9317_v55  ;;  %v855_v19 = vld [vmem:[#allocation9 + $0x3e8] sm:$0xff]  ;;  %v9332_v20 = vpack.c.bf16 %v836_v63, %v828_v61  ;;  %v844_v30 = vld [vmem:[#allocation9 + $0x390] sm:$0xff] }
  0x3f   :  { %6145 = vmatmul.mubr.msk.f32.gmra.mrb[16].mxu1 %vm164_vm3, %v9029_v27  ;;  %6155 = vmatmul.mubr.msk.f32.gmra.mrb[16].mxu0 %vm164_vm3, %v9029_v27 }
  0x40   :  { %6342 = vmatpush1.bf16.msra.mxu0 %v9191_v31  ;;  %421 = vmatprep.mubr.f32.mxu1 %v10822_v0  ;;  %10944 = vst [vmem:[#allocation51_spill] sm:$0xff] %v9332_v20 }
  0x41   :  { %534 = vmatprep.mubr.f32.mxu0 %v10822_v0  ;;  %6344 = vmatprep.subr.bf16.mxu0 %v9195_v32 }
  0x43   :  { %6146 = vmatmul.mubr.msk.f32.gmra.mrb[18].mxu1 %vm164_vm3, %v9068_v40  ;;  %6156 = vmatmul.mubr.msk.f32.gmra.mrb[18].mxu0 %vm164_vm3, %v9068_v40 }
  0x44   :  { %6346 = vmatpush1.bf16.msra.mxu0 %v9203_v37  ;;  %427 = vmatprep.mubr.f32.mxu1 %v10822_v0 }
  0x45   :  { %540 = vmatprep.mubr.f32.mxu0 %v10822_v0  ;;  %6348 = vmatprep.subr.bf16.mxu0 %v9207_v38 }
  0x47   :  { %6147 = vmatmul.mubr.msk.f32.gmra.mrb[20].mxu1 %vm164_vm3, %v9087_v48  ;;  %6157 = vmatmul.mubr.msk.f32.gmra.mrb[20].mxu0 %vm164_vm3, %v9087_v48 }
  0x48   :  { %6350 = vmatpush1.bf16.msra.mxu0 %v9215_v45  ;;  %433 = vmatprep.mubr.f32.mxu1 %v10822_v0 }
  0x49   :  { %546 = vmatprep.mubr.f32.mxu0 %v10822_v0  ;;  %6352 = vmatprep.subr.bf16.mxu0 %v9219_v46 }
  0x4b   :  { %6148 = vmatmul.mubr.msk.f32.gmra.mrb[22].mxu1 %vm164_vm3, %v9111_v51  ;;  %6158 = vmatmul.mubr.msk.f32.gmra.mrb[22].mxu0 %vm164_vm3, %v9111_v51 }
  0x4c   :  { %6354 = vmatpush1.bf16.msra.mxu0 %v9227_v56  ;;  %617 = vmatprep.mubr.f32.mxu1 %v10822_v0 }
  0x4d   :  { %922 = vmatprep.mubr.f32.mxu0 %v10822_v0  ;;  %6388 = vmatprep.subr.bf16.mxu0 %v9231_v58 }
  0x4f   :  { %6161 = vmatmul.mubr.msk.f32.vlgmr.msra.gmra.mrb[24].mxu1 %vm164_vm3, %v9024_v26  ;;  %923 = vmatmul.mubr.f32.vlgmr.msra.gmra.mrb[0].mxu0 %v10822_v0  ;;  %v772_v26 = vld [vmem:[#allocation9 + $0x150] sm:$0xff] }
  0x50   :  { %6358 = vmatpush1.bf16.msra.mxu1 %v9239_v5  ;;  %6390 = vmatpush1.bf16.msra.mxu0 %v9241_v6  ;;  %v9271_v43 = vpack.c.bf16 %v772_v26, %v764_v28  ;;  %v9302_v28 = vpack.c.bf16 %v804_v12, %v796_v4  ;;  %v830_v4 = vld [vmem:[#allocation9 + $0x320] sm:$0xff] }
  0x51   :  { %623 = vmatprep.mubr.f32.mxu1 %v10822_v0  ;;  %6360 = vmatprep.subr.bf16.mxu1 %v9245_v11 }
  0x52   :  { %6392 = vmatprep.subr.bf16.mxu0 %v9247_v15  ;;  %928 = vmatprep.mubr.f32.mxu0 %v10822_v0  ;;  %10936 = vst [vmem:[#allocation43_spill] sm:$0xff] %v9271_v43  ;;  %10940 = vst [vmem:[#allocation47_spill] sm:$0xff] %v9302_v28 }
  0x53   :  { %6162 = vmatmul.mubr.msk.f32.gmra.mrb[26].mxu1 %vm164_vm3, %v9063_v39  ;;  %929 = vmatmul.mubr.f32.gmra.mrb[24].mxu0 %v10822_v0  ;;  %v788_v39 = vld [vmem:[#allocation9 + $0x1d0] sm:$0xff] }
  0x54   :  { %6362 = vmatpush1.bf16.msra.mxu1 %v9254_v22  ;;  %6394 = vmatpush1.bf16.msra.mxu0 %v9256_v25  ;;  %v9287_v2 = vpack.c.bf16 %v788_v39, %v780_v52  ;;  %v837_v52 = vld [vmem:[#allocation9 + $0x358] sm:$0xff]  ;;  %v831_v39 = vld [vmem:[#allocation9 + $0x328] sm:$0xff] }
  0x55   :  { %629 = vmatprep.mubr.f32.mxu1 %v10822_v0  ;;  %6364 = vmatprep.subr.bf16.mxu1 %v9260_v29  ;;  %v9323_v62 = vpack.c.bf16 %v837_v52, %v829_v42  ;;  %v9326_v12 = vpack.c.bf16 %v839_v54, %v831_v39  ;;  %v9341_v42 = vpack.c.bf16 %v855_v19, %v847_v16  ;;  %v737_v52 = vld [vmem:[#allocation9 + $0x38] sm:$0xff]  ;;  %v752_v19 = vld [vmem:[#allocation9 + $0xb0] sm:$0xff] }
  0x56   :  { %6396 = vmatprep.subr.bf16.mxu0 %v9263_v34  ;;  %1072 = vmatprep.mubr.f32.mxu0 %v10822_v0  ;;  %10938 = vst [vmem:[#allocation45_spill] sm:$0xff] %v9287_v2  ;;  %v745_v39 = vld [vmem:[#allocation9 + $0x78] sm:$0xff] }
  0x57   :  { %6163 = vmatmul.mubr.msk.f32.gmra.mrb[28].mxu1 %vm164_vm3, %v9082_v47  ;;  %v806_v47 = vld [vmem:[#allocation9 + $0x260] sm:$0xff]  ;;  %10943 = vst [vmem:[#allocation50_spill] sm:$0xff] %v9323_v62  ;;  %v9353_v63 = vpack.c.bf16 %v745_v39, %v737_v52  ;;  %v768_v52 = vld [vmem:[#allocation9 + $0x130] sm:$0xff] }
  0x58   :  { %6366 = vmatpush1.bf16.msra.mxu1 %v9271_v43  ;;  %6398 = vmatpush1.bf16.msra.mxu0 %v9273_v44  ;;  %v9304_v26 = vpack.c.bf16 %v806_v47, %v798_v13  ;;  %v845_v13 = vld [vmem:[#allocation9 + $0x398] sm:$0xff]  ;;  %v776_v39 = vld [vmem:[#allocation9 + $0x170] sm:$0xff] }
  0x59   :  { %635 = vmatprep.mubr.f32.mxu1 %v10822_v0  ;;  %6368 = vmatprep.subr.bf16.mxu1 %v9277_v53  ;;  %v853_v47 = vld [vmem:[#allocation9 + $0x3d8] sm:$0xff]  ;;  %10947 = vst [vmem:[#allocation54_spill] sm:$0xff] %v9353_v63 }
  0x5a   :  { %6400 = vmatprep.subr.bf16.mxu0 %v9280_v57  ;;  %v9338_v35 = vpack.c.bf16 %v853_v47, %v845_v13  ;;  %v753_v13 = vld [vmem:[#allocation9 + $0xb8] sm:$0xff] }
  0x5b   :  { %6164 = vmatmul.mubr.msk.f32.gmra.mrb[30].mxu1 %vm164_vm3, %v9106_v50  ;;  %v822_v50 = vld [vmem:[#allocation9 + $0x2e0] sm:$0xff] }
  0x5c   :  { %6370 = vmatpush1.bf16.msra.mxu1 %v9287_v2  ;;  %6402 = vmatpush1.bf16.msra.mxu0 %v9289_v3  ;;  %v9319_v59 = vpack.c.bf16 %v822_v50, %v814_v36  ;;  %10945 = vst [vmem:[#allocation52_spill] sm:$0xff] %v9338_v35  ;;  %v852_v36 = vld [vmem:[#allocation9 + $0x3d0] sm:$0xff]  ;;  %v846_v50 = vld [vmem:[#allocation9 + $0x3a0] sm:$0xff] }
  0x5d   :  { %641 = vmatprep.mubr.f32.mxu1 %v10822_v0  ;;  %6372 = vmatprep.subr.bf16.mxu1 %v9293_v9  ;;  %v9347_v54 = vpack.c.bf16 %v852_v36, %v844_v30  ;;  %v760_v30 = vld [vmem:[#allocation9 + $0xf0] sm:$0xff]  ;;  %v769_v36 = vld [vmem:[#allocation9 + $0x138] sm:$0xff] }
  0x5e   :  { %6404 = vmatprep.subr.bf16.mxu0 %v9296_v14 }
  0x5f   :  { %6165 = vmatmul.mubr.msk.f32.gmra.mrb[32].mxu1 %vm164_vm3, %v9029_v27  ;;  %v838_v27 = vld [vmem:[#allocation9 + $0x360] sm:$0xff]  ;;  %10946 = vst [vmem:[#allocation53_spill] sm:$0xff] %v9347_v54 }
  0x60   :  { %6374 = vmatpush1.bf16.msra.mxu1 %v9302_v28  ;;  %6406 = vmatpush1.bf16.msra.mxu0 %v9304_v26  ;;  %v9334_v21 = vpack.c.bf16 %v838_v27, %v830_v4  ;;  %v736_v4 = vld [vmem:[#allocation9 + $0x30] sm:$0xff] }
  0x61   :  { %647 = vmatprep.mubr.f32.mxu1 %v10822_v0  ;;  %6376 = vmatprep.subr.bf16.mxu1 %v9308_v33  ;;  %v744_v27 = vld [vmem:[#allocation9 + $0x70] sm:$0xff] }
  0x62   :  { %6408 = vmatprep.subr.bf16.mxu0 %v9311_v41  ;;  %v9360_v47 = vpack.c.bf16 %v744_v27, %v736_v4  ;;  %v785_v4 = vld [vmem:[#allocation9 + $0x1b8] sm:$0xff] }
  0x63   :  { %6166 = vmatmul.mubr.msk.f32.gmra.mrb[34].mxu1 %vm164_vm3, %v9068_v40  ;;  %v854_v40 = vld [vmem:[#allocation9 + $0x3e0] sm:$0xff]  ;;  %v793_v27 = vld [vmem:[#allocation9 + $0x1f8] sm:$0xff] }
  0x64   :  { %6378 = vmatpush1.bf16.msra.mxu1 %v9317_v55  ;;  %6410 = vmatpush1.bf16.msra.mxu0 %v9319_v59  ;;  %v9349_v61 = vpack.c.bf16 %v854_v40, %v846_v50  ;;  %v777_v50 = vld [vmem:[#allocation9 + $0x178] sm:$0xff] }
  0x65   :  { %653 = vmatprep.mubr.f32.mxu1 %v10822_v0  ;;  %6380 = vmatprep.subr.bf16.mxu1 %v9323_v62  ;;  %v9374_v40 = vpack.c.bf16 %v777_v50, %v769_v36  ;;  %v801_v36 = vld [vmem:[#allocation9 + $0x238] sm:$0xff] }
  0x66   :  { %6412 = vmatprep.subr.bf16.mxu0 %v9326_v12  ;;  %v809_v50 = vld [vmem:[#allocation9 + $0x278] sm:$0xff] }
  0x67   :  { %6167 = vmatmul.mubr.msk.f32.gmra.mrb[36].mxu1 %vm164_vm3, %v9087_v48  ;;  %v761_v48 = vld [vmem:[#allocation9 + $0xf8] sm:$0xff] }
  0x68   :  { %6382 = vmatpush1.bf16.msra.mxu1 %v9332_v20  ;;  %6414 = vmatpush1.bf16.msra.mxu0 %v9334_v21  ;;  %v9364_v16 = vpack.c.bf16 %v761_v48, %v753_v13  ;;  %v9381_v13 = vpack.c.bf16 %v776_v39, %v768_v52  ;;  %v9385_v48 = vpack.c.bf16 %v793_v27, %v785_v4  ;;  %v800_v4 = vld [vmem:[#allocation9 + $0x230] sm:$0xff] }
  0x69   :  { %659 = vmatprep.mubr.f32.mxu1 %v10822_v0  ;;  %6384 = vmatprep.subr.bf16.mxu1 %v9338_v35  ;;  %v9395_v39 = vpack.c.bf16 %v809_v50, %v801_v36  ;;  %v808_v27 = vld [vmem:[#allocation9 + $0x270] sm:$0xff]  ;;  %v833_v36 = vld [vmem:[#allocation9 + $0x338] sm:$0xff] }
  0x6a   :  { %6416 = vmatprep.subr.bf16.mxu0 %v9341_v42  ;;  %v841_v50 = vld [vmem:[#allocation9 + $0x378] sm:$0xff] }
  0x6b   :  { %6168 = vmatmul.mubr.msk.f32.gmra.mrb[38].mxu1 %vm164_vm3, %v9111_v51  ;;  %v9371_v51 = vpack.c.bf16 %v760_v30, %v752_v19  ;;  %v784_v19 = vld [vmem:[#allocation9 + $0x1b0] sm:$0xff] }
  0x6c   :  { %6386 = vmatpush1.bf16.msra.mxu1 %v9347_v54  ;;  %6418 = vmatpush1.bf16.msra.mxu0 %v9349_v61  ;;  %v792_v30 = vld [vmem:[#allocation9 + $0x1f0] sm:$0xff] }
  0x6d   :  { %997 = vmatprep.mubr.f32.mxu1 %v10822_v0  ;;  %6420 = vmatprep.subr.bf16.mxu1 %v9353_v63  ;;  %v9392_v52 = vpack.c.bf16 %v792_v30, %v784_v19  ;;  %v816_v30 = vld [vmem:[#allocation9 + $0x2b0] sm:$0xff] }
  0x6e   :  { %6452 = vmatprep.subr.bf16.mxu0 %v9093_v49 }
  0x6f   :  { %1073 = vmatmul.mubr.f32.vlgmr.msra.gmra.mrb[26].mxu0 %v10822_v0  ;;  %998 = vmatmul.mubr.f32.vlgmr.msra.gmra.mrb[8].mxu1 %v10822_v0 }
  0x70   :  { %6422 = vmatpush1.bf16.msra.mxu1 %v9360_v47  ;;  %1076 = vmatprep.mubr.f32.mxu0 %v10822_v0 }
  0x71   :  { %6424 = vmatprep.subr.bf16.mxu1 %v9364_v16  ;;  %1003 = vmatprep.mubr.f32.mxu1 %v10822_v0 }
  0x72   :  { %6454 = vmatpush1.bf16.msra.mxu0 %v9132_v60  ;;  %v817_v60 = vld [vmem:[#allocation9 + $0x2b8] sm:$0xff] }
  0x73   :  { %1077 = vmatmul.mubr.f32.gmra.mrb[22].mxu0 %v10822_v0  ;;  %1004 = vmatmul.mubr.f32.gmra.mrb[40].mxu1 %v10822_v0 }
  0x74   :  { %6426 = vmatpush1.bf16.msra.mxu1 %v9371_v51  ;;  %1147 = vmatprep.mubr.f32.mxu1 %v10822_v0 }
  0x75   :  { %6428 = vmatprep.subr.bf16.mxu1 %v9374_v40  ;;  %6456 = vmatprep.subr.bf16.mxu0 %v9134_v1  ;;  %v825_v1 = vld [vmem:[#allocation9 + $0x2f8] sm:$0xff] }
  0x76   :  { %6458 = vmatpush1.bf16.msra.mxu0 %v9147_v7  ;;  %1290 = vmatprep.mubr.f32.mxu0 %v10822_v0  ;;  %v9400_v0 = vpack.c.bf16 %v808_v27, %v800_v4  ;;  %v9403_v19 = vpack.c.bf16 %v825_v1, %v817_v60  ;;  %v9411_v4 = vpack.c.bf16 %v841_v50, %v833_v36  ;;  %v832_v27 = vld [vmem:[#allocation9 + $0x330] sm:$0xff]  ;;  %v849_v60 = vld [vmem:[#allocation9 + $0x3b8] sm:$0xff] }
  0x77   :  { %6460 = vmatprep.subr.bf16.mxu0 %v9151_v8  ;;  %v824_v8 = vld [vmem:[#allocation9 + $0x2f0] sm:$0xff]  ;;  %v857_v1 = vld [vmem:[#allocation9 + $0x3f8] sm:$0xff] }
  0x78   :  { %6430 = vmatpush1.bf16.msra.mxu1 %v9381_v13 }
  0x79   :  { %6432 = vmatprep.subr.bf16.mxu1 %v9385_v48 }
  0x7a   :  { %6462 = vmatpush1.bf16.msra.mxu0 %v9162_v17  ;;  %v9408_v17 = vpack.c.bf16 %v824_v8, %v816_v30  ;;  %v9419_v8 = vpack.c.bf16 %v857_v1, %v849_v60  ;;  %v848_v30 = vld [vmem:[#allocation9 + $0x3b0] sm:$0xff] }
  0x7b   :  { %6464 = vmatprep.subr.bf16.mxu0 %v9166_v18  ;;  %v840_v18 = vld [vmem:[#allocation9 + $0x370] sm:$0xff] }
  0x7c   :  { %6434 = vmatpush1.bf16.msra.mxu1 %v9392_v52 }
  0x7d   :  { %6436 = vmatprep.subr.bf16.mxu1 %v9395_v39 }
  0x7e   :  { %6466 = vmatpush1.bf16.msra.mxu0 %v9178_v24  ;;  %v9416_v24 = vpack.c.bf16 %v840_v18, %v832_v27  ;;  %v10948_v18 = vmov 0.0  }
  0x7f   :  { %6468 = vmatprep.subr.bf16.mxu0 %v9182_v10  ;;  %v856_v10 = vld [vmem:[#allocation9 + $0x3f0] sm:$0xff] }
  0x80   :  { %6438 = vmatpush1.bf16.msra.mxu1 %v9400_v0  ;;  %v9424_v36 = vpack.c.bf16 %v856_v10, %v848_v30 }
  0x81   :  { %6440 = vmatprep.subr.bf16.mxu1 %v9403_v19 }
  0x82   :  { %6470 = vmatpush1.bf16.msra.mxu0 %v9191_v31 }
  0x83   :  { %6472 = vmatprep.subr.bf16.mxu0 %v9195_v32 }
  0x84   :  { %6442 = vmatpush1.bf16.msra.mxu1 %v9408_v17 }
  0x85   :  { %6444 = vmatprep.subr.bf16.mxu1 %v9411_v4 }
  0x86   :  { %6474 = vmatpush1.bf16.msra.mxu0 %v9203_v37 }
  0x87   :  { %6476 = vmatprep.subr.bf16.mxu0 %v9207_v38 }
  0x88   :  { %6446 = vmatpush1.bf16.msra.mxu1 %v9416_v24 }
  0x89   :  { %6448 = vmatprep.subr.bf16.mxu1 %v9419_v8 }
  0x8a   :  { %6478 = vmatpush1.bf16.msra.mxu0 %v9215_v45 }
  0x8b   :  { %6480 = vmatprep.subr.bf16.mxu0 %v9219_v46 }
  0x8c   :  { %6450 = vmatpush1.bf16.msra.mxu1 %v9424_v36 }
  0x8d   :  { %6484 = vmatprep.subr.bf16.mxu1 %v9170_v23 }
  0x8e   :  { %6482 = vmatpush1.bf16.msra.mxu0 %v9227_v56 }
  0x8f   :  { %1148 = vmatmul.mubr.f32.vlgmr.msra.gmra.mrb[42].mxu1 %v10948_v18  ;;  %6516 = vmatprep.subr.bf16.mxu0 %v9231_v58 }
  0x90   :  { %1151 = vmatprep.mubr.f32.mxu1 %v10948_v18  ;;  %6486 = vmatpush1.bf16.msra.mxu1 %v9239_v5 }
  0x91   :  { %6488 = vmatprep.subr.bf16.mxu1 %v9245_v11 }
  0x93   :  { %1152 = vmatmul.mubr.f32.gmra.mrb[38].mxu1 %v10948_v18 }
  0x94   :  { %6490 = vmatpush1.bf16.msra.mxu1 %v9254_v22  ;;  %1365 = vmatprep.mubr.f32.mxu1 %v10948_v18 }
  0x95   :  { %6492 = vmatprep.subr.bf16.mxu1 %v9260_v29 }
  0x98   :  { %6494 = vmatpush1.bf16.msra.mxu1 %v9271_v43 }
  0x99   :  { %6496 = vmatprep.subr.bf16.mxu1 %v9277_v53 }
  0x9c   :  { %6498 = vmatpush1.bf16.msra.mxu1 %v9287_v2 }
  0x9d   :  { %6500 = vmatprep.subr.bf16.mxu1 %v9293_v9 }
  0xa0   :  { %6502 = vmatpush1.bf16.msra.mxu1 %v9302_v28 }
  0xa1   :  { %6504 = vmatprep.subr.bf16.mxu1 %v9308_v33 }
  0xa4   :  { %6506 = vmatpush1.bf16.msra.mxu1 %v9317_v55 }
  0xa5   :  { %6508 = vmatprep.subr.bf16.mxu1 %v9323_v62 }
  0xa8   :  { %6510 = vmatpush1.bf16.msra.mxu1 %v9332_v20 }
  0xa9   :  { %6512 = vmatprep.subr.bf16.mxu1 %v9338_v35  ;;  %v124_v35 = vlaneseq }
  0xac   :  { %6514 = vmatpush1.bf16.msra.mxu1 %v9347_v54  ;;  %v9469_v54 = vshrl.u32 %v124_v35, 7 }
  0xad   :  { %6548 = vmatprep.subr.bf16.mxu1 %v9353_v63 }
  0xae   :  { %v9493_v62 = vsub.s32 2, %v9469_v54 }
  0xb0   :  { %10961 = vst [vmem:[#allocation67_spill] sm:$0xff] %v9493_v62 }
  0xf2   :  { %v9453_v10 = vpop.f32.mrb[0].mxu1 }
  0xf3   :  { %10949 = vst [vmem:[#allocation55_spill] sm:$0xff] %v9453_v10  ;;  %v9455_v50 = vpop.f32.mrb[1].mxu1  ;;  %v9472_v10 = vsub.s32 1, %v9469_v54 }
  0xf4   :  { %10950 = vst [vmem:[#allocation56_spill] sm:$0xff] %v9455_v50 }
  0xf5   :  { %10957 = vst [vmem:[#allocation63_spill] sm:$0xff] %v9472_v10 }
  0xf6   :  { %v9457_v27 = vpop.f32.mrb[2].mxu1 }
  0xf7   :  { %10951 = vst [vmem:[#allocation57_spill] sm:$0xff] %v9457_v27  ;;  %v9459_v60 = vpop.f32.mrb[3].mxu1 }
  0xf8   :  { %10952 = vst [vmem:[#allocation58_spill] sm:$0xff] %v9459_v60  ;;  %v9477_v60 = vld [vmem:[%s10809_s3] sm:$0xff]  ;;  %s8877_s3 = smov [#allocation5]  }
  0xf9   :  { %s54_s12 = sshll.u32 %s8877_s3, 4  ;;  %s55_s12 = int_to_ptr.vmem [resolvable:$true] %s54_s12 }
  0xfa   :  { %v9461_v1 = vpop.f32.mrb[4].mxu1 }
  0xfb   :  { %10953 = vst [vmem:[#allocation59_spill] sm:$0xff] %v9461_v1  ;;  %v9463_v30 = vpop.f32.mrb[5].mxu1  ;;  %v9480_v1 = vsub.s32 0, %v9469_v54 }
  0xfc   :  { %10954 = vst [vmem:[#allocation60_spill] sm:$0xff] %v9463_v30 }
  0xfd   :  { %10958 = vst [vmem:[#allocation64_spill] sm:$0xff] %v9480_v1  ;;  %v9488_v35 = vrot.slane %v9477_v60, %v9480_v1  ;;  %v9500_v1 = vrot.slane %v9477_v60, %v9493_v62 }
  0xfe   :  { %v9465_v58 = vpop.f32.mrb[6].mxu1 }
  0xff   :  { %10955 = vst [vmem:[#allocation61_spill] sm:$0xff] %v9465_v58  ;;  %v9467_v56 = vpop.f32.mrb[7].mxu1  ;;  %10960 = vst [vmem:[#allocation66_spill] sm:$0xff] %v9488_v35 }
 0x100   :  { %10956 = vst [vmem:[#allocation62_spill] sm:$0xff] %v9467_v56  ;;  %v9484_v56 = vrot.slane %v9477_v60, %v9472_v10  ;;  %10963 = vst [vmem:[#allocation69_spill] sm:$0xff] %v9500_v1 }
 0x102   :  { %10959 = vst [vmem:[#allocation65_spill] sm:$0xff] %v9484_v56 }
 0x122   :  { %v924_v63 = vpop.f32.mrb[0].mxu0 }
 0x123   :  { %v926_v46 = vpop.f32.mrb[1].mxu0  ;;  %v8151_v50 = vadd.f32 %v924_v63, %v9488_v35 }
 0x124   :  { %v8152_v27 = vadd.f32 %v926_v46, %v9484_v56 }
 0x125   :  { %v6169_v45 = vmul.f32 -1.442695, %v8151_v50 }
 0x126   :  { %v930_v30 = vpop.f32.mrb[24].mxu0  ;;  %v6170_v20 = vmul.f32 -1.442695, %v8152_v27 }
 0x127   :  { %v931_v58 = vpop.f32.mrb[25].mxu0 }
 0x128   :  { %8352 = vpow2.f32 %v6170_v20  ;;  %v9496_v58 = vsub.s32 3, %v9469_v54 }
 0x129   :  { %8354 = vpow2.f32 %v6169_v45 }
 0x12a   :  { %10962 = vst [vmem:[#allocation68_spill] sm:$0xff] %v9496_v58  ;;  %v9504_v46 = vrot.slane %v9477_v60, %v9496_v58 }
 0x12c   :  { %10964 = vst [vmem:[#allocation70_spill] sm:$0xff] %v9504_v46 }
 0x132   :  { %v8353_v30 = vpop.eup %8352 }
 0x133   :  { %v8355_v10 = vpop.eup %8354  ;;  %v1194_v38 = vadd.f32 1.0, %v8353_v30  ;;  %v146_v30 = vsub.s32 5, %v9469_v54 }
 0x134   :  { %v1193_v63 = vadd.f32 1.0, %v8355_v10  ;;  %v142_v10 = vsub.s32 4, %v9469_v54 }
 0x135   :  { %8356 = vrcp.f32 %v1194_v38 }
 0x136   :  { %8358 = vrcp.f32 %v1193_v63 }
 0x13f   :  { %v8357_v38 = vpop.eup %8356 }
 0x142   :  { %v999_v20 = vpop.f32.mrb[8].mxu1  ;;  %v1074_v45 = vpop.f32.mrb[26].mxu0 }
 0x143   :  { %v8175_v50 = vadd.f32 %v999_v20, %v9500_v1  ;;  %v1001_v27 = vpop.f32.mrb[9].mxu1  ;;  %v1075_v56 = vpop.f32.mrb[27].mxu0  ;;  %v9511_v45 = vrot.slane %v9477_v60, %v146_v30 }
 0x144   :  { %v8176_v35 = vadd.f32 %v1001_v27, %v9504_v46  ;;  %v9514_v56 = vrot.slane %v9477_v60, %v142_v10  ;;  %v8359_v20 = vpop.eup %8358 }
 0x145   :  { %v6171_v55 = vmul.f32 -1.442695, %v8175_v50  ;;  %10965 = vst [vmem:[#allocation71_spill] sm:$0xff] %v9511_v45  ;;  %v1213_v50 = vmul.f32 0.0, %v8357_v38 }
 0x146   :  { %8360 = vtanh.f32 %v8176_v35  ;;  %v1078_v62 = vpop.f32.mrb[22].mxu0  ;;  %v1005_v37 = vpop.f32.mrb[40].mxu1 }
 0x147   :  { %8362 = vpow2.f32 %v6171_v55  ;;  %v1080_v58 = vpop.f32.mrb[23].mxu0  ;;  %v1006_v33 = vpop.f32.mrb[41].mxu1  ;;  %v8205_v37 = vadd.f32 %v1078_v62, %v9514_v56  ;;  %v154_v62 = vsub.s32 7, %v9469_v54 }
 0x148   :  { %v8206_v63 = vadd.f32 %v1080_v58, %v9511_v45  ;;  %v150_v58 = vsub.s32 6, %v9469_v54 }
 0x149   :  { %v6172_v30 = vmul.f32 -1.442695, %v8205_v37 }
 0x14a   :  { %v6173_v1 = vmul.f32 -1.442695, %v8206_v63  ;;  %v9528_v63 = vrot.slane %v9477_v60, %v150_v58 }
 0x150   :  { %v8361_v35 = vpop.eup %8360 }
 0x151   :  { %v8363_v55 = vpop.eup %8362  ;;  %v1215_v27 = vmul.f32 %v8361_v35, %v8359_v20 }
 0x152   :  { %v1195_v46 = vadd.f32 1.0, %v8363_v55 }
 0x153   :  { %v9518_v33 = vadd.f32 %v1215_v27, %v1213_v50 }
 0x154   :  { %8364 = vrcp.f32 %v1195_v46 }
 0x155   :  { %8366 = vtanh.f32 %v9518_v33 }
 0x156   :  { %8368 = vpow2.f32 %v6173_v1 }
 0x157   :  { %8370 = vpow2.f32 %v6172_v30 }
 0x15e   :  { %v8365_v10 = vpop.eup %8364 }
 0x15f   :  { %v8367_v32 = vpop.eup %8366 }
 0x160   :  { %v9522_v45 = vmul.f32 %v8367_v32, %v8365_v10  ;;  %v8369_v38 = vpop.eup %8368  ;;  %v9533_v32 = vrot.slane %v9477_v60, %v154_v62 }
 0x161   :  { %v8371_v20 = vpop.eup %8370  ;;  %v1197_v1 = vadd.f32 1.0, %v8369_v38 }
 0x162   :  { %10966 = vst [vmem:[#allocation72_spill] sm:$0xff] %v9522_v45  ;;  %v1149_v35 = vpop.f32.mrb[42].mxu1  ;;  %1291 = vmatmul.mubr.f32.vlgmr.msra.gmra.mrb[2].mxu0 %v9522_v45  ;;  %1366 = vmatmul.mubr.f32.vlgmr.msra.gmra.mrb[10].mxu1 %v9522_v45  ;;  %v1196_v54 = vadd.f32 1.0, %v8371_v20 }
 0x163   :  { %v1150_v46 = vpop.f32.mrb[43].mxu1  ;;  %6518 = vmatpush1.bf16.msra.mxu0 %v9241_v6  ;;  %6550 = vmatpush1.bf16.msra.mxu1 %v9360_v47  ;;  %8372 = vrcp.f32 %v1197_v1 }
 0x164   :  { %6520 = vmatprep.subr.bf16.mxu0 %v9247_v15  ;;  %6552 = vmatprep.subr.bf16.mxu1 %v9364_v16  ;;  %8374 = vrcp.f32 %v1196_v54 }
 0x165   :  { %1296 = vmatprep.mubr.f32.mxu0 %v10948_v18  ;;  %1371 = vmatprep.mubr.f32.mxu1 %v10948_v18 }
 0x166   :  { %v1153_v37 = vpop.f32.mrb[38].mxu1 }
 0x167   :  { %v8221_v55 = vadd.f32 %v1153_v37, %v9528_v63  ;;  %v1155_v50 = vpop.f32.mrb[39].mxu1  ;;  %6522 = vmatpush1.bf16.msra.mxu0 %v9256_v25  ;;  %6554 = vmatpush1.bf16.msra.mxu1 %v9371_v51 }
 0x168   :  { %v8222_v60 = vadd.f32 %v1155_v50, %v9533_v32  ;;  %6524 = vmatprep.subr.bf16.mxu0 %v9263_v34  ;;  %6556 = vmatprep.subr.bf16.mxu1 %v9374_v40  ;;  %v10969_v50 = vld [vmem:[#allocation27_spill] sm:$0xff] }
 0x169   :  { %v6174_v27 = vmul.f32 -1.442695, %v8221_v55  ;;  %v10968_v55 = vld [vmem:[#allocation26_spill] sm:$0xff] }
 0x16a   :  { %8376 = vtanh.f32 %v8222_v60  ;;  %v10970_v60 = vld [vmem:[#allocation28_spill] sm:$0xff] }
 0x16b   :  { %8378 = vpow2.f32 %v6174_v27  ;;  %6526 = vmatpush1.bf16.msra.mxu0 %v9273_v44  ;;  %6558 = vmatpush1.bf16.msra.mxu1 %v9381_v13  ;;  %v10971_v27 = vld [vmem:[#allocation29_spill] sm:$0xff] }
 0x16c   :  { %6528 = vmatprep.subr.bf16.mxu0 %v9280_v57  ;;  %6560 = vmatprep.subr.bf16.mxu1 %v9385_v48 }
 0x16d   :  { %v8373_v30 = vpop.eup %8372 }
 0x16e   :  { %v8375_v10 = vpop.eup %8374  ;;  %v1214_v38 = vmul.f32 0.0, %v8373_v30  ;;  %v10972_v30 = vld [vmem:[#allocation30_spill] sm:$0xff] }
 0x16f   :  { %6530 = vmatpush1.bf16.msra.mxu0 %v9289_v3  ;;  %6562 = vmatpush1.bf16.msra.mxu1 %v9392_v52 }
 0x170   :  { %6532 = vmatprep.subr.bf16.mxu0 %v9296_v14  ;;  %6564 = vmatprep.subr.bf16.mxu1 %v9395_v39 }
 0x173   :  { %6534 = vmatpush1.bf16.msra.mxu0 %v9304_v26  ;;  %6566 = vmatpush1.bf16.msra.mxu1 %v9400_v0 }
 0x174   :  { %v8377_v58 = vpop.eup %8376  ;;  %6536 = vmatprep.subr.bf16.mxu0 %v9311_v41  ;;  %6568 = vmatprep.subr.bf16.mxu1 %v9403_v19 }
 0x175   :  { %v8379_v62 = vpop.eup %8378  ;;  %v1216_v20 = vmul.f32 %v8377_v58, %v8375_v10  ;;  %v10973_v10 = vld [vmem:[#allocation31_spill] sm:$0xff]  ;;  %v10974_v58 = vld [vmem:[#allocation32_spill] sm:$0xff] }
 0x176   :  { %v1198_v35 = vadd.f32 1.0, %v8379_v62  ;;  %v10975_v62 = vld [vmem:[#allocation34_spill] sm:$0xff] }
 0x177   :  { %v9557_v46 = vadd.f32 %v1216_v20, %v1214_v38  ;;  %6538 = vmatpush1.bf16.msra.mxu0 %v9319_v59  ;;  %6570 = vmatpush1.bf16.msra.mxu1 %v9408_v17  ;;  %v10976_v38 = vld [vmem:[#allocation48_spill] sm:$0xff]  ;;  %v10977_v20 = vld [vmem:[#allocation35_spill] sm:$0xff] }
 0x178   :  { %8380 = vrcp.f32 %v1198_v35  ;;  %6540 = vmatprep.subr.bf16.mxu0 %v9326_v12  ;;  %6572 = vmatprep.subr.bf16.mxu1 %v9411_v4  ;;  %v10978_v35 = vld [vmem:[#allocation49_spill] sm:$0xff] }
 0x179   :  { %8382 = vtanh.f32 %v9557_v46 }
 0x17b   :  { %6542 = vmatpush1.bf16.msra.mxu0 %v9334_v21  ;;  %6574 = vmatpush1.bf16.msra.mxu1 %v9416_v24 }
 0x17c   :  { %6544 = vmatprep.subr.bf16.mxu0 %v9341_v42  ;;  %6576 = vmatprep.subr.bf16.mxu1 %v9419_v8 }
 0x17f   :  { %6546 = vmatpush1.bf16.msra.mxu0 %v9349_v61  ;;  %6578 = vmatpush1.bf16.msra.mxu1 %v9424_v36 }
 0x180   :  { %6580 = vmatprep.subr.bf16.mxu0 %v9093_v49  ;;  %6612 = vmatprep.subr.bf16.mxu1 %v9170_v23 }
 0x182   :  { %v8381_v1 = vpop.eup %8380 }
 0x183   :  { %v8383_v54 = vpop.eup %8382 }
 0x184   :  { %v9572_v37 = vmul.f32 %v8383_v54, %v8381_v1  ;;  %v10979_v1 = vld [vmem:[#allocation36_spill] sm:$0xff]  ;;  %v10980_v54 = vld [vmem:[#allocation50_spill] sm:$0xff] }
 0x186   :  { %10967 = vst [vmem:[#allocation73_spill] sm:$0xff] %v9572_v37  ;;  %1297 = vmatmul.mubr.f32.gmra.mrb[28].mxu0 %v9572_v37  ;;  %1372 = vmatmul.mubr.f32.gmra.mrb[44].mxu1 %v9572_v37 }
 0x187   :  { %1440 = vmatprep.mubr.f32.mxu0 %v10948_v18  ;;  %1515 = vmatprep.mubr.f32.mxu1 %v10948_v18 }
 0x18a   :  { %1441 = vmatmul.mubr.f32.vlgmr.msra.gmra.mrb[30].mxu0 %v9522_v45  ;;  %1516 = vmatmul.mubr.f32.vlgmr.msra.gmra.mrb[46].mxu1 %v9522_v45  ;;  %v10982_v45 = vld [vmem:[#allocation51_spill] sm:$0xff] }
 0x18b   :  { %1444 = vmatprep.mubr.f32.mxu0 %v10948_v18  ;;  %1519 = vmatprep.mubr.f32.mxu1 %v10948_v18 }
 0x18c   :  { %6582 = vmatpush1.bf16.msra.mxu0 %v10968_v55  ;;  %6614 = vmatpush1.bf16.msra.mxu1 %v9239_v5 }
 0x18d   :  { %6584 = vmatprep.subr.bf16.mxu0 %v10969_v50  ;;  %6616 = vmatprep.subr.bf16.mxu1 %v9245_v11 }
 0x18e   :  { %1445 = vmatmul.mubr.f32.gmra.mrb[20].mxu0 %v9572_v37  ;;  %1520 = vmatmul.mubr.f32.gmra.mrb[36].mxu1 %v9572_v37  ;;  %v10981_v37 = vld [vmem:[#allocation37_spill] sm:$0xff] }
 0x18f   :  { %1660 = vmatprep.mubr.f32.mxu0 %v10948_v18  ;;  %1735 = vmatprep.mubr.f32.mxu1 %v10948_v18 }
 0x190   :  { %6586 = vmatpush1.bf16.msra.mxu0 %v9147_v7  ;;  %6618 = vmatpush1.bf16.msra.mxu1 %v9254_v22 }
 0x191   :  { %6588 = vmatprep.subr.bf16.mxu0 %v10970_v60  ;;  %6620 = vmatprep.subr.bf16.mxu1 %v9260_v29 }
 0x194   :  { %6590 = vmatpush1.bf16.msra.mxu0 %v10971_v27  ;;  %6622 = vmatpush1.bf16.msra.mxu1 %v9271_v43 }
 0x195   :  { %6592 = vmatprep.subr.bf16.mxu0 %v10972_v30  ;;  %6624 = vmatprep.subr.bf16.mxu1 %v9277_v53  ;;  %v10992_v30 = vld [vmem:[#allocation70_spill] sm:$0xff] }
 0x198   :  { %6594 = vmatpush1.bf16.msra.mxu0 %v10973_v10  ;;  %6626 = vmatpush1.bf16.msra.mxu1 %v9287_v2  ;;  %v10990_v10 = vld [vmem:[#allocation65_spill] sm:$0xff] }
 0x199   :  { %6596 = vmatprep.subr.bf16.mxu0 %v10974_v58  ;;  %6628 = vmatprep.subr.bf16.mxu1 %v9293_v9  ;;  %v10983_v9 = vld [vmem:[#allocation38_spill] sm:$0xff] }
 0x19a   :  { %v10989_v58 = vld [vmem:[#allocation66_spill] sm:$0xff] }
 0x19c   :  { %6598 = vmatpush1.bf16.msra.mxu0 %v9191_v31  ;;  %6630 = vmatpush1.bf16.msra.mxu1 %v9302_v28  ;;  %v10984_v31 = vld [vmem:[#allocation52_spill] sm:$0xff]  ;;  %v10985_v28 = vld [vmem:[#allocation39_spill] sm:$0xff] }
 0x19d   :  { %6600 = vmatprep.subr.bf16.mxu0 %v10975_v62  ;;  %6632 = vmatprep.subr.bf16.mxu1 %v10976_v38  ;;  %v10986_v62 = vld [vmem:[#allocation53_spill] sm:$0xff]  ;;  %v10987_v38 = vld [vmem:[#allocation40_spill] sm:$0xff] }
 0x1a0   :  { %6602 = vmatpush1.bf16.msra.mxu0 %v10977_v20  ;;  %6634 = vmatpush1.bf16.msra.mxu1 %v10978_v35  ;;  %v10988_v20 = vld [vmem:[#allocation54_spill] sm:$0xff] }
 0x1a1   :  { %6604 = vmatprep.subr.bf16.mxu0 %v10979_v1  ;;  %6636 = vmatprep.subr.bf16.mxu1 %v10980_v54 }
 0x1a4   :  { %6606 = vmatpush1.bf16.msra.mxu0 %v10981_v37  ;;  %6638 = vmatpush1.bf16.msra.mxu1 %v10982_v45 }
 0x1a5   :  { %6608 = vmatprep.subr.bf16.mxu0 %v10983_v9  ;;  %6640 = vmatprep.subr.bf16.mxu1 %v10984_v31  ;;  %v10991_v31 = vld [vmem:[#allocation69_spill] sm:$0xff] }
 0x1a8   :  { %6610 = vmatpush1.bf16.msra.mxu0 %v10985_v28  ;;  %6642 = vmatpush1.bf16.msra.mxu1 %v10986_v62 }
 0x1a9   :  { %6644 = vmatprep.subr.bf16.mxu0 %v10987_v38  ;;  %6676 = vmatprep.subr.bf16.mxu1 %v10988_v20 }
 0x235   :  { %v1292_v35 = vpop.f32.mrb[2].mxu0  ;;  %v1367_v1 = vpop.f32.mrb[10].mxu1 }
 0x236   :  { %v8153_v54 = vadd.f32 %v1292_v35, %v10989_v58  ;;  %v1294_v2 = vpop.f32.mrb[3].mxu0  ;;  %v1369_v37 = vpop.f32.mrb[11].mxu1  ;;  %v8177_v28 = vadd.f32 %v1367_v1, %v10991_v31 }
 0x237   :  { %v8154_v45 = vadd.f32 %v1294_v2, %v10990_v10  ;;  %v8178_v62 = vadd.f32 %v1369_v37, %v10992_v30 }
 0x238   :  { %v6175_v53 = vmul.f32 -1.442695, %v8153_v54  ;;  %v6177_v43 = vmul.f32 -1.442695, %v8177_v28 }
 0x239   :  { %v6176_v9 = vmul.f32 -1.442695, %v8154_v45 }
 0x23a   :  { %8384 = vpow2.f32 %v6175_v53 }
 0x23b   :  { %8386 = vpow2.f32 %v6176_v9 }
 0x23c   :  { %8388 = vtanh.f32 %v8178_v62 }
 0x23d   :  { %8390 = vpow2.f32 %v6177_v43 }
 0x244   :  { %v8385_v38 = vpop.eup %8384 }
 0x245   :  { %v1562_v27 = vadd.f32 1.0, %v8385_v38  ;;  %v8387_v20 = vpop.eup %8386 }
 0x246   :  { %v1563_v35 = vadd.f32 1.0, %v8387_v20  ;;  %v8389_v58 = vpop.eup %8388 }
 0x247   :  { %8392 = vrcp.f32 %v1562_v27  ;;  %v8391_v29 = vpop.eup %8390 }
 0x248   :  { %8394 = vrcp.f32 %v1563_v35  ;;  %v1564_v53 = vadd.f32 1.0, %v8391_v29 }
 0x24a   :  { %8396 = vrcp.f32 %v1564_v53 }
 0x251   :  { %v8393_v2 = vpop.eup %8392 }
 0x252   :  { %v1584_v54 = vmul.f32 %v8393_v2, %v8389_v58  ;;  %v8395_v45 = vpop.eup %8394 }
 0x253   :  { %v1582_v9 = vmul.f32 %v8395_v45, %v9518_v33  ;;  %v10993_v45 = vld [vmem:[#allocation71_spill] sm:$0xff] }
 0x254   :  { %v8397_v30 = vpop.eup %8396 }
 0x255   :  { %v9623_v1 = vadd.f32 %v1584_v54, %v1582_v9 }
 0x257   :  { %8398 = vtanh.f32 %v9623_v1 }
 0x259   :  { %v1298_v28 = vpop.f32.mrb[28].mxu0  ;;  %v1373_v37 = vpop.f32.mrb[44].mxu1 }
 0x25a   :  { %v1299_v62 = vpop.f32.mrb[29].mxu0  ;;  %v1374_v43 = vpop.f32.mrb[45].mxu1 }
 0x25d   :  { %v1442_v27 = vpop.f32.mrb[30].mxu0  ;;  %v1517_v38 = vpop.f32.mrb[46].mxu1 }
 0x25e   :  { %v1443_v20 = vpop.f32.mrb[31].mxu0  ;;  %v1518_v35 = vpop.f32.mrb[47].mxu1 }
 0x261   :  { %v1446_v31 = vpop.f32.mrb[20].mxu0  ;;  %v1521_v58 = vpop.f32.mrb[36].mxu1 }
 0x262   :  { %v8399_v2 = vpop.eup %8398  ;;  %v8203_v29 = vadd.f32 %v1446_v31, %v9514_v56  ;;  %v1448_v33 = vpop.f32.mrb[21].mxu0  ;;  %v8219_v31 = vadd.f32 %v1521_v58, %v9528_v63 }
 0x263   :  { %v1523_v54 = vpop.f32.mrb[37].mxu1  ;;  %v8204_v53 = vadd.f32 %v1448_v33, %v10993_v45  ;;  %v9628_v9 = vmul.f32 %v8399_v2, %v8397_v30 }
 0x264   :  { %v6178_v28 = vmul.f32 -1.442695, %v8203_v29  ;;  %v8220_v30 = vadd.f32 %v1523_v54, %v9533_v32  ;;  %v6180_v62 = vmul.f32 -1.442695, %v8219_v31 }
 0x265   :  { %10994 = vst [vmem:[#allocation26_spill] sm:$0xff] %v9628_v9  ;;  %v6179_v37 = vmul.f32 -1.442695, %v8204_v53  ;;  %1661 = vmatmul.mubr.f32.vlgmr.msra.gmra.mrb[4].mxu0 %v9628_v9  ;;  %1736 = vmatmul.mubr.f32.vlgmr.msra.gmra.mrb[12].mxu1 %v9628_v9 }
 0x266   :  { %8400 = vpow2.f32 %v6178_v28  ;;  %6646 = vmatpush1.bf16.msra.mxu0 %v9241_v6  ;;  %6678 = vmatpush1.bf16.msra.mxu1 %v9360_v47 }
 0x267   :  { %6648 = vmatprep.subr.bf16.mxu0 %v9247_v15  ;;  %6680 = vmatprep.subr.bf16.mxu1 %v9364_v16  ;;  %8402 = vpow2.f32 %v6179_v37 }
 0x268   :  { %1666 = vmatprep.mubr.f32.mxu0 %v10948_v18  ;;  %1741 = vmatprep.mubr.f32.mxu1 %v10948_v18  ;;  %8404 = vtanh.f32 %v8220_v30 }
 0x269   :  { %8406 = vpow2.f32 %v6180_v62  ;;  %v10997_v62 = vld [vmem:[#allocation29_spill] sm:$0xff] }
 0x26a   :  { %6650 = vmatpush1.bf16.msra.mxu0 %v9256_v25  ;;  %6682 = vmatpush1.bf16.msra.mxu1 %v9371_v51 }
 0x26b   :  { %6652 = vmatprep.subr.bf16.mxu0 %v9263_v34  ;;  %6684 = vmatprep.subr.bf16.mxu1 %v9374_v40 }
 0x26e   :  { %6654 = vmatpush1.bf16.msra.mxu0 %v9273_v44  ;;  %6686 = vmatpush1.bf16.msra.mxu1 %v9381_v13 }
 0x26f   :  { %6656 = vmatprep.subr.bf16.mxu0 %v9280_v57  ;;  %6688 = vmatprep.subr.bf16.mxu1 %v9385_v48 }
 0x270   :  { %v8401_v43 = vpop.eup %8400 }
 0x271   :  { %v1565_v27 = vadd.f32 1.0, %v8401_v43  ;;  %v8403_v38 = vpop.eup %8402  ;;  %v10998_v43 = vld [vmem:[#allocation43_spill] sm:$0xff] }
 0x272   :  { %6658 = vmatpush1.bf16.msra.mxu0 %v9289_v3  ;;  %6690 = vmatpush1.bf16.msra.mxu1 %v9392_v52  ;;  %v1566_v20 = vadd.f32 1.0, %v8403_v38  ;;  %v8405_v35 = vpop.eup %8404  ;;  %v11000_v38 = vld [vmem:[#allocation44_spill] sm:$0xff] }
 0x273   :  { %8408 = vrcp.f32 %v1565_v27  ;;  %6660 = vmatprep.subr.bf16.mxu0 %v9296_v14  ;;  %6692 = vmatprep.subr.bf16.mxu1 %v9395_v39  ;;  %v8407_v58 = vpop.eup %8406  ;;  %v10999_v27 = vld [vmem:[#allocation30_spill] sm:$0xff] }
 0x274   :  { %8410 = vrcp.f32 %v1566_v20  ;;  %v1567_v54 = vadd.f32 1.0, %v8407_v58  ;;  %v11001_v20 = vld [vmem:[#allocation31_spill] sm:$0xff]  ;;  %v11003_v58 = vld [vmem:[#allocation32_spill] sm:$0xff] }
 0x276   :  { %6662 = vmatpush1.bf16.msra.mxu0 %v9304_v26  ;;  %6694 = vmatpush1.bf16.msra.mxu1 %v9400_v0  ;;  %8412 = vrcp.f32 %v1567_v54  ;;  %v11007_v54 = vld [vmem:[#allocation34_spill] sm:$0xff] }
 0x277   :  { %6664 = vmatprep.subr.bf16.mxu0 %v9311_v41  ;;  %6696 = vmatprep.subr.bf16.mxu1 %v9403_v19 }
 0x27a   :  { %6666 = vmatpush1.bf16.msra.mxu0 %v9319_v59  ;;  %6698 = vmatpush1.bf16.msra.mxu1 %v9408_v17 }
 0x27b   :  { %6668 = vmatprep.subr.bf16.mxu0 %v9326_v12  ;;  %6700 = vmatprep.subr.bf16.mxu1 %v9411_v4 }
 0x27d   :  { %v8409_v2 = vpop.eup %8408 }
 0x27e   :  { %v1585_v29 = vmul.f32 %v8409_v2, %v8405_v35  ;;  %6670 = vmatpush1.bf16.msra.mxu0 %v9334_v21  ;;  %6702 = vmatpush1.bf16.msra.mxu1 %v9416_v24  ;;  %v8411_v33 = vpop.eup %8410  ;;  %v11002_v35 = vld [vmem:[#allocation45_spill] sm:$0xff]  ;;  %v11004_v2 = vld [vmem:[#allocation46_spill] sm:$0xff] }
 0x27f   :  { %6672 = vmatprep.subr.bf16.mxu0 %v9341_v42  ;;  %6704 = vmatprep.subr.bf16.mxu1 %v9419_v8  ;;  %v1583_v53 = vmul.f32 %v8411_v33, %v9557_v46  ;;  %v10996_v46 = vld [vmem:[#allocation42_spill] sm:$0xff]  ;;  %v11006_v33 = vld [vmem:[#allocation47_spill] sm:$0xff] }
 0x280   :  { %v8413_v37 = vpop.eup %8412 }
 0x281   :  { %v9665_v28 = vadd.f32 %v1585_v29, %v1583_v53  ;;  %v11005_v29 = vld [vmem:[#allocation33_spill] sm:$0xff]  ;;  %v11008_v53 = vld [vmem:[#allocation48_spill] sm:$0xff] }
 0x282   :  { %6674 = vmatpush1.bf16.msra.mxu0 %v9349_v61  ;;  %6706 = vmatpush1.bf16.msra.mxu1 %v9424_v36 }
 0x283   :  { %6708 = vmatprep.subr.bf16.mxu0 %v9093_v49  ;;  %6740 = vmatprep.subr.bf16.mxu1 %v9170_v23  ;;  %8414 = vtanh.f32 %v9665_v28 }
 0x28d   :  { %v8415_v31 = vpop.eup %8414 }
 0x28e   :  { %v9672_v30 = vmul.f32 %v8415_v31, %v8413_v37  ;;  %v11009_v37 = vld [vmem:[#allocation35_spill] sm:$0xff]  ;;  %v11010_v31 = vld [vmem:[#allocation49_spill] sm:$0xff] }
 0x290   :  { %10995 = vst [vmem:[#allocation27_spill] sm:$0xff] %v9672_v30  ;;  %1667 = vmatmul.mubr.f32.gmra.mrb[32].mxu0 %v9672_v30  ;;  %1742 = vmatmul.mubr.f32.gmra.mrb[48].mxu1 %v9672_v30 }
 0x291   :  { %1810 = vmatprep.mubr.f32.mxu0 %v10948_v18  ;;  %1885 = vmatprep.mubr.f32.mxu1 %v10948_v18 }
 0x294   :  { %1811 = vmatmul.mubr.f32.vlgmr.msra.gmra.mrb[34].mxu0 %v9628_v9  ;;  %1886 = vmatmul.mubr.f32.vlgmr.msra.gmra.mrb[50].mxu1 %v9628_v9  ;;  %v11012_v9 = vld [vmem:[#allocation50_spill] sm:$0xff] }
 0x295   :  { %1814 = vmatprep.mubr.f32.mxu0 %v10948_v18  ;;  %1889 = vmatprep.mubr.f32.mxu1 %v10948_v18 }
 0x296   :  { %6710 = vmatpush1.bf16.msra.mxu0 %v10968_v55  ;;  %6742 = vmatpush1.bf16.msra.mxu1 %v9239_v5 }
 0x297   :  { %6712 = vmatprep.subr.bf16.mxu0 %v10969_v50  ;;  %6744 = vmatprep.subr.bf16.mxu1 %v9245_v11 }
 0x298   :  { %1815 = vmatmul.mubr.f32.gmra.mrb[18].mxu0 %v9672_v30  ;;  %1890 = vmatmul.mubr.f32.gmra.mrb[34].mxu1 %v9672_v30  ;;  %v11011_v30 = vld [vmem:[#allocation36_spill] sm:$0xff] }
 0x299   :  { %2030 = vmatprep.mubr.f32.mxu0 %v10948_v18  ;;  %2105 = vmatprep.mubr.f32.mxu1 %v10948_v18 }
 0x29a   :  { %6714 = vmatpush1.bf16.msra.mxu0 %v9147_v7  ;;  %6746 = vmatpush1.bf16.msra.mxu1 %v9254_v22 }
 0x29b   :  { %6716 = vmatprep.subr.bf16.mxu0 %v10970_v60  ;;  %6748 = vmatprep.subr.bf16.mxu1 %v10996_v46 }
 0x29e   :  { %6718 = vmatpush1.bf16.msra.mxu0 %v10997_v62  ;;  %6750 = vmatpush1.bf16.msra.mxu1 %v10998_v43  ;;  %v11023_v43 = vld [vmem:[#allocation70_spill] sm:$0xff] }
 0x29f   :  { %6720 = vmatprep.subr.bf16.mxu0 %v10999_v27  ;;  %6752 = vmatprep.subr.bf16.mxu1 %v11000_v38 }
 0x2a2   :  { %6722 = vmatpush1.bf16.msra.mxu0 %v11001_v20  ;;  %6754 = vmatpush1.bf16.msra.mxu1 %v11002_v35  ;;  %v11013_v35 = vld [vmem:[#allocation37_spill] sm:$0xff]  ;;  %v11021_v20 = vld [vmem:[#allocation66_spill] sm:$0xff] }
 0x2a3   :  { %6724 = vmatprep.subr.bf16.mxu0 %v11003_v58  ;;  %6756 = vmatprep.subr.bf16.mxu1 %v11004_v2  ;;  %v11014_v58 = vld [vmem:[#allocation51_spill] sm:$0xff]  ;;  %v11015_v2 = vld [vmem:[#allocation38_spill] sm:$0xff] }
 0x2a6   :  { %6726 = vmatpush1.bf16.msra.mxu0 %v11005_v29  ;;  %6758 = vmatpush1.bf16.msra.mxu1 %v11006_v33  ;;  %v11016_v29 = vld [vmem:[#allocation52_spill] sm:$0xff]  ;;  %v11017_v33 = vld [vmem:[#allocation39_spill] sm:$0xff] }
 0x2a7   :  { %6728 = vmatprep.subr.bf16.mxu0 %v11007_v54  ;;  %6760 = vmatprep.subr.bf16.mxu1 %v11008_v53  ;;  %v11018_v54 = vld [vmem:[#allocation53_spill] sm:$0xff]  ;;  %v11019_v53 = vld [vmem:[#allocation40_spill] sm:$0xff] }
 0x2aa   :  { %6730 = vmatpush1.bf16.msra.mxu0 %v11009_v37  ;;  %6762 = vmatpush1.bf16.msra.mxu1 %v11010_v31  ;;  %v11020_v37 = vld [vmem:[#allocation54_spill] sm:$0xff] }
 0x2ab   :  { %6732 = vmatprep.subr.bf16.mxu0 %v11011_v30  ;;  %6764 = vmatprep.subr.bf16.mxu1 %v11012_v9 }
 0x2ae   :  { %6734 = vmatpush1.bf16.msra.mxu0 %v11013_v35  ;;  %6766 = vmatpush1.bf16.msra.mxu1 %v11014_v58 }
 0x2af   :  { %6736 = vmatprep.subr.bf16.mxu0 %v11015_v2  ;;  %6768 = vmatprep.subr.bf16.mxu1 %v11016_v29  ;;  %v11022_v29 = vld [vmem:[#allocation69_spill] sm:$0xff] }
 0x2b2   :  { %6738 = vmatpush1.bf16.msra.mxu0 %v11017_v33  ;;  %6770 = vmatpush1.bf16.msra.mxu1 %v11018_v54 }
 0x2b3   :  { %6772 = vmatprep.subr.bf16.mxu0 %v11019_v53  ;;  %6804 = vmatprep.subr.bf16.mxu1 %v11020_v37 }
 0x338   :  { %v1662_v31 = vpop.f32.mrb[4].mxu0  ;;  %v1737_v30 = vpop.f32.mrb[12].mxu1 }
 0x339   :  { %v8155_v9 = vadd.f32 %v1662_v31, %v11021_v20  ;;  %v1664_v38 = vpop.f32.mrb[5].mxu0  ;;  %v1739_v35 = vpop.f32.mrb[13].mxu1  ;;  %v8179_v33 = vadd.f32 %v1737_v30, %v11022_v29 }
 0x33a   :  { %v8156_v58 = vadd.f32 %v1664_v38, %v10990_v10  ;;  %v8180_v54 = vadd.f32 %v1739_v35, %v11023_v43 }
 0x33b   :  { %v6181_v27 = vmul.f32 -1.442695, %v8155_v9  ;;  %v6183_v62 = vmul.f32 -1.442695, %v8179_v33 }
 0x33c   :  { %v6182_v2 = vmul.f32 -1.442695, %v8156_v58 }
 0x33d   :  { %8416 = vpow2.f32 %v6181_v27 }
 0x33e   :  { %8418 = vpow2.f32 %v6182_v2 }
 0x33f   :  { %8420 = vtanh.f32 %v8180_v54 }
 0x340   :  { %8422 = vpow2.f32 %v6183_v62 }
 0x347   :  { %v8417_v53 = vpop.eup %8416 }
 0x348   :  { %v1932_v46 = vadd.f32 1.0, %v8417_v53  ;;  %v8419_v37 = vpop.eup %8418 }
 0x349   :  { %v1933_v31 = vadd.f32 1.0, %v8419_v37  ;;  %v8421_v20 = vpop.eup %8420 }
 0x34a   :  { %8424 = vrcp.f32 %v1932_v46  ;;  %v8423_v60 = vpop.eup %8422 }
 0x34b   :  { %8426 = vrcp.f32 %v1933_v31  ;;  %v1934_v27 = vadd.f32 1.0, %v8423_v60 }
 0x34d   :  { %8428 = vrcp.f32 %v1934_v27 }
 0x354   :  { %v8425_v38 = vpop.eup %8424 }
 0x355   :  { %v1954_v9 = vmul.f32 %v8425_v38, %v8421_v20  ;;  %v8427_v58 = vpop.eup %8426 }
 0x356   :  { %v1952_v2 = vmul.f32 %v8427_v58, %v9623_v1 }
 0x357   :  { %v8429_v35 = vpop.eup %8428 }
 0x358   :  { %v9723_v30 = vadd.f32 %v1954_v9, %v1952_v2 }
 0x35a   :  { %8430 = vtanh.f32 %v9723_v30 }
 0x363   :  { %v1668_v33 = vpop.f32.mrb[32].mxu0  ;;  %v1743_v54 = vpop.f32.mrb[48].mxu1 }
 0x364   :  { %v8431_v62 = vpop.eup %8430  ;;  %v1669_v46 = vpop.f32.mrb[33].mxu0 }
 0x365   :  { %v1744_v53 = vpop.f32.mrb[49].mxu1  ;;  %v9726_v37 = vmul.f32 %v8431_v62, %v8429_v35 }
 0x367   :  { %11024 = vst [vmem:[#allocation65_spill] sm:$0xff] %v9726_v37  ;;  %v1812_v31 = vpop.f32.mrb[34].mxu0  ;;  %v1887_v43 = vpop.f32.mrb[50].mxu1  ;;  %2031 = vmatmul.mubr.f32.vlgmr.msra.gmra.mrb[6].mxu0 %v9726_v37  ;;  %2106 = vmatmul.mubr.f32.vlgmr.msra.gmra.mrb[14].mxu1 %v9726_v37 }
 0x368   :  { %v1813_v60 = vpop.f32.mrb[35].mxu0  ;;  %v1888_v1 = vpop.f32.mrb[51].mxu1  ;;  %6774 = vmatpush1.bf16.msra.mxu0 %v9241_v6  ;;  %6806 = vmatpush1.bf16.msra.mxu1 %v9360_v47 }
 0x369   :  { %6776 = vmatprep.subr.bf16.mxu0 %v9247_v15  ;;  %6808 = vmatprep.subr.bf16.mxu1 %v9364_v16 }
 0x36a   :  { %2036 = vmatprep.mubr.f32.mxu0 %v10948_v18  ;;  %2111 = vmatprep.mubr.f32.mxu1 %v10948_v18 }
 0x36b   :  { %v1816_v20 = vpop.f32.mrb[18].mxu0  ;;  %v1891_v43 = vpop.f32.mrb[34].mxu1 }
 0x36c   :  { %v8201_v38 = vadd.f32 %v1816_v20, %v9514_v56  ;;  %v1818_v9 = vpop.f32.mrb[19].mxu0  ;;  %v1893_v58 = vpop.f32.mrb[35].mxu1  ;;  %6778 = vmatpush1.bf16.msra.mxu0 %v9256_v25  ;;  %6810 = vmatpush1.bf16.msra.mxu1 %v9371_v51  ;;  %v8217_v33 = vadd.f32 %v1891_v43, %v9528_v63 }
 0x36d   :  { %v8202_v27 = vadd.f32 %v1818_v9, %v10993_v45  ;;  %6780 = vmatprep.subr.bf16.mxu0 %v9263_v34  ;;  %6812 = vmatprep.subr.bf16.mxu1 %v9374_v40  ;;  %v8218_v54 = vadd.f32 %v1893_v58, %v9533_v32 }
 0x36e   :  { %v6184_v2 = vmul.f32 -1.442695, %v8201_v38  ;;  %v6186_v62 = vmul.f32 -1.442695, %v8217_v33 }
 0x36f   :  { %v6185_v35 = vmul.f32 -1.442695, %v8202_v27 }
 0x370   :  { %8432 = vpow2.f32 %v6184_v2  ;;  %6782 = vmatpush1.bf16.msra.mxu0 %v9273_v44  ;;  %6814 = vmatpush1.bf16.msra.mxu1 %v9381_v13 }
 0x371   :  { %6784 = vmatprep.subr.bf16.mxu0 %v9280_v57  ;;  %6816 = vmatprep.subr.bf16.mxu1 %v9385_v48  ;;  %8434 = vpow2.f32 %v6185_v35 }
 0x372   :  { %8436 = vtanh.f32 %v8218_v54 }
 0x373   :  { %8438 = vpow2.f32 %v6186_v62  ;;  %v11027_v62 = vld [vmem:[#allocation42_spill] sm:$0xff] }
 0x374   :  { %6786 = vmatpush1.bf16.msra.mxu0 %v9289_v3  ;;  %6818 = vmatpush1.bf16.msra.mxu1 %v9392_v52 }
 0x375   :  { %6788 = vmatprep.subr.bf16.mxu0 %v9296_v14  ;;  %6820 = vmatprep.subr.bf16.mxu1 %v9395_v39 }
 0x378   :  { %6790 = vmatpush1.bf16.msra.mxu0 %v9304_v26  ;;  %6822 = vmatpush1.bf16.msra.mxu1 %v9400_v0 }
 0x379   :  { %6792 = vmatprep.subr.bf16.mxu0 %v9311_v41  ;;  %6824 = vmatprep.subr.bf16.mxu1 %v9403_v19 }
 0x37a   :  { %v8433_v46 = vpop.eup %8432 }
 0x37b   :  { %v1935_v53 = vadd.f32 1.0, %v8433_v46  ;;  %v8435_v31 = vpop.eup %8434  ;;  %v11028_v46 = vld [vmem:[#allocation29_spill] sm:$0xff] }
 0x37c   :  { %6794 = vmatpush1.bf16.msra.mxu0 %v9319_v59  ;;  %6826 = vmatpush1.bf16.msra.mxu1 %v9408_v17  ;;  %v1936_v60 = vadd.f32 1.0, %v8435_v31  ;;  %v8437_v1 = vpop.eup %8436  ;;  %v11030_v31 = vld [vmem:[#allocation30_spill] sm:$0xff] }
 0x37d   :  { %8440 = vrcp.f32 %v1935_v53  ;;  %6796 = vmatprep.subr.bf16.mxu0 %v9326_v12  ;;  %6828 = vmatprep.subr.bf16.mxu1 %v9411_v4  ;;  %v8439_v20 = vpop.eup %8438  ;;  %v11029_v53 = vld [vmem:[#allocation43_spill] sm:$0xff] }
 0x37e   :  { %8442 = vrcp.f32 %v1936_v60  ;;  %v1937_v58 = vadd.f32 1.0, %v8439_v20  ;;  %v11031_v60 = vld [vmem:[#allocation44_spill] sm:$0xff]  ;;  %v11033_v20 = vld [vmem:[#allocation45_spill] sm:$0xff] }
 0x380   :  { %6798 = vmatpush1.bf16.msra.mxu0 %v9334_v21  ;;  %6830 = vmatpush1.bf16.msra.mxu1 %v9416_v24  ;;  %8444 = vrcp.f32 %v1937_v58  ;;  %v11037_v58 = vld [vmem:[#allocation47_spill] sm:$0xff] }
 0x381   :  { %6800 = vmatprep.subr.bf16.mxu0 %v9341_v42  ;;  %6832 = vmatprep.subr.bf16.mxu1 %v9419_v8 }
 0x384   :  { %6802 = vmatpush1.bf16.msra.mxu0 %v9349_v61  ;;  %6834 = vmatpush1.bf16.msra.mxu1 %v9424_v36 }
 0x385   :  { %6836 = vmatprep.subr.bf16.mxu0 %v9093_v49  ;;  %6868 = vmatprep.subr.bf16.mxu1 %v9170_v23 }
 0x387   :  { %v8441_v43 = vpop.eup %8440 }
 0x388   :  { %v1955_v38 = vmul.f32 %v8441_v43, %v8437_v1  ;;  %v8443_v9 = vpop.eup %8442  ;;  %v11032_v1 = vld [vmem:[#allocation31_spill] sm:$0xff]  ;;  %v11034_v43 = vld [vmem:[#allocation32_spill] sm:$0xff] }
 0x389   :  { %v1953_v27 = vmul.f32 %v8443_v9, %v9665_v28  ;;  %v11026_v28 = vld [vmem:[#allocation28_spill] sm:$0xff]  ;;  %v11036_v9 = vld [vmem:[#allocation33_spill] sm:$0xff] }
 0x38a   :  { %v8445_v35 = vpop.eup %8444 }
 0x38b   :  { %v9769_v2 = vadd.f32 %v1955_v38, %v1953_v27  ;;  %v11035_v38 = vld [vmem:[#allocation46_spill] sm:$0xff] }
 0x38c   :  { %v11038_v27 = vld [vmem:[#allocation34_spill] sm:$0xff] }
 0x38d   :  { %8446 = vtanh.f32 %v9769_v2 }
 0x397   :  { %v8447_v33 = vpop.eup %8446 }
 0x398   :  { %v9772_v54 = vmul.f32 %v8447_v33, %v8445_v35  ;;  %v11039_v35 = vld [vmem:[#allocation48_spill] sm:$0xff]  ;;  %v11040_v33 = vld [vmem:[#allocation35_spill] sm:$0xff] }
 0x39a   :  { %11025 = vst [vmem:[#allocation71_spill] sm:$0xff] %v9772_v54  ;;  %2037 = vmatmul.mubr.f32.gmra.mrb[36].mxu0 %v9772_v54  ;;  %2112 = vmatmul.mubr.f32.gmra.mrb[52].mxu1 %v9772_v54 }
 0x39b   :  { %2180 = vmatprep.mubr.f32.mxu0 %v10948_v18  ;;  %2255 = vmatprep.mubr.f32.mxu1 %v10948_v18 }
 0x39e   :  { %2181 = vmatmul.mubr.f32.vlgmr.msra.gmra.mrb[38].mxu0 %v9726_v37  ;;  %2256 = vmatmul.mubr.f32.vlgmr.msra.gmra.mrb[54].mxu1 %v9726_v37  ;;  %v11042_v37 = vld [vmem:[#allocation36_spill] sm:$0xff] }
 0x39f   :  { %2184 = vmatprep.mubr.f32.mxu0 %v10948_v18  ;;  %2259 = vmatprep.mubr.f32.mxu1 %v10948_v18 }
 0x3a0   :  { %6838 = vmatpush1.bf16.msra.mxu0 %v10968_v55  ;;  %6870 = vmatpush1.bf16.msra.mxu1 %v9239_v5 }
 0x3a1   :  { %6840 = vmatprep.subr.bf16.mxu0 %v10969_v50  ;;  %6872 = vmatprep.subr.bf16.mxu1 %v9245_v11 }
 0x3a2   :  { %2185 = vmatmul.mubr.f32.gmra.mrb[16].mxu0 %v9772_v54  ;;  %2260 = vmatmul.mubr.f32.gmra.mrb[32].mxu1 %v9772_v54  ;;  %v11041_v54 = vld [vmem:[#allocation49_spill] sm:$0xff] }
 0x3a3   :  { %2400 = vmatprep.mubr.f32.mxu0 %v10948_v18  ;;  %2475 = vmatprep.mubr.f32.mxu1 %v10948_v18 }
 0x3a4   :  { %6842 = vmatpush1.bf16.msra.mxu0 %v9147_v7  ;;  %6874 = vmatpush1.bf16.msra.mxu1 %v9254_v22 }
 0x3a5   :  { %6844 = vmatprep.subr.bf16.mxu0 %v11026_v28  ;;  %6876 = vmatprep.subr.bf16.mxu1 %v11027_v62 }
 0x3a8   :  { %6846 = vmatpush1.bf16.msra.mxu0 %v11028_v46  ;;  %6878 = vmatpush1.bf16.msra.mxu1 %v11029_v53 }
 0x3a9   :  { %6848 = vmatprep.subr.bf16.mxu0 %v11030_v31  ;;  %6880 = vmatprep.subr.bf16.mxu1 %v11031_v60  ;;  %v11052_v60 = vld [vmem:[#allocation66_spill] sm:$0xff] }
 0x3ac   :  { %6850 = vmatpush1.bf16.msra.mxu0 %v11032_v1  ;;  %6882 = vmatpush1.bf16.msra.mxu1 %v11033_v20  ;;  %v11043_v1 = vld [vmem:[#allocation50_spill] sm:$0xff]  ;;  %v11044_v20 = vld [vmem:[#allocation37_spill] sm:$0xff] }
 0x3ad   :  { %6852 = vmatprep.subr.bf16.mxu0 %v11034_v43  ;;  %6884 = vmatprep.subr.bf16.mxu1 %v11035_v38  ;;  %v11045_v43 = vld [vmem:[#allocation51_spill] sm:$0xff]  ;;  %v11046_v38 = vld [vmem:[#allocation38_spill] sm:$0xff] }
 0x3b0   :  { %6854 = vmatpush1.bf16.msra.mxu0 %v11036_v9  ;;  %6886 = vmatpush1.bf16.msra.mxu1 %v11037_v58  ;;  %v11047_v9 = vld [vmem:[#allocation52_spill] sm:$0xff]  ;;  %v11048_v58 = vld [vmem:[#allocation39_spill] sm:$0xff] }
 0x3b1   :  { %6856 = vmatprep.subr.bf16.mxu0 %v11038_v27  ;;  %6888 = vmatprep.subr.bf16.mxu1 %v11039_v35  ;;  %v11049_v27 = vld [vmem:[#allocation53_spill] sm:$0xff]  ;;  %v11050_v35 = vld [vmem:[#allocation40_spill] sm:$0xff] }
 0x3b4   :  { %6858 = vmatpush1.bf16.msra.mxu0 %v11040_v33  ;;  %6890 = vmatpush1.bf16.msra.mxu1 %v11041_v54  ;;  %v11051_v33 = vld [vmem:[#allocation54_spill] sm:$0xff] }
 0x3b5   :  { %6860 = vmatprep.subr.bf16.mxu0 %v11042_v37  ;;  %6892 = vmatprep.subr.bf16.mxu1 %v11043_v1 }
 0x3b8   :  { %6862 = vmatpush1.bf16.msra.mxu0 %v11044_v20  ;;  %6894 = vmatpush1.bf16.msra.mxu1 %v11045_v43 }
 0x3b9   :  { %6864 = vmatprep.subr.bf16.mxu0 %v11046_v38  ;;  %6896 = vmatprep.subr.bf16.mxu1 %v11047_v9  ;;  %v11053_v9 = vld [vmem:[#allocation70_spill] sm:$0xff] }
 0x3bc   :  { %6866 = vmatpush1.bf16.msra.mxu0 %v11048_v58  ;;  %6898 = vmatpush1.bf16.msra.mxu1 %v11049_v27 }
 0x3bd   :  { %6900 = vmatprep.subr.bf16.mxu0 %v11050_v35  ;;  %6932 = vmatprep.subr.bf16.mxu1 %v11051_v33 }
 0x43a   :  { %v2032_v54 = vpop.f32.mrb[6].mxu0  ;;  %v2107_v37 = vpop.f32.mrb[14].mxu1 }
 0x43b   :  { %v8157_v1 = vadd.f32 %v2032_v54, %v11052_v60  ;;  %v2034_v31 = vpop.f32.mrb[7].mxu0  ;;  %v2109_v20 = vpop.f32.mrb[15].mxu1  ;;  %v8181_v58 = vadd.f32 %v2107_v37, %v11022_v29 }
 0x43c   :  { %v8158_v43 = vadd.f32 %v2034_v31, %v10990_v10  ;;  %v8182_v27 = vadd.f32 %v2109_v20, %v11053_v9 }
 0x43d   :  { %v6187_v53 = vmul.f32 -1.442695, %v8157_v1  ;;  %v6189_v46 = vmul.f32 -1.442695, %v8181_v58 }
 0x43e   :  { %v6188_v38 = vmul.f32 -1.442695, %v8158_v43 }
 0x43f   :  { %8448 = vpow2.f32 %v6187_v53 }
 0x440   :  { %8450 = vpow2.f32 %v6188_v38 }
 0x441   :  { %8452 = vtanh.f32 %v8182_v27 }
 0x442   :  { %8454 = vpow2.f32 %v6189_v46 }
 0x449   :  { %v8449_v35 = vpop.eup %8448 }
 0x44a   :  { %v2302_v62 = vadd.f32 1.0, %v8449_v35  ;;  %v8451_v33 = vpop.eup %8450 }
 0x44b   :  { %v2303_v54 = vadd.f32 1.0, %v8451_v33  ;;  %v8453_v60 = vpop.eup %8452 }
 0x44c   :  { %8456 = vrcp.f32 %v2302_v62  ;;  %v8455_v28 = vpop.eup %8454 }
 0x44d   :  { %8458 = vrcp.f32 %v2303_v54  ;;  %v2304_v53 = vadd.f32 1.0, %v8455_v28 }
 0x44f   :  { %8460 = vrcp.f32 %v2304_v53 }
 0x456   :  { %v8457_v31 = vpop.eup %8456 }
 0x457   :  { %v2324_v1 = vmul.f32 %v8457_v31, %v8453_v60  ;;  %v8459_v43 = vpop.eup %8458 }
 0x458   :  { %v2322_v38 = vmul.f32 %v8459_v43, %v9723_v30 }
 0x459   :  { %v8461_v20 = vpop.eup %8460 }
 0x45a   :  { %v9823_v37 = vadd.f32 %v2324_v1, %v2322_v38 }
 0x45c   :  { %8462 = vtanh.f32 %v9823_v37 }
 0x466   :  { %v8463_v58 = vpop.eup %8462 }
 0x467   :  { %v9826_v27 = vmul.f32 %v8463_v58, %v8461_v20 }
 0x469   :  { %11054 = vst [vmem:[#allocation69_spill] sm:$0xff] %v9826_v27  ;;  %2401 = vmatmul.mubr.f32.vlgmr.msra.gmra.mrb[40].mxu0 %v9826_v27  ;;  %2476 = vmatmul.mubr.f32.vlgmr.msra.gmra.mrb[16].mxu1 %v9826_v27 }
 0x46a   :  { %6902 = vmatpush1.bf16.msra.mxu0 %v9241_v6  ;;  %6934 = vmatpush1.bf16.msra.mxu1 %v9360_v47 }
 0x46b   :  { %6904 = vmatprep.subr.bf16.mxu0 %v9247_v15  ;;  %6936 = vmatprep.subr.bf16.mxu1 %v9364_v16 }
 0x46c   :  { %2406 = vmatprep.mubr.f32.mxu0 %v10948_v18  ;;  %2481 = vmatprep.mubr.f32.mxu1 %v10948_v18 }
 0x46d   :  { %v2038_v30 = vpop.f32.mrb[36].mxu0  ;;  %v2113_v28 = vpop.f32.mrb[52].mxu1 }
 0x46e   :  { %v2039_v62 = vpop.f32.mrb[37].mxu0  ;;  %v2114_v46 = vpop.f32.mrb[53].mxu1  ;;  %6906 = vmatpush1.bf16.msra.mxu0 %v9256_v25  ;;  %6938 = vmatpush1.bf16.msra.mxu1 %v9371_v51 }
 0x46f   :  { %6908 = vmatprep.subr.bf16.mxu0 %v9263_v34  ;;  %6940 = vmatprep.subr.bf16.mxu1 %v9374_v40 }
 0x471   :  { %v2182_v60 = vpop.f32.mrb[38].mxu0  ;;  %v2257_v35 = vpop.f32.mrb[54].mxu1 }
 0x472   :  { %v2183_v33 = vpop.f32.mrb[39].mxu0  ;;  %v2258_v54 = vpop.f32.mrb[55].mxu1  ;;  %6910 = vmatpush1.bf16.msra.mxu0 %v9273_v44  ;;  %6942 = vmatpush1.bf16.msra.mxu1 %v9381_v13 }
 0x473   :  { %6912 = vmatprep.subr.bf16.mxu0 %v9280_v57  ;;  %6944 = vmatprep.subr.bf16.mxu1 %v9385_v48 }
 0x475   :  { %v2186_v31 = vpop.f32.mrb[16].mxu0  ;;  %v2261_v1 = vpop.f32.mrb[32].mxu1 }
 0x476   :  { %v8199_v43 = vadd.f32 %v2186_v31, %v9514_v56  ;;  %v2188_v53 = vpop.f32.mrb[17].mxu0  ;;  %v2263_v38 = vpop.f32.mrb[33].mxu1  ;;  %6914 = vmatpush1.bf16.msra.mxu0 %v9289_v3  ;;  %6946 = vmatpush1.bf16.msra.mxu1 %v9392_v52  ;;  %v8215_v28 = vadd.f32 %v2261_v1, %v9528_v63 }
 0x477   :  { %v8200_v20 = vadd.f32 %v2188_v53, %v10993_v45  ;;  %6916 = vmatprep.subr.bf16.mxu0 %v9296_v14  ;;  %6948 = vmatprep.subr.bf16.mxu1 %v9395_v39  ;;  %v8216_v62 = vadd.f32 %v2263_v38, %v9533_v32 }
 0x478   :  { %v6190_v58 = vmul.f32 -1.442695, %v8199_v43  ;;  %v6192_v46 = vmul.f32 -1.442695, %v8215_v28 }
 0x479   :  { %v6191_v30 = vmul.f32 -1.442695, %v8200_v20 }
 0x47a   :  { %8464 = vpow2.f32 %v6190_v58  ;;  %6918 = vmatpush1.bf16.msra.mxu0 %v9304_v26  ;;  %6950 = vmatpush1.bf16.msra.mxu1 %v9400_v0 }
 0x47b   :  { %6920 = vmatprep.subr.bf16.mxu0 %v9311_v41  ;;  %6952 = vmatprep.subr.bf16.mxu1 %v9403_v19  ;;  %8466 = vpow2.f32 %v6191_v30 }
 0x47c   :  { %8468 = vtanh.f32 %v8216_v62 }
 0x47d   :  { %8470 = vpow2.f32 %v6192_v46 }
 0x47e   :  { %6922 = vmatpush1.bf16.msra.mxu0 %v9319_v59  ;;  %6954 = vmatpush1.bf16.msra.mxu1 %v9408_v17 }
 0x47f   :  { %6924 = vmatprep.subr.bf16.mxu0 %v9326_v12  ;;  %6956 = vmatprep.subr.bf16.mxu1 %v9411_v4 }
 0x482   :  { %6926 = vmatpush1.bf16.msra.mxu0 %v9334_v21  ;;  %6958 = vmatpush1.bf16.msra.mxu1 %v9416_v24 }
 0x483   :  { %6928 = vmatprep.subr.bf16.mxu0 %v9341_v42  ;;  %6960 = vmatprep.subr.bf16.mxu1 %v9419_v8 }
 0x484   :  { %v8465_v60 = vpop.eup %8464 }
 0x485   :  { %v2305_v35 = vadd.f32 1.0, %v8465_v60  ;;  %v8467_v33 = vpop.eup %8466  ;;  %v11057_v60 = vld [vmem:[#allocation42_spill] sm:$0xff] }
 0x486   :  { %6930 = vmatpush1.bf16.msra.mxu0 %v9349_v61  ;;  %6962 = vmatpush1.bf16.msra.mxu1 %v9424_v36  ;;  %v2306_v54 = vadd.f32 1.0, %v8467_v33  ;;  %v8469_v31 = vpop.eup %8468  ;;  %v11059_v33 = vld [vmem:[#allocation43_spill] sm:$0xff] }
 0x487   :  { %8472 = vrcp.f32 %v2305_v35  ;;  %6964 = vmatprep.subr.bf16.mxu0 %v9093_v49  ;;  %6996 = vmatprep.subr.bf16.mxu1 %v9170_v23  ;;  %v8471_v1 = vpop.eup %8470  ;;  %v11058_v35 = vld [vmem:[#allocation29_spill] sm:$0xff] }
 0x488   :  { %8474 = vrcp.f32 %v2306_v54  ;;  %v2307_v20 = vadd.f32 1.0, %v8471_v1  ;;  %v11060_v54 = vld [vmem:[#allocation30_spill] sm:$0xff]  ;;  %v11062_v1 = vld [vmem:[#allocation31_spill] sm:$0xff] }
 0x48a   :  { %8476 = vrcp.f32 %v2307_v20  ;;  %v11066_v20 = vld [vmem:[#allocation33_spill] sm:$0xff] }
 0x491   :  { %v8473_v43 = vpop.eup %8472 }
 0x492   :  { %v2325_v53 = vmul.f32 %v8473_v43, %v8469_v31  ;;  %v8475_v38 = vpop.eup %8474  ;;  %v11061_v31 = vld [vmem:[#allocation44_spill] sm:$0xff]  ;;  %v11063_v43 = vld [vmem:[#allocation45_spill] sm:$0xff] }
 0x493   :  { %v2323_v58 = vmul.f32 %v8475_v38, %v9769_v2  ;;  %v11056_v2 = vld [vmem:[#allocation28_spill] sm:$0xff]  ;;  %v11065_v38 = vld [vmem:[#allocation46_spill] sm:$0xff] }
 0x494   :  { %v8477_v28 = vpop.eup %8476 }
 0x495   :  { %v9869_v30 = vadd.f32 %v2325_v53, %v2323_v58  ;;  %v11064_v53 = vld [vmem:[#allocation32_spill] sm:$0xff]  ;;  %v11067_v58 = vld [vmem:[#allocation47_spill] sm:$0xff] }
 0x497   :  { %8478 = vtanh.f32 %v9869_v30 }
 0x4a1   :  { %v8479_v62 = vpop.eup %8478 }
 0x4a2   :  { %v9872_v46 = vmul.f32 %v8479_v62, %v8477_v28  ;;  %v11068_v28 = vld [vmem:[#allocation34_spill] sm:$0xff]  ;;  %v11069_v62 = vld [vmem:[#allocation48_spill] sm:$0xff] }
 0x4a4   :  { %11055 = vst [vmem:[#allocation70_spill] sm:$0xff] %v9872_v46  ;;  %2407 = vmatmul.mubr.f32.gmra.mrb[42].mxu0 %v9872_v46  ;;  %2482 = vmatmul.mubr.f32.gmra.mrb[56].mxu1 %v9872_v46 }
 0x4a5   :  { %2550 = vmatprep.mubr.f32.mxu0 %v10948_v18  ;;  %2625 = vmatprep.mubr.f32.mxu1 %v10948_v18 }
 0x4a8   :  { %2551 = vmatmul.mubr.f32.vlgmr.msra.gmra.mrb[44].mxu0 %v9826_v27  ;;  %2626 = vmatmul.mubr.f32.vlgmr.msra.gmra.mrb[58].mxu1 %v9826_v27  ;;  %v11071_v27 = vld [vmem:[#allocation49_spill] sm:$0xff] }
 0x4a9   :  { %2554 = vmatprep.mubr.f32.mxu0 %v10948_v18  ;;  %2629 = vmatprep.mubr.f32.mxu1 %v10948_v18 }
 0x4aa   :  { %6966 = vmatpush1.bf16.msra.mxu0 %v10968_v55  ;;  %6998 = vmatpush1.bf16.msra.mxu1 %v9239_v5 }
 0x4ab   :  { %6968 = vmatprep.subr.bf16.mxu0 %v10969_v50  ;;  %7000 = vmatprep.subr.bf16.mxu1 %v9245_v11 }
 0x4ac   :  { %2555 = vmatmul.mubr.f32.gmra.mrb[14].mxu0 %v9872_v46  ;;  %2630 = vmatmul.mubr.f32.gmra.mrb[30].mxu1 %v9872_v46  ;;  %v11070_v46 = vld [vmem:[#allocation35_spill] sm:$0xff] }
 0x4ad   :  { %2766 = vmatprep.mubr.f32.mxu0 %v10948_v18  ;;  %2841 = vmatprep.mubr.f32.mxu1 %v10948_v18 }
 0x4ae   :  { %6970 = vmatpush1.bf16.msra.mxu0 %v9147_v7  ;;  %7002 = vmatpush1.bf16.msra.mxu1 %v9254_v22 }
 0x4af   :  { %6972 = vmatprep.subr.bf16.mxu0 %v11056_v2  ;;  %7004 = vmatprep.subr.bf16.mxu1 %v11057_v60 }
 0x4b2   :  { %6974 = vmatpush1.bf16.msra.mxu0 %v11058_v35  ;;  %7006 = vmatpush1.bf16.msra.mxu1 %v11059_v33 }
 0x4b3   :  { %6976 = vmatprep.subr.bf16.mxu0 %v11060_v54  ;;  %7008 = vmatprep.subr.bf16.mxu1 %v11061_v31  ;;  %v11072_v31 = vld [vmem:[#allocation36_spill] sm:$0xff] }
 0x4b6   :  { %6978 = vmatpush1.bf16.msra.mxu0 %v11062_v1  ;;  %7010 = vmatpush1.bf16.msra.mxu1 %v11063_v43  ;;  %v11073_v1 = vld [vmem:[#allocation50_spill] sm:$0xff]  ;;  %v11074_v43 = vld [vmem:[#allocation37_spill] sm:$0xff] }
 0x4b7   :  { %6980 = vmatprep.subr.bf16.mxu0 %v11064_v53  ;;  %7012 = vmatprep.subr.bf16.mxu1 %v11065_v38  ;;  %v11075_v53 = vld [vmem:[#allocation51_spill] sm:$0xff]  ;;  %v11076_v38 = vld [vmem:[#allocation38_spill] sm:$0xff] }
 0x4ba   :  { %6982 = vmatpush1.bf16.msra.mxu0 %v11066_v20  ;;  %7014 = vmatpush1.bf16.msra.mxu1 %v11067_v58  ;;  %v11077_v20 = vld [vmem:[#allocation52_spill] sm:$0xff]  ;;  %v11078_v58 = vld [vmem:[#allocation39_spill] sm:$0xff] }
 0x4bb   :  { %6984 = vmatprep.subr.bf16.mxu0 %v11068_v28  ;;  %7016 = vmatprep.subr.bf16.mxu1 %v11069_v62  ;;  %v11079_v28 = vld [vmem:[#allocation53_spill] sm:$0xff]  ;;  %v11080_v62 = vld [vmem:[#allocation40_spill] sm:$0xff] }
 0x4be   :  { %6986 = vmatpush1.bf16.msra.mxu0 %v11070_v46  ;;  %7018 = vmatpush1.bf16.msra.mxu1 %v11071_v27  ;;  %v11081_v46 = vld [vmem:[#allocation54_spill] sm:$0xff] }
 0x4bf   :  { %6988 = vmatprep.subr.bf16.mxu0 %v11072_v31  ;;  %7020 = vmatprep.subr.bf16.mxu1 %v11073_v1  ;;  %v11082_v27 = vld [vmem:[#allocation66_spill] sm:$0xff]  ;;  %v11083_v31 = vld [vmem:[#allocation55_spill] sm:$0xff]  ;;  %v11084_v1 = vld [vmem:[#allocation56_spill] sm:$0xff] }
 0x4c0   :  { %v305_v54 = vadd.f32 %v11083_v31, %v11082_v27 }
 0x4c2   :  { %6990 = vmatpush1.bf16.msra.mxu0 %v11074_v43  ;;  %7022 = vmatpush1.bf16.msra.mxu1 %v11075_v53  ;;  %v307_v43 = vadd.f32 %v11084_v1, %v10990_v10 }
 0x4c3   :  { %6992 = vmatprep.subr.bf16.mxu0 %v11076_v38  ;;  %7024 = vmatprep.subr.bf16.mxu1 %v11077_v20 }
 0x4c6   :  { %6994 = vmatpush1.bf16.msra.mxu0 %v11078_v58  ;;  %7026 = vmatpush1.bf16.msra.mxu1 %v11079_v28 }
 0x4c7   :  { %7028 = vmatprep.subr.bf16.mxu0 %v11080_v62  ;;  %7060 = vmatprep.subr.bf16.mxu1 %v11081_v46 }
 0x53c   :  { %v2402_v33 = vpop.f32.mrb[40].mxu0  ;;  %v2477_v53 = vpop.f32.mrb[16].mxu1 }
 0x53d   :  { %v2640_v35 = vadd.f32 %v2402_v33, %v305_v54  ;;  %v2404_v38 = vpop.f32.mrb[41].mxu0  ;;  %v2479_v60 = vpop.f32.mrb[17].mxu1  ;;  %v8183_v62 = vadd.f32 %v2477_v53, %v11022_v29 }
 0x53e   :  { %v2641_v20 = vadd.f32 %v2404_v38, %v307_v43  ;;  %v8184_v46 = vadd.f32 %v2479_v60, %v11053_v9 }
 0x53f   :  { %v6193_v2 = vmul.f32 -1.442695, %v2640_v35  ;;  %v6195_v28 = vmul.f32 -1.442695, %v8183_v62 }
 0x540   :  { %v6194_v58 = vmul.f32 -1.442695, %v2641_v20 }
 0x541   :  { %8480 = vpow2.f32 %v6193_v2 }
 0x542   :  { %8482 = vpow2.f32 %v6194_v58 }
 0x543   :  { %8484 = vtanh.f32 %v8184_v46 }
 0x544   :  { %8486 = vpow2.f32 %v6195_v28 }
 0x54b   :  { %v8481_v22 = vpop.eup %8480 }
 0x54c   :  { %v2670_v31 = vadd.f32 1.0, %v8481_v22  ;;  %v8483_v27 = vpop.eup %8482 }
 0x54d   :  { %v2671_v1 = vadd.f32 1.0, %v8483_v27  ;;  %v8485_v33 = vpop.eup %8484 }
 0x54e   :  { %8488 = vrcp.f32 %v2670_v31  ;;  %v8487_v54 = vpop.eup %8486 }
 0x54f   :  { %8490 = vrcp.f32 %v2671_v1  ;;  %v2672_v2 = vadd.f32 1.0, %v8487_v54 }
 0x551   :  { %8492 = vrcp.f32 %v2672_v2 }
 0x558   :  { %v8489_v43 = vpop.eup %8488 }
 0x559   :  { %v2692_v35 = vmul.f32 %v8489_v43, %v8485_v33  ;;  %v8491_v38 = vpop.eup %8490 }
 0x55a   :  { %v2690_v20 = vmul.f32 %v8491_v38, %v9823_v37 }
 0x55b   :  { %v8493_v22 = vpop.eup %8492 }
 0x55c   :  { %v9925_v53 = vadd.f32 %v2692_v35, %v2690_v20 }
 0x55e   :  { %8494 = vtanh.f32 %v9925_v53 }
 0x568   :  { %v8495_v46 = vpop.eup %8494 }
 0x569   :  { %v9928_v60 = vmul.f32 %v8495_v46, %v8493_v22 }
 0x56b   :  { %11085 = vst [vmem:[#allocation55_spill] sm:$0xff] %v9928_v60  ;;  %2767 = vmatmul.mubr.f32.vlgmr.msra.gmra.mrb[46].mxu0 %v9928_v60  ;;  %2842 = vmatmul.mubr.f32.vlgmr.msra.gmra.mrb[18].mxu1 %v9928_v60 }
 0x56c   :  { %7030 = vmatpush1.bf16.msra.mxu0 %v9241_v6  ;;  %7062 = vmatpush1.bf16.msra.mxu1 %v9360_v47 }
 0x56d   :  { %7032 = vmatprep.subr.bf16.mxu0 %v9247_v15  ;;  %7064 = vmatprep.subr.bf16.mxu1 %v9364_v16 }
 0x56e   :  { %2772 = vmatprep.mubr.f32.mxu0 %v10948_v18  ;;  %2847 = vmatprep.mubr.f32.mxu1 %v10948_v18 }
 0x570   :  { %7034 = vmatpush1.bf16.msra.mxu0 %v9256_v25  ;;  %7066 = vmatpush1.bf16.msra.mxu1 %v9371_v51 }
 0x571   :  { %7036 = vmatprep.subr.bf16.mxu0 %v9263_v34  ;;  %7068 = vmatprep.subr.bf16.mxu1 %v9374_v40 }
 0x574   :  { %7038 = vmatpush1.bf16.msra.mxu0 %v9273_v44  ;;  %7070 = vmatpush1.bf16.msra.mxu1 %v9381_v13 }
 0x575   :  { %7040 = vmatprep.subr.bf16.mxu0 %v9280_v57  ;;  %7072 = vmatprep.subr.bf16.mxu1 %v9385_v48 }
 0x577   :  { %v2408_v37 = vpop.f32.mrb[42].mxu0  ;;  %v2483_v27 = vpop.f32.mrb[56].mxu1 }
 0x578   :  { %v2409_v58 = vpop.f32.mrb[43].mxu0  ;;  %v2484_v28 = vpop.f32.mrb[57].mxu1  ;;  %7042 = vmatpush1.bf16.msra.mxu0 %v9289_v3  ;;  %7074 = vmatpush1.bf16.msra.mxu1 %v9392_v52 }
 0x579   :  { %7044 = vmatprep.subr.bf16.mxu0 %v9296_v14  ;;  %7076 = vmatprep.subr.bf16.mxu1 %v9395_v39 }
 0x57b   :  { %v2552_v62 = vpop.f32.mrb[44].mxu0  ;;  %v2627_v31 = vpop.f32.mrb[58].mxu1 }
 0x57c   :  { %v2553_v1 = vpop.f32.mrb[45].mxu0  ;;  %v2628_v33 = vpop.f32.mrb[59].mxu1  ;;  %7046 = vmatpush1.bf16.msra.mxu0 %v9304_v26  ;;  %7078 = vmatpush1.bf16.msra.mxu1 %v9400_v0 }
 0x57d   :  { %7048 = vmatprep.subr.bf16.mxu0 %v9311_v41  ;;  %7080 = vmatprep.subr.bf16.mxu1 %v9403_v19 }
 0x57f   :  { %v2556_v54 = vpop.f32.mrb[14].mxu0  ;;  %v2631_v43 = vpop.f32.mrb[30].mxu1 }
 0x580   :  { %v8197_v35 = vadd.f32 %v2556_v54, %v9514_v56  ;;  %v2558_v38 = vpop.f32.mrb[15].mxu0  ;;  %v2633_v2 = vpop.f32.mrb[31].mxu1  ;;  %7050 = vmatpush1.bf16.msra.mxu0 %v9319_v59  ;;  %7082 = vmatpush1.bf16.msra.mxu1 %v9408_v17  ;;  %v8213_v37 = vadd.f32 %v2631_v43, %v9528_v63 }
 0x581   :  { %v8198_v20 = vadd.f32 %v2558_v38, %v10993_v45  ;;  %7052 = vmatprep.subr.bf16.mxu0 %v9326_v12  ;;  %7084 = vmatprep.subr.bf16.mxu1 %v9411_v4  ;;  %v8214_v27 = vadd.f32 %v2633_v2, %v9533_v32 }
 0x582   :  { %v6196_v22 = vmul.f32 -1.442695, %v8197_v35  ;;  %v6198_v58 = vmul.f32 -1.442695, %v8213_v37 }
 0x583   :  { %v6197_v46 = vmul.f32 -1.442695, %v8198_v20 }
 0x584   :  { %8496 = vpow2.f32 %v6196_v22  ;;  %7054 = vmatpush1.bf16.msra.mxu0 %v9334_v21  ;;  %7086 = vmatpush1.bf16.msra.mxu1 %v9416_v24 }
 0x585   :  { %7056 = vmatprep.subr.bf16.mxu0 %v9341_v42  ;;  %7088 = vmatprep.subr.bf16.mxu1 %v9419_v8  ;;  %8498 = vpow2.f32 %v6197_v46 }
 0x586   :  { %8500 = vtanh.f32 %v8214_v27 }
 0x587   :  { %8502 = vpow2.f32 %v6198_v58  ;;  %v11088_v58 = vld [vmem:[#allocation28_spill] sm:$0xff] }
 0x588   :  { %7058 = vmatpush1.bf16.msra.mxu0 %v9349_v61  ;;  %7090 = vmatpush1.bf16.msra.mxu1 %v9424_v36 }
 0x589   :  { %7092 = vmatprep.subr.bf16.mxu0 %v9093_v49  ;;  %7124 = vmatprep.subr.bf16.mxu1 %v9170_v23 }
 0x58e   :  { %v8497_v28 = vpop.eup %8496 }
 0x58f   :  { %v2673_v62 = vadd.f32 1.0, %v8497_v28  ;;  %v8499_v31 = vpop.eup %8498  ;;  %v11089_v28 = vld [vmem:[#allocation42_spill] sm:$0xff] }
 0x590   :  { %v2674_v1 = vadd.f32 1.0, %v8499_v31  ;;  %v8501_v33 = vpop.eup %8500  ;;  %v11091_v31 = vld [vmem:[#allocation43_spill] sm:$0xff] }
 0x591   :  { %8504 = vrcp.f32 %v2673_v62  ;;  %v8503_v54 = vpop.eup %8502  ;;  %v11090_v62 = vld [vmem:[#allocation29_spill] sm:$0xff] }
 0x592   :  { %8506 = vrcp.f32 %v2674_v1  ;;  %v2675_v20 = vadd.f32 1.0, %v8503_v54  ;;  %v11092_v1 = vld [vmem:[#allocation30_spill] sm:$0xff]  ;;  %v11094_v54 = vld [vmem:[#allocation31_spill] sm:$0xff] }
 0x594   :  { %8508 = vrcp.f32 %v2675_v20  ;;  %v11098_v20 = vld [vmem:[#allocation33_spill] sm:$0xff] }
 0x59b   :  { %v8505_v43 = vpop.eup %8504 }
 0x59c   :  { %v2693_v35 = vmul.f32 %v8505_v43, %v8501_v33  ;;  %v8507_v38 = vpop.eup %8506  ;;  %v11093_v33 = vld [vmem:[#allocation44_spill] sm:$0xff]  ;;  %v11095_v43 = vld [vmem:[#allocation45_spill] sm:$0xff] }
 0x59d   :  { %v2691_v22 = vmul.f32 %v8507_v38, %v9869_v30  ;;  %v11087_v30 = vld [vmem:[#allocation41_spill] sm:$0xff]  ;;  %v11097_v38 = vld [vmem:[#allocation46_spill] sm:$0xff] }
 0x59e   :  { %v8509_v2 = vpop.eup %8508 }
 0x59f   :  { %v9971_v46 = vadd.f32 %v2693_v35, %v2691_v22  ;;  %v11096_v35 = vld [vmem:[#allocation32_spill] sm:$0xff]  ;;  %v11099_v22 = vld [vmem:[#allocation47_spill] sm:$0xff] }
 0x5a1   :  { %8510 = vtanh.f32 %v9971_v46 }
 0x5ab   :  { %v8511_v37 = vpop.eup %8510 }
 0x5ac   :  { %v9974_v27 = vmul.f32 %v8511_v37, %v8509_v2  ;;  %v11100_v2 = vld [vmem:[#allocation34_spill] sm:$0xff]  ;;  %v11101_v37 = vld [vmem:[#allocation48_spill] sm:$0xff] }
 0x5ae   :  { %11086 = vst [vmem:[#allocation56_spill] sm:$0xff] %v9974_v27  ;;  %2773 = vmatmul.mubr.f32.gmra.mrb[48].mxu0 %v9974_v27  ;;  %2848 = vmatmul.mubr.f32.gmra.mrb[60].mxu1 %v9974_v27 }
 0x5af   :  { %2916 = vmatprep.mubr.f32.mxu0 %v10948_v18  ;;  %2991 = vmatprep.mubr.f32.mxu1 %v10948_v18 }
 0x5b2   :  { %2917 = vmatmul.mubr.f32.vlgmr.msra.gmra.mrb[50].mxu0 %v9928_v60  ;;  %2992 = vmatmul.mubr.f32.vlgmr.msra.gmra.mrb[62].mxu1 %v9928_v60  ;;  %v11102_v60 = vld [vmem:[#allocation35_spill] sm:$0xff] }
 0x5b3   :  { %2920 = vmatprep.mubr.f32.mxu0 %v10948_v18  ;;  %2995 = vmatprep.mubr.f32.mxu1 %v10948_v18 }
 0x5b4   :  { %7094 = vmatpush1.bf16.msra.mxu0 %v10968_v55  ;;  %7126 = vmatpush1.bf16.msra.mxu1 %v9239_v5 }
 0x5b5   :  { %7096 = vmatprep.subr.bf16.mxu0 %v10969_v50  ;;  %7128 = vmatprep.subr.bf16.mxu1 %v9245_v11 }
 0x5b6   :  { %2921 = vmatmul.mubr.f32.gmra.mrb[12].mxu0 %v9974_v27  ;;  %2996 = vmatmul.mubr.f32.gmra.mrb[28].mxu1 %v9974_v27  ;;  %v11103_v27 = vld [vmem:[#allocation49_spill] sm:$0xff] }
 0x5b7   :  { %3132 = vmatprep.mubr.f32.mxu0 %v10948_v18  ;;  %3207 = vmatprep.mubr.f32.mxu1 %v10948_v18 }
 0x5b8   :  { %7098 = vmatpush1.bf16.msra.mxu0 %v9147_v7  ;;  %7130 = vmatpush1.bf16.msra.mxu1 %v11087_v30 }
 0x5b9   :  { %7100 = vmatprep.subr.bf16.mxu0 %v11088_v58  ;;  %7132 = vmatprep.subr.bf16.mxu1 %v11089_v28 }
 0x5bc   :  { %7102 = vmatpush1.bf16.msra.mxu0 %v11090_v62  ;;  %7134 = vmatpush1.bf16.msra.mxu1 %v11091_v31 }
 0x5bd   :  { %7104 = vmatprep.subr.bf16.mxu0 %v11092_v1  ;;  %7136 = vmatprep.subr.bf16.mxu1 %v11093_v33  ;;  %v11104_v33 = vld [vmem:[#allocation36_spill] sm:$0xff] }
 0x5c0   :  { %7106 = vmatpush1.bf16.msra.mxu0 %v11094_v54  ;;  %7138 = vmatpush1.bf16.msra.mxu1 %v11095_v43  ;;  %v11105_v54 = vld [vmem:[#allocation50_spill] sm:$0xff]  ;;  %v11106_v43 = vld [vmem:[#allocation37_spill] sm:$0xff] }
 0x5c1   :  { %7108 = vmatprep.subr.bf16.mxu0 %v11096_v35  ;;  %7140 = vmatprep.subr.bf16.mxu1 %v11097_v38  ;;  %v11107_v35 = vld [vmem:[#allocation51_spill] sm:$0xff]  ;;  %v11108_v38 = vld [vmem:[#allocation38_spill] sm:$0xff] }
 0x5c4   :  { %7110 = vmatpush1.bf16.msra.mxu0 %v11098_v20  ;;  %7142 = vmatpush1.bf16.msra.mxu1 %v11099_v22  ;;  %v11109_v20 = vld [vmem:[#allocation52_spill] sm:$0xff]  ;;  %v11110_v22 = vld [vmem:[#allocation39_spill] sm:$0xff] }
 0x5c5   :  { %7112 = vmatprep.subr.bf16.mxu0 %v11100_v2  ;;  %7144 = vmatprep.subr.bf16.mxu1 %v11101_v37  ;;  %v11111_v2 = vld [vmem:[#allocation53_spill] sm:$0xff]  ;;  %v11112_v37 = vld [vmem:[#allocation40_spill] sm:$0xff] }
 0x5c8   :  { %7114 = vmatpush1.bf16.msra.mxu0 %v11102_v60  ;;  %7146 = vmatpush1.bf16.msra.mxu1 %v11103_v27  ;;  %v11113_v60 = vld [vmem:[#allocation54_spill] sm:$0xff] }
 0x5c9   :  { %7116 = vmatprep.subr.bf16.mxu0 %v11104_v33  ;;  %7148 = vmatprep.subr.bf16.mxu1 %v11105_v54  ;;  %v11114_v27 = vld [vmem:[#allocation66_spill] sm:$0xff]  ;;  %v11115_v33 = vld [vmem:[#allocation57_spill] sm:$0xff] }
 0x5ca   :  { %v311_v1 = vadd.f32 %v11115_v33, %v11114_v27  ;;  %v11116_v54 = vld [vmem:[#allocation58_spill] sm:$0xff] }
 0x5cc   :  { %7118 = vmatpush1.bf16.msra.mxu0 %v11106_v43  ;;  %7150 = vmatpush1.bf16.msra.mxu1 %v11107_v35  ;;  %v313_v43 = vadd.f32 %v11116_v54, %v10990_v10 }
 0x5cd   :  { %7120 = vmatprep.subr.bf16.mxu0 %v11108_v38  ;;  %7152 = vmatprep.subr.bf16.mxu1 %v11109_v20 }
 0x5d0   :  { %7122 = vmatpush1.bf16.msra.mxu0 %v11110_v22  ;;  %7154 = vmatpush1.bf16.msra.mxu1 %v11111_v2 }
 0x5d1   :  { %7156 = vmatprep.subr.bf16.mxu0 %v11112_v37  ;;  %7188 = vmatprep.subr.bf16.mxu1 %v11113_v60 }
 0x63e   :  { %v2768_v31 = vpop.f32.mrb[46].mxu0  ;;  %v2843_v35 = vpop.f32.mrb[18].mxu1 }
 0x63f   :  { %v3006_v62 = vadd.f32 %v2768_v31, %v311_v1  ;;  %v2770_v38 = vpop.f32.mrb[47].mxu0  ;;  %v2845_v28 = vpop.f32.mrb[19].mxu1  ;;  %v8185_v37 = vadd.f32 %v2843_v35, %v11022_v29 }
 0x640   :  { %v3007_v20 = vadd.f32 %v2770_v38, %v313_v43  ;;  %v8186_v60 = vadd.f32 %v2845_v28, %v11053_v9 }
 0x641   :  { %v6199_v58 = vmul.f32 -1.442695, %v3006_v62  ;;  %v6201_v2 = vmul.f32 -1.442695, %v8185_v37 }
 0x642   :  { %v6200_v22 = vmul.f32 -1.442695, %v3007_v20 }
 0x643   :  { %8512 = vpow2.f32 %v6199_v58 }
 0x644   :  { %8514 = vpow2.f32 %v6200_v22 }
 0x645   :  { %8516 = vtanh.f32 %v8186_v60 }
 0x646   :  { %8518 = vpow2.f32 %v6201_v2 }
 0x64d   :  { %v8513_v30 = vpop.eup %8512 }
 0x64e   :  { %v3036_v33 = vadd.f32 1.0, %v8513_v30  ;;  %v8515_v27 = vpop.eup %8514 }
 0x64f   :  { %v3037_v54 = vadd.f32 1.0, %v8515_v27  ;;  %v8517_v31 = vpop.eup %8516 }
 0x650   :  { %8520 = vrcp.f32 %v3036_v33  ;;  %v8519_v1 = vpop.eup %8518 }
 0x651   :  { %8522 = vrcp.f32 %v3037_v54  ;;  %v3038_v58 = vadd.f32 1.0, %v8519_v1 }
 0x653   :  { %8524 = vrcp.f32 %v3038_v58 }
 0x65a   :  { %v8521_v43 = vpop.eup %8520 }
 0x65b   :  { %v3058_v62 = vmul.f32 %v8521_v43, %v8517_v31  ;;  %v8523_v38 = vpop.eup %8522 }
 0x65c   :  { %v3056_v20 = vmul.f32 %v8523_v38, %v9925_v53 }
 0x65d   :  { %v8525_v30 = vpop.eup %8524 }
 0x65e   :  { %v10027_v35 = vadd.f32 %v3058_v62, %v3056_v20 }
 0x660   :  { %8526 = vtanh.f32 %v10027_v35 }
 0x66a   :  { %v8527_v60 = vpop.eup %8526 }
 0x66b   :  { %v10030_v28 = vmul.f32 %v8527_v60, %v8525_v30 }
 0x66d   :  { %3133 = vmatmul.mubr.f32.vlgmr.msra.gmra.mrb[52].mxu0 %v10030_v28  ;;  %3208 = vmatmul.mubr.f32.vlgmr.msra.gmra.mrb[20].mxu1 %v10030_v28 }
 0x66e   :  { %7158 = vmatpush1.bf16.msra.mxu0 %v9241_v6  ;;  %7190 = vmatpush1.bf16.msra.mxu1 %v9360_v47 }
 0x66f   :  { %7160 = vmatprep.subr.bf16.mxu0 %v9247_v15  ;;  %7192 = vmatprep.subr.bf16.mxu1 %v9364_v16 }
 0x670   :  { %3138 = vmatprep.mubr.f32.mxu0 %v10948_v18  ;;  %3213 = vmatprep.mubr.f32.mxu1 %v10948_v18 }
 0x672   :  { %7162 = vmatpush1.bf16.msra.mxu0 %v9256_v25  ;;  %7194 = vmatpush1.bf16.msra.mxu1 %v9371_v51 }
 0x673   :  { %7164 = vmatprep.subr.bf16.mxu0 %v9263_v34  ;;  %7196 = vmatprep.subr.bf16.mxu1 %v9374_v40 }
 0x676   :  { %7166 = vmatpush1.bf16.msra.mxu0 %v9273_v44  ;;  %7198 = vmatpush1.bf16.msra.mxu1 %v9381_v13 }
 0x677   :  { %7168 = vmatprep.subr.bf16.mxu0 %v9280_v57  ;;  %7200 = vmatprep.subr.bf16.mxu1 %v9385_v48 }
 0x67a   :  { %7170 = vmatpush1.bf16.msra.mxu0 %v9289_v3  ;;  %7202 = vmatpush1.bf16.msra.mxu1 %v9392_v52 }
 0x67b   :  { %7172 = vmatprep.subr.bf16.mxu0 %v9296_v14  ;;  %7204 = vmatprep.subr.bf16.mxu1 %v9395_v39 }
 0x67e   :  { %7174 = vmatpush1.bf16.msra.mxu0 %v9304_v26  ;;  %7206 = vmatpush1.bf16.msra.mxu1 %v9400_v0 }
 0x67f   :  { %7176 = vmatprep.subr.bf16.mxu0 %v9311_v41  ;;  %7208 = vmatprep.subr.bf16.mxu1 %v9403_v19 }
 0x681   :  { %v2774_v53 = vpop.f32.mrb[48].mxu0  ;;  %v2849_v27 = vpop.f32.mrb[60].mxu1 }
 0x682   :  { %v2775_v22 = vpop.f32.mrb[49].mxu0  ;;  %v2850_v2 = vpop.f32.mrb[61].mxu1  ;;  %7178 = vmatpush1.bf16.msra.mxu0 %v9319_v59  ;;  %7210 = vmatpush1.bf16.msra.mxu1 %v9408_v17 }
 0x683   :  { %7180 = vmatprep.subr.bf16.mxu0 %v9326_v12  ;;  %7212 = vmatprep.subr.bf16.mxu1 %v9411_v4 }
 0x685   :  { %v2918_v37 = vpop.f32.mrb[50].mxu0  ;;  %v2993_v33 = vpop.f32.mrb[62].mxu1 }
 0x686   :  { %v2919_v54 = vpop.f32.mrb[51].mxu0  ;;  %v2994_v31 = vpop.f32.mrb[63].mxu1  ;;  %7182 = vmatpush1.bf16.msra.mxu0 %v9334_v21  ;;  %7214 = vmatpush1.bf16.msra.mxu1 %v9416_v24 }
 0x687   :  { %7184 = vmatprep.subr.bf16.mxu0 %v9341_v42  ;;  %7216 = vmatprep.subr.bf16.mxu1 %v9419_v8 }
 0x689   :  { %v2922_v1 = vpop.f32.mrb[12].mxu0  ;;  %v2997_v43 = vpop.f32.mrb[28].mxu1 }
 0x68a   :  { %v8195_v62 = vadd.f32 %v2922_v1, %v9514_v56  ;;  %v2924_v38 = vpop.f32.mrb[13].mxu0  ;;  %v2999_v58 = vpop.f32.mrb[29].mxu1  ;;  %7186 = vmatpush1.bf16.msra.mxu0 %v9349_v61  ;;  %7218 = vmatpush1.bf16.msra.mxu1 %v9424_v36  ;;  %v8211_v53 = vadd.f32 %v2997_v43, %v9528_v63 }
 0x68b   :  { %v8196_v20 = vadd.f32 %v2924_v38, %v10993_v45  ;;  %7220 = vmatprep.subr.bf16.mxu0 %v9093_v49  ;;  %7252 = vmatprep.subr.bf16.mxu1 %v9170_v23  ;;  %v8212_v27 = vadd.f32 %v2999_v58, %v9533_v32 }
 0x68c   :  { %v6202_v30 = vmul.f32 -1.442695, %v8195_v62  ;;  %v6204_v22 = vmul.f32 -1.442695, %v8211_v53  ;;  %v11118_v53 = vld [vmem:[#allocation28_spill] sm:$0xff] }
 0x68d   :  { %v6203_v60 = vmul.f32 -1.442695, %v8196_v20 }
 0x68e   :  { %8528 = vpow2.f32 %v6202_v30 }
 0x68f   :  { %8530 = vpow2.f32 %v6203_v60 }
 0x690   :  { %8532 = vtanh.f32 %v8212_v27  ;;  %v11123_v27 = vld [vmem:[#allocation44_spill] sm:$0xff] }
 0x691   :  { %8534 = vpow2.f32 %v6204_v22  ;;  %v11124_v22 = vld [vmem:[#allocation31_spill] sm:$0xff] }
 0x698   :  { %v8529_v2 = vpop.eup %8528 }
 0x699   :  { %v3039_v37 = vadd.f32 1.0, %v8529_v2  ;;  %v8531_v33 = vpop.eup %8530  ;;  %v11125_v2 = vld [vmem:[#allocation45_spill] sm:$0xff] }
 0x69a   :  { %v3040_v54 = vadd.f32 1.0, %v8531_v33  ;;  %v8533_v49 = vpop.eup %8532  ;;  %v11128_v33 = vld [vmem:[#allocation33_spill] sm:$0xff] }
 0x69b   :  { %8536 = vrcp.f32 %v3039_v37  ;;  %v8535_v31 = vpop.eup %8534  ;;  %v11126_v37 = vld [vmem:[#allocation32_spill] sm:$0xff] }
 0x69c   :  { %8538 = vrcp.f32 %v3040_v54  ;;  %v3041_v38 = vadd.f32 1.0, %v8535_v31  ;;  %v11129_v54 = vld [vmem:[#allocation47_spill] sm:$0xff]  ;;  %v11131_v31 = vld [vmem:[#allocation48_spill] sm:$0xff] }
 0x69e   :  { %8540 = vrcp.f32 %v3041_v38  ;;  %v11135_v38 = vld [vmem:[#allocation50_spill] sm:$0xff] }
 0x6a5   :  { %v8537_v23 = vpop.eup %8536 }
 0x6a6   :  { %v3059_v1 = vmul.f32 %v8537_v23, %v8533_v49  ;;  %v8539_v62 = vpop.eup %8538  ;;  %v11130_v49 = vld [vmem:[#allocation34_spill] sm:$0xff]  ;;  %v11132_v23 = vld [vmem:[#allocation35_spill] sm:$0xff] }
 0x6a7   :  { %v3057_v20 = vmul.f32 %v8539_v62, %v9971_v46  ;;  %v11117_v46 = vld [vmem:[#allocation41_spill] sm:$0xff]  ;;  %v11134_v62 = vld [vmem:[#allocation36_spill] sm:$0xff] }
 0x6a8   :  { %v8541_v58 = vpop.eup %8540 }
 0x6a9   :  { %v10073_v43 = vadd.f32 %v3059_v1, %v3057_v20  ;;  %v11133_v1 = vld [vmem:[#allocation49_spill] sm:$0xff] }
 0x6aa   :  { %v11136_v20 = vld [vmem:[#allocation37_spill] sm:$0xff] }
 0x6ab   :  { %8542 = vtanh.f32 %v10073_v43 }
 0x6b5   :  { %v8543_v30 = vpop.eup %8542 }
 0x6b6   :  { %v10076_v60 = vmul.f32 %v8543_v30, %v8541_v58  ;;  %v11137_v58 = vld [vmem:[#allocation51_spill] sm:$0xff]  ;;  %v11138_v30 = vld [vmem:[#allocation38_spill] sm:$0xff] }
 0x6b8   :  { %3139 = vmatmul.mubr.f32.gmra.mrb[54].mxu0 %v10076_v60  ;;  %3214 = vmatmul.mubr.f32.gmra.mrb[64].mxu1 %v10076_v60 }
 0x6b9   :  { %3282 = vmatprep.mubr.f32.mxu0 %v10948_v18  ;;  %3357 = vmatprep.mubr.f32.mxu1 %v10948_v18 }
 0x6bc   :  { %3283 = vmatmul.mubr.f32.vlgmr.msra.gmra.mrb[56].mxu0 %v10030_v28  ;;  %3358 = vmatmul.mubr.f32.vlgmr.msra.gmra.mrb[66].mxu1 %v10030_v28 }
 0x6bd   :  { %3286 = vmatprep.mubr.f32.mxu0 %v10948_v18  ;;  %3361 = vmatprep.mubr.f32.mxu1 %v10948_v18 }
 0x6be   :  { %7222 = vmatpush1.bf16.msra.mxu0 %v10968_v55  ;;  %7254 = vmatpush1.bf16.msra.mxu1 %v9239_v5  ;;  %v11119_v55 = vld [vmem:[#allocation42_spill] sm:$0xff]  ;;  %v11120_v5 = vld [vmem:[#allocation29_spill] sm:$0xff] }
 0x6bf   :  { %7224 = vmatprep.subr.bf16.mxu0 %v10969_v50  ;;  %7256 = vmatprep.subr.bf16.mxu1 %v9245_v11  ;;  %v11121_v50 = vld [vmem:[#allocation43_spill] sm:$0xff]  ;;  %v11122_v11 = vld [vmem:[#allocation30_spill] sm:$0xff] }
 0x6c0   :  { %3287 = vmatmul.mubr.f32.gmra.mrb[10].mxu0 %v10076_v60  ;;  %3362 = vmatmul.mubr.f32.gmra.mrb[26].mxu1 %v10076_v60 }
 0x6c1   :  { %3498 = vmatprep.mubr.f32.mxu0 %v10948_v18  ;;  %3573 = vmatprep.mubr.f32.mxu1 %v10948_v18 }
 0x6c2   :  { %7226 = vmatpush1.bf16.msra.mxu0 %v9147_v7  ;;  %7258 = vmatpush1.bf16.msra.mxu1 %v11117_v46  ;;  %v11127_v7 = vld [vmem:[#allocation46_spill] sm:$0xff]  ;;  %v11139_v46 = vld [vmem:[#allocation52_spill] sm:$0xff] }
 0x6c3   :  { %7228 = vmatprep.subr.bf16.mxu0 %v11118_v53  ;;  %7260 = vmatprep.subr.bf16.mxu1 %v11119_v55  ;;  %v11140_v53 = vld [vmem:[#allocation39_spill] sm:$0xff]  ;;  %v11141_v55 = vld [vmem:[#allocation53_spill] sm:$0xff] }
 0x6c6   :  { %7230 = vmatpush1.bf16.msra.mxu0 %v11120_v5  ;;  %7262 = vmatpush1.bf16.msra.mxu1 %v11121_v50  ;;  %v11142_v5 = vld [vmem:[#allocation40_spill] sm:$0xff]  ;;  %v11143_v50 = vld [vmem:[#allocation54_spill] sm:$0xff] }
 0x6c7   :  { %7232 = vmatprep.subr.bf16.mxu0 %v11122_v11  ;;  %7264 = vmatprep.subr.bf16.mxu1 %v11123_v27  ;;  %v11144_v11 = vld [vmem:[#allocation66_spill] sm:$0xff]  ;;  %v11145_v27 = vld [vmem:[#allocation59_spill] sm:$0xff] }
 0x6ca   :  { %7234 = vmatpush1.bf16.msra.mxu0 %v11124_v22  ;;  %7266 = vmatpush1.bf16.msra.mxu1 %v11125_v2  ;;  %v317_v22 = vadd.f32 %v11145_v27, %v11144_v11  ;;  %v11146_v2 = vld [vmem:[#allocation60_spill] sm:$0xff] }
 0x6cb   :  { %7236 = vmatprep.subr.bf16.mxu0 %v11126_v37  ;;  %7268 = vmatprep.subr.bf16.mxu1 %v11127_v7  ;;  %v319_v37 = vadd.f32 %v11146_v2, %v10990_v10 }
 0x6ce   :  { %7238 = vmatpush1.bf16.msra.mxu0 %v11128_v33  ;;  %7270 = vmatpush1.bf16.msra.mxu1 %v11129_v54 }
 0x6cf   :  { %7240 = vmatprep.subr.bf16.mxu0 %v11130_v49  ;;  %7272 = vmatprep.subr.bf16.mxu1 %v11131_v31 }
 0x6d2   :  { %7242 = vmatpush1.bf16.msra.mxu0 %v11132_v23  ;;  %7274 = vmatpush1.bf16.msra.mxu1 %v11133_v1 }
 0x6d3   :  { %7244 = vmatprep.subr.bf16.mxu0 %v11134_v62  ;;  %7276 = vmatprep.subr.bf16.mxu1 %v11135_v38 }
 0x6d6   :  { %7246 = vmatpush1.bf16.msra.mxu0 %v11136_v20  ;;  %7278 = vmatpush1.bf16.msra.mxu1 %v11137_v58 }
 0x6d7   :  { %7248 = vmatprep.subr.bf16.mxu0 %v11138_v30  ;;  %7280 = vmatprep.subr.bf16.mxu1 %v11139_v46 }
 0x6da   :  { %7250 = vmatpush1.bf16.msra.mxu0 %v11140_v53  ;;  %7282 = vmatpush1.bf16.msra.mxu1 %v11141_v55 }
 0x6db   :  { %7284 = vmatprep.subr.bf16.mxu0 %v11142_v5  ;;  %7316 = vmatprep.subr.bf16.mxu1 %v11143_v50 }
 0x740   :  { %v3134_v7 = vpop.f32.mrb[52].mxu0  ;;  %v3209_v33 = vpop.f32.mrb[20].mxu1 }
 0x741   :  { %v3372_v54 = vadd.f32 %v3134_v7, %v317_v22  ;;  %v3136_v49 = vpop.f32.mrb[53].mxu0  ;;  %v3211_v31 = vpop.f32.mrb[21].mxu1  ;;  %v8187_v38 = vadd.f32 %v3209_v33, %v11022_v29 }
 0x742   :  { %v3373_v23 = vadd.f32 %v3136_v49, %v319_v37  ;;  %v8188_v20 = vadd.f32 %v3211_v31, %v11053_v9 }
 0x743   :  { %v6205_v1 = vmul.f32 -1.442695, %v3372_v54  ;;  %v6207_v58 = vmul.f32 -1.442695, %v8187_v38 }
 0x744   :  { %v6206_v62 = vmul.f32 -1.442695, %v3373_v23 }
 0x745   :  { %8544 = vpow2.f32 %v6205_v1 }
 0x746   :  { %8546 = vpow2.f32 %v6206_v62 }
 0x747   :  { %8548 = vtanh.f32 %v8188_v20  ;;  %v11148_v20 = vld [vmem:[#allocation62_spill] sm:$0xff] }
 0x748   :  { %8550 = vpow2.f32 %v6207_v58  ;;  %v325_v58 = vadd.f32 %v11148_v20, %v10990_v10 }
 0x74f   :  { %v8545_v30 = vpop.eup %8544 }
 0x750   :  { %v3402_v46 = vadd.f32 1.0, %v8545_v30  ;;  %v8547_v53 = vpop.eup %8546 }
 0x751   :  { %v3403_v55 = vadd.f32 1.0, %v8547_v53  ;;  %v8549_v5 = vpop.eup %8548 }
 0x752   :  { %8552 = vrcp.f32 %v3402_v46  ;;  %v8551_v50 = vpop.eup %8550 }
 0x753   :  { %8554 = vrcp.f32 %v3403_v55  ;;  %v3404_v37 = vadd.f32 1.0, %v8551_v50 }
 0x755   :  { %8556 = vrcp.f32 %v3404_v37 }
 0x75c   :  { %v8553_v27 = vpop.eup %8552 }
 0x75d   :  { %v3424_v22 = vmul.f32 %v8553_v27, %v8549_v5  ;;  %v8555_v2 = vpop.eup %8554 }
 0x75e   :  { %v3422_v7 = vmul.f32 %v8555_v2, %v10027_v35 }
 0x75f   :  { %v8557_v54 = vpop.eup %8556 }
 0x760   :  { %v10129_v33 = vadd.f32 %v3424_v22, %v3422_v7 }
 0x762   :  { %8558 = vtanh.f32 %v10129_v33 }
 0x76c   :  { %v8559_v49 = vpop.eup %8558 }
 0x76d   :  { %v10132_v31 = vmul.f32 %v8559_v49, %v8557_v54 }
 0x76f   :  { %3499 = vmatmul.mubr.f32.vlgmr.msra.gmra.mrb[58].mxu0 %v10132_v31  ;;  %3574 = vmatmul.mubr.f32.vlgmr.msra.gmra.mrb[22].mxu1 %v10132_v31 }
 0x770   :  { %7286 = vmatpush1.bf16.msra.mxu0 %v9241_v6  ;;  %7318 = vmatpush1.bf16.msra.mxu1 %v9360_v47 }
 0x771   :  { %7288 = vmatprep.subr.bf16.mxu0 %v9247_v15  ;;  %7320 = vmatprep.subr.bf16.mxu1 %v9364_v16 }
 0x772   :  { %3504 = vmatprep.mubr.f32.mxu0 %v10948_v18  ;;  %3579 = vmatprep.mubr.f32.mxu1 %v10948_v18 }
 0x774   :  { %7290 = vmatpush1.bf16.msra.mxu0 %v9256_v25  ;;  %7322 = vmatpush1.bf16.msra.mxu1 %v9371_v51 }
 0x775   :  { %7292 = vmatprep.subr.bf16.mxu0 %v9263_v34  ;;  %7324 = vmatprep.subr.bf16.mxu1 %v9374_v40 }
 0x778   :  { %7294 = vmatpush1.bf16.msra.mxu0 %v9273_v44  ;;  %7326 = vmatpush1.bf16.msra.mxu1 %v9381_v13 }
 0x779   :  { %7296 = vmatprep.subr.bf16.mxu0 %v9280_v57  ;;  %7328 = vmatprep.subr.bf16.mxu1 %v9385_v48 }
 0x77c   :  { %7298 = vmatpush1.bf16.msra.mxu0 %v9289_v3  ;;  %7330 = vmatpush1.bf16.msra.mxu1 %v9392_v52 }
 0x77d   :  { %7300 = vmatprep.subr.bf16.mxu0 %v9296_v14  ;;  %7332 = vmatprep.subr.bf16.mxu1 %v9395_v39 }
 0x780   :  { %7302 = vmatpush1.bf16.msra.mxu0 %v9304_v26  ;;  %7334 = vmatpush1.bf16.msra.mxu1 %v9400_v0 }
 0x781   :  { %7304 = vmatprep.subr.bf16.mxu0 %v9311_v41  ;;  %7336 = vmatprep.subr.bf16.mxu1 %v9403_v19 }
 0x784   :  { %7306 = vmatpush1.bf16.msra.mxu0 %v9319_v59  ;;  %7338 = vmatpush1.bf16.msra.mxu1 %v9408_v17 }
 0x785   :  { %7308 = vmatprep.subr.bf16.mxu0 %v9326_v12  ;;  %7340 = vmatprep.subr.bf16.mxu1 %v9411_v4 }
 0x788   :  { %7310 = vmatpush1.bf16.msra.mxu0 %v9334_v21  ;;  %7342 = vmatpush1.bf16.msra.mxu1 %v9416_v24 }
 0x789   :  { %7312 = vmatprep.subr.bf16.mxu0 %v9341_v42  ;;  %7344 = vmatprep.subr.bf16.mxu1 %v9419_v8 }
 0x78b   :  { %v3140_v0 = vpop.f32.mrb[54].mxu0  ;;  %v3215_v6 = vpop.f32.mrb[64].mxu1 }
 0x78c   :  { %v3141_v15 = vpop.f32.mrb[55].mxu0  ;;  %v3216_v25 = vpop.f32.mrb[65].mxu1  ;;  %7314 = vmatpush1.bf16.msra.mxu0 %v9349_v61  ;;  %7346 = vmatpush1.bf16.msra.mxu1 %v9424_v36 }
 0x78f   :  { %v3284_v17 = vpop.f32.mrb[56].mxu0  ;;  %v3359_v34 = vpop.f32.mrb[66].mxu1 }
 0x790   :  { %v3285_v44 = vpop.f32.mrb[57].mxu0  ;;  %v3360_v57 = vpop.f32.mrb[67].mxu1 }
 0x793   :  { %v3288_v3 = vpop.f32.mrb[10].mxu0  ;;  %v3363_v14 = vpop.f32.mrb[26].mxu1 }
 0x794   :  { %v8193_v24 = vadd.f32 %v3288_v3, %v9514_v56  ;;  %v3290_v26 = vpop.f32.mrb[11].mxu0  ;;  %v3365_v41 = vpop.f32.mrb[27].mxu1  ;;  %v8209_v42 = vadd.f32 %v3363_v14, %v9528_v63 }
 0x795   :  { %v8194_v59 = vadd.f32 %v3290_v26, %v10993_v45  ;;  %v8210_v61 = vadd.f32 %v3365_v41, %v9533_v32 }
 0x796   :  { %v6208_v12 = vmul.f32 -1.442695, %v8193_v24  ;;  %v6210_v47 = vmul.f32 -1.442695, %v8209_v42 }
 0x797   :  { %v6209_v21 = vmul.f32 -1.442695, %v8194_v59 }
 0x798   :  { %8560 = vpow2.f32 %v6208_v12 }
 0x799   :  { %8562 = vpow2.f32 %v6209_v21 }
 0x79a   :  { %8564 = vtanh.f32 %v8210_v61 }
 0x79b   :  { %8566 = vpow2.f32 %v6210_v47 }
 0x7a2   :  { %v8561_v16 = vpop.eup %8560 }
 0x7a3   :  { %v3405_v51 = vadd.f32 1.0, %v8561_v16  ;;  %v8563_v40 = vpop.eup %8562 }
 0x7a4   :  { %v3406_v13 = vadd.f32 1.0, %v8563_v40  ;;  %v8565_v48 = vpop.eup %8564 }
 0x7a5   :  { %8568 = vrcp.f32 %v3405_v51  ;;  %v8567_v52 = vpop.eup %8566 }
 0x7a6   :  { %8570 = vrcp.f32 %v3406_v13  ;;  %v3407_v8 = vadd.f32 1.0, %v8567_v52 }
 0x7a8   :  { %8572 = vrcp.f32 %v3407_v8 }
 0x7af   :  { %v8569_v39 = vpop.eup %8568 }
 0x7b0   :  { %v3425_v19 = vmul.f32 %v8569_v39, %v8565_v48  ;;  %v8571_v4 = vpop.eup %8570 }
 0x7b1   :  { %v3423_v36 = vmul.f32 %v8571_v4, %v10073_v43  ;;  %v11147_v43 = vld [vmem:[#allocation61_spill] sm:$0xff] }
 0x7b2   :  { %v8573_v23 = vpop.eup %8572  ;;  %v323_v38 = vadd.f32 %v11147_v43, %v11144_v11 }
 0x7b3   :  { %v10173_v35 = vadd.f32 %v3425_v19, %v3423_v36 }
 0x7b5   :  { %8574 = vtanh.f32 %v10173_v35 }
 0x7bf   :  { %v8575_v1 = vpop.eup %8574 }
 0x7c0   :  { %v10176_v62 = vmul.f32 %v8575_v1, %v8573_v23 }
 0x7c2   :  { %3505 = vmatmul.mubr.f32.gmra.mrb[60].mxu0 %v10176_v62  ;;  %3580 = vmatmul.mubr.f32.gmra.mrb[68].mxu1 %v10176_v62 }
 0x7c3   :  { %3648 = vmatprep.mubr.f32.mxu0 %v10948_v18  ;;  %3723 = vmatprep.mubr.f32.mxu1 %v10948_v18 }
 0x7c6   :  { %3649 = vmatmul.mubr.f32.vlgmr.msra.gmra.mrb[62].mxu0 %v10132_v31  ;;  %3724 = vmatmul.mubr.f32.vlgmr.msra.gmra.mrb[70].mxu1 %v10132_v31 }
 0x7c7   :  { %3652 = vmatprep.mubr.f32.mxu0 %v10948_v18  ;;  %3727 = vmatprep.mubr.f32.mxu1 %v10948_v18 }
 0x7ca   :  { %3653 = vmatmul.mubr.f32.gmra.mrb[8].mxu0 %v10176_v62  ;;  %3728 = vmatmul.mubr.f32.gmra.mrb[24].mxu1 %v10176_v62 }
 0x842   :  { %v3500_v30 = vpop.f32.mrb[58].mxu0  ;;  %v3575_v46 = vpop.f32.mrb[22].mxu1 }
 0x843   :  { %v3738_v53 = vadd.f32 %v3500_v30, %v323_v38  ;;  %v3502_v55 = vpop.f32.mrb[59].mxu0  ;;  %v3577_v5 = vpop.f32.mrb[23].mxu1 }
 0x844   :  { %v3739_v50 = vadd.f32 %v3502_v55, %v325_v58 }
 0x845   :  { %v6211_v27 = vmul.f32 -1.442695, %v3738_v53 }
 0x846   :  { %v6212_v22 = vmul.f32 -1.442695, %v3739_v50 }
 0x847   :  { %8576 = vpow2.f32 %v6211_v27 }
 0x848   :  { %8578 = vpow2.f32 %v6212_v22 }
 0x849   :  { %8783 = shalt.err (!%p8780_p10)  }
 0x84a   :  { %s8784_s21 = scalar_lea.vmem %s55_s12, 16384  ;;  %p8789_p12 = scmp.lt.s32.totalorder %s55_s12, %s55_s12 }
 0x84b   :  { %p8785_p11 = scmp.ne.s32.totalorder %s55_s12, %s8784_s21  ;;  %p8790_p13 = scmp.lt.s32.totalorder %s8784_s21, %s8784_s21 }
 0x84d   :  { %p8791_p0 = por %p8790_p13, %p8789_p12 }
 0x84f   :  { %p8792_p1 = pnand %p8791_p0, %p8785_p11 }
 0x851   :  { %8795 = shalt.err (!%p8792_p1)  }
 0x852   :  { %57 = dma.hbm_to_vmem [thread:$0]  %s10810_s4, 16384, %s55_s12, [#allocation8]  ;;  %v8189_v10 = vadd.f32 %v3575_v46, %v11022_v29 }
 0x853   :  { %s8796_s25 = scalar_lea.hbm %s10811_s5, 16384 }
 0x854   :  { %p8797_p2 = scmp.ne.s32.totalorder %s10811_s5, %s8796_s25  ;;  %p8800_p3 = scmp.lt.u32.totalorder %s8796_s25, %s10811_s5 }
 0x856   :  { %p8802_p4 = pnand %p8800_p3, %p8797_p2 }
 0x858   :  { %8805 = shalt.err (!%p8802_p4)  }
 0x859   :  { %s8806_s1 = scalar_lea.vmem %s67_s14, 16384  ;;  %p8811_p6 = scmp.lt.s32.totalorder %s67_s14, %s67_s14 }
 0x85a   :  { %p8807_p5 = scmp.ne.s32.totalorder %s67_s14, %s8806_s1  ;;  %p8812_p7 = scmp.lt.s32.totalorder %s8806_s1, %s8806_s1 }
 0x85c   :  { %p8813_p8 = por %p8812_p7, %p8811_p6 }
 0x85e   :  { %p8814_p9 = pnand %p8813_p8, %p8807_p5 }
 0x860   :  { %8817 = shalt.err (!%p8814_p9)  }
 0x861   :  { %69 = dma.hbm_to_vmem [thread:$0]  %s10811_s5, 16384, %s67_s14, [#allocation8 + $0x1]  ;;  %v8190_v29 = vadd.f32 %v3577_v5, %v11053_v9  ;;  %v6213_v11 = vmul.f32 -1.442695, %v8189_v10 }
 0x862   :  { %s8879_s3 = smov [#allocation7]   ;;  %s8818_s16 = scalar_lea.hbm %s10812_s6, 8192 }
 0x863   :  { %s78_s12 = sshll.u32 %s8879_s3, 4  ;;  %p8819_p10 = scmp.ne.s32.totalorder %s10812_s6, %s8818_s16  ;;  %s79_s12 = int_to_ptr.vmem [resolvable:$true] %s78_s12 }
 0x864   :  { %p8822_p11 = scmp.lt.u32.totalorder %s8818_s16, %s10812_s6 }
 0x866   :  { %p8824_p12 = pnand %p8822_p11, %p8819_p10 }
 0x868   :  { %8827 = shalt.err (!%p8824_p12)  }
 0x869   :  { %s8828_s5 = scalar_lea.vmem %s79_s12, 8192  ;;  %p8833_p0 = scmp.lt.s32.totalorder %s79_s12, %s79_s12 }
 0x86a   :  { %p8829_p13 = scmp.ne.s32.totalorder %s79_s12, %s8828_s5  ;;  %p8834_p1 = scmp.lt.s32.totalorder %s8828_s5, %s8828_s5 }
 0x86c   :  { %p8835_p2 = por %p8834_p1, %p8833_p0 }
 0x86e   :  { %p8836_p3 = pnand %p8835_p2, %p8829_p13 }
 0x870   :  { %8839 = shalt.err (!%p8836_p3)  }
 0x871   :  { %81 = dma.hbm_to_vmem [thread:$0]  %s10812_s6, 8192, %s79_s12, [#allocation8 + $0x2]  ;;  %v8577_v9 = vpop.eup %8576  ;;  %8580 = vtanh.f32 %v8190_v29 }
 0x872   :  { %v3768_v2 = vadd.f32 1.0, %v8577_v9  ;;  %v8579_v37 = vpop.eup %8578  ;;  %8582 = vpow2.f32 %v6213_v11 }
 0x873   :  { %v3769_v7 = vadd.f32 1.0, %v8579_v37 }
 0x874   :  { %8584 = vrcp.f32 %v3768_v2 }
 0x875   :  { %8586 = vrcp.f32 %v3769_v7 }
 0x87b   :  { %v8581_v54 = vpop.eup %8580 }
 0x87c   :  { %v8583_v49 = vpop.eup %8582 }
 0x87d   :  { %v3770_v25 = vadd.f32 1.0, %v8583_v49 }
 0x87e   :  { %v8585_v0 = vpop.eup %8584 }
 0x87f   :  { %v3790_v6 = vmul.f32 %v8585_v0, %v8581_v54  ;;  %v8587_v15 = vpop.eup %8586  ;;  %8588 = vrcp.f32 %v3770_v25 }
 0x880   :  { %v3788_v17 = vmul.f32 %v8587_v15, %v10129_v33 }
 0x882   :  { %v3792_v34 = vadd.f32 %v3790_v6, %v3788_v17 }
 0x884   :  { %8590 = vtanh.f32 %v3792_v34 }
 0x889   :  { %v8589_v44 = vpop.eup %8588 }
 0x88e   :  { %v8591_v57 = vpop.eup %8590 }
 0x88f   :  { %v10231_v3 = vmul.f32 %v8591_v57, %v8589_v44 }
 0x895   :  { %v3506_v14 = vpop.f32.mrb[60].mxu0  ;;  %v3581_v24 = vpop.f32.mrb[68].mxu1 }
 0x896   :  { %v3507_v26 = vpop.f32.mrb[61].mxu0  ;;  %v3582_v41 = vpop.f32.mrb[69].mxu1 }
 0x899   :  { %v3650_v59 = vpop.f32.mrb[62].mxu0  ;;  %v3725_v12 = vpop.f32.mrb[70].mxu1 }
 0x89a   :  { %v3651_v21 = vpop.f32.mrb[63].mxu0  ;;  %v3726_v42 = vpop.f32.mrb[71].mxu1 }
 0x89d   :  { %v3654_v61 = vpop.f32.mrb[8].mxu0  ;;  %v3729_v47 = vpop.f32.mrb[24].mxu1 }
 0x89e   :  { %v8191_v16 = vadd.f32 %v3654_v61, %v9514_v56  ;;  %v3656_v33 = vpop.f32.mrb[9].mxu0  ;;  %v3731_v51 = vpop.f32.mrb[25].mxu1  ;;  %v8207_v52 = vadd.f32 %v3729_v47, %v9528_v63 }
 0x89f   :  { %v8192_v40 = vadd.f32 %v3656_v33, %v10993_v45  ;;  %v8208_v39 = vadd.f32 %v3731_v51, %v9533_v32 }
 0x8a0   :  { %v6214_v13 = vmul.f32 -1.442695, %v8191_v16  ;;  %v6216_v19 = vmul.f32 -1.442695, %v8207_v52 }
 0x8a1   :  { %v6215_v48 = vmul.f32 -1.442695, %v8192_v40 }
 0x8a2   :  { %8592 = vpow2.f32 %v6214_v13 }
 0x8a3   :  { %8594 = vpow2.f32 %v6215_v48 }
 0x8a4   :  { %8596 = vtanh.f32 %v8208_v39 }
 0x8a5   :  { %8598 = vpow2.f32 %v6216_v19 }
 0x8ac   :  { %v8593_v4 = vpop.eup %8592 }
 0x8ad   :  { %v3771_v8 = vadd.f32 1.0, %v8593_v4  ;;  %v8595_v36 = vpop.eup %8594 }
 0x8ae   :  { %v3772_v56 = vadd.f32 1.0, %v8595_v36  ;;  %v8597_v23 = vpop.eup %8596 }
 0x8af   :  { %8600 = vrcp.f32 %v3771_v8  ;;  %v8599_v1 = vpop.eup %8598 }
 0x8b0   :  { %8602 = vrcp.f32 %v3772_v56  ;;  %v3773_v20 = vadd.f32 1.0, %v8599_v1 }
 0x8b2   :  { %8604 = vrcp.f32 %v3773_v20 }
 0x8b9   :  { %v8601_v45 = vpop.eup %8600 }
 0x8ba   :  { %v3791_v43 = vmul.f32 %v8601_v45, %v8597_v23  ;;  %v8603_v38 = vpop.eup %8602 }
 0x8bb   :  { %v3789_v58 = vmul.f32 %v8603_v38, %v10173_v35 }
 0x8bc   :  { %v8605_v32 = vpop.eup %8604 }
 0x8bd   :  { %v3793_v63 = vadd.f32 %v3791_v43, %v3789_v58 }
 0x8bf   :  { %8606 = vtanh.f32 %v3793_v63 }
 0x8c9   :  { %v8607_v30 = vpop.eup %8606 }
 0x8ca   :  { %v3797_v46 = vmul.f32 %v8607_v30, %v8605_v32 }
 0x8cb   :  { %8864 = dma.done.wait [#allocation8], 16384 }
 0x8cc   :  { %8865 = vsyncadd [#allocation8], 4294950912 }
 0x8cd   :  { %8866 = dma.done.wait [#allocation8 + $0x1], 16384 }
 0x8ce   :  { %8867 = vsyncadd [#allocation8 + $0x1], 4294950912 }
 0x8cf   :  { %8868 = dma.done.wait [#allocation8 + $0x2], 8192 }
 0x8d0   :  { %8869 = vsyncadd [#allocation8 + $0x2], 4294959104  ;;  %4040 = vmatprep.mubr.f32.mxu0 %v3797_v46  ;;  %4153 = vmatprep.mubr.f32.mxu1 %v3797_v46  ;;  %v3827_v53 = vld [vmem:[#allocation5 + $0x8] sm:$0xff]  ;;  %v3829_v5 = vld [vmem:[#allocation5 + $0x18] sm:$0xff]  ;;  %s8880_s1 = smov [#allocation12]   ;;  %vm6092_vm4 = vcmask 80896  }
 0x8d1   :  { %v3831_v55 = vld [vmem:[#allocation5 + $0x28] sm:$0xff]  ;;  %v3833_v27 = vld [vmem:[#allocation5 + $0x38] sm:$0xff]  ;;  %v3826_v35 = vld [vmem:[#allocation5] sm:$0xff]  ;;  %s6100_s4 = sshll.u32 %s8880_s1, 4  ;;  %s6101_s4 = int_to_ptr.vmem [resolvable:$true] %s6100_s4 }
 0x8d2   :  { %v7347_v50 = vpack.c.bf16 %v3831_v55, %v3827_v53  ;;  %v3830_v22 = vld [vmem:[#allocation5 + $0x20] sm:$0xff]  ;;  %v7411_v10 = vpack.c.bf16 %v3833_v27, %v3829_v5  ;;  %v3828_v11 = vld [vmem:[#allocation5 + $0x10] sm:$0xff]  ;;  %v3835_v2 = vld [vmem:[#allocation5 + $0x48] sm:$0xff]  ;;  %s8840_s30 = scalar_lea.vmem %s6101_s4, 128  ;;  %p8845_p5 = scmp.lt.s32.totalorder %s6101_s4, %s6101_s4 }
 0x8d3   :  { %v7349_v29 = vpack.c.bf16 %v3830_v22, %v3826_v35  ;;  %v3832_v9 = vld [vmem:[#allocation5 + $0x30] sm:$0xff]  ;;  %v3839_v7 = vld [vmem:[#allocation5 + $0x68] sm:$0xff]  ;;  %v3837_v54 = vld [vmem:[#allocation5 + $0x58] sm:$0xff]  ;;  %p8841_p4 = scmp.ne.s32.totalorder %s6101_s4, %s8840_s30  ;;  %p8846_p6 = scmp.lt.s32.totalorder %s8840_s30, %s8840_s30 }
 0x8d4   :  { %7348 = vmatprep.subr.bf16.mxu0 %v7347_v50  ;;  %v7413_v37 = vpack.c.bf16 %v3832_v9, %v3828_v11  ;;  %v3841_v49 = vld [vmem:[#allocation5 + $0x78] sm:$0xff]  ;;  %7412 = vmatprep.subr.bf16.mxu1 %v7411_v10  ;;  %v7351_v0 = vpack.c.bf16 %v3839_v7, %v3835_v2  ;;  %v3834_v15 = vld [vmem:[#allocation5 + $0x40] sm:$0xff]  ;;  %v3836_v17 = vld [vmem:[#allocation5 + $0x50] sm:$0xff] }
 0x8d5   :  { %7350 = vmatpush1.bf16.msra.mxu0 %v7349_v29  ;;  %v7415_v6 = vpack.c.bf16 %v3841_v49, %v3837_v54  ;;  %v3838_v25 = vld [vmem:[#allocation5 + $0x60] sm:$0xff]  ;;  %v3840_v44 = vld [vmem:[#allocation5 + $0x70] sm:$0xff]  ;;  %v3843_v57 = vld [vmem:[#allocation5 + $0x88] sm:$0xff]  ;;  %p8847_p7 = por %p8846_p6, %p8845_p5 }
 0x8d6   :  { %7414 = vmatpush1.bf16.msra.mxu1 %v7413_v37  ;;  %v7353_v34 = vpack.c.bf16 %v3838_v25, %v3834_v15  ;;  %v3847_v14 = vld [vmem:[#allocation5 + $0xa8] sm:$0xff]  ;;  %7352 = vmatprep.subr.bf16.mxu0 %v7351_v0  ;;  %v7417_v24 = vpack.c.bf16 %v3840_v44, %v3836_v17  ;;  %v3845_v41 = vld [vmem:[#allocation5 + $0x98] sm:$0xff]  ;;  %v3842_v12 = vld [vmem:[#allocation5 + $0x80] sm:$0xff] }
 0x8d7   :  { %7416 = vmatprep.subr.bf16.mxu1 %v7415_v6  ;;  %v7355_v26 = vpack.c.bf16 %v3847_v14, %v3843_v57  ;;  %v3849_v59 = vld [vmem:[#allocation5 + $0xb8] sm:$0xff]  ;;  %v3846_v42 = vld [vmem:[#allocation5 + $0xa0] sm:$0xff]  ;;  %v3844_v61 = vld [vmem:[#allocation5 + $0x90] sm:$0xff]  ;;  %p8848_p8 = pnand %p8847_p7, %p8841_p4 }
 0x8d8   :  { %v7419_v21 = vpack.c.bf16 %v3849_v59, %v3845_v41  ;;  %v3848_v47 = vld [vmem:[#allocation5 + $0xb0] sm:$0xff]  ;;  %v7357_v16 = vpack.c.bf16 %v3846_v42, %v3842_v12  ;;  %v3851_v33 = vld [vmem:[#allocation5 + $0xc8] sm:$0xff]  ;;  %v3853_v40 = vld [vmem:[#allocation5 + $0xd8] sm:$0xff] }
 0x8d9   :  { %7354 = vmatpush1.bf16.msra.mxu0 %v7353_v34  ;;  %v3855_v51 = vld [vmem:[#allocation5 + $0xe8] sm:$0xff]  ;;  %v7421_v13 = vpack.c.bf16 %v3848_v47, %v3844_v61  ;;  %v3857_v52 = vld [vmem:[#allocation5 + $0xf8] sm:$0xff]  ;;  %v3850_v39 = vld [vmem:[#allocation5 + $0xc0] sm:$0xff] }
 0x8da   :  { %7418 = vmatpush1.bf16.msra.mxu1 %v7417_v24  ;;  %7356 = vmatprep.subr.bf16.mxu0 %v7355_v26  ;;  %v7359_v48 = vpack.c.bf16 %v3855_v51, %v3851_v33  ;;  %v3854_v19 = vld [vmem:[#allocation5 + $0xe0] sm:$0xff]  ;;  %v7423_v4 = vpack.c.bf16 %v3857_v52, %v3853_v40  ;;  %v3852_v8 = vld [vmem:[#allocation5 + $0xd0] sm:$0xff]  ;;  %v3859_v56 = vld [vmem:[#allocation5 + $0x108] sm:$0xff] }
 0x8db   :  { %7420 = vmatprep.subr.bf16.mxu1 %v7419_v21  ;;  %v3856_v36 = vld [vmem:[#allocation5 + $0xf0] sm:$0xff]  ;;  %v3863_v23 = vld [vmem:[#allocation5 + $0x128] sm:$0xff]  ;;  %v3861_v1 = vld [vmem:[#allocation5 + $0x118] sm:$0xff]  ;;  %v7361_v43 = vpack.c.bf16 %v3854_v19, %v3850_v39 }
 0x8dc   :  { %v3865_v45 = vld [vmem:[#allocation5 + $0x138] sm:$0xff]  ;;  %v7425_v38 = vpack.c.bf16 %v3856_v36, %v3852_v8  ;;  %v7363_v20 = vpack.c.bf16 %v3863_v23, %v3859_v56  ;;  %v3858_v58 = vld [vmem:[#allocation5 + $0x100] sm:$0xff]  ;;  %v3860_v32 = vld [vmem:[#allocation5 + $0x110] sm:$0xff] }
 0x8dd   :  { %7358 = vmatpush1.bf16.msra.mxu0 %v7357_v16  ;;  %v3862_v63 = vld [vmem:[#allocation5 + $0x120] sm:$0xff]  ;;  %v7427_v30 = vpack.c.bf16 %v3865_v45, %v3861_v1  ;;  %v3864_v46 = vld [vmem:[#allocation5 + $0x130] sm:$0xff]  ;;  %v3867_v53 = vld [vmem:[#allocation5 + $0x148] sm:$0xff] }
 0x8de   :  { %7422 = vmatpush1.bf16.msra.mxu1 %v7421_v13  ;;  %7360 = vmatprep.subr.bf16.mxu0 %v7359_v48  ;;  %v3871_v55 = vld [vmem:[#allocation5 + $0x168] sm:$0xff]  ;;  %v3869_v5 = vld [vmem:[#allocation5 + $0x158] sm:$0xff]  ;;  %v7365_v27 = vpack.c.bf16 %v3862_v63, %v3858_v58  ;;  %v7429_v35 = vpack.c.bf16 %v3864_v46, %v3860_v32  ;;  %v3866_v10 = vld [vmem:[#allocation5 + $0x140] sm:$0xff] }
 0x8df   :  { %7424 = vmatprep.subr.bf16.mxu1 %v7423_v4  ;;  %v3873_v50 = vld [vmem:[#allocation5 + $0x178] sm:$0xff]  ;;  %v7367_v22 = vpack.c.bf16 %v3871_v55, %v3867_v53  ;;  %v3870_v29 = vld [vmem:[#allocation5 + $0x160] sm:$0xff]  ;;  %v3868_v11 = vld [vmem:[#allocation5 + $0x150] sm:$0xff] }
 0x8e0   :  { %v7431_v9 = vpack.c.bf16 %v3873_v50, %v3869_v5  ;;  %v3872_v2 = vld [vmem:[#allocation5 + $0x170] sm:$0xff]  ;;  %v3875_v37 = vld [vmem:[#allocation5 + $0x188] sm:$0xff]  ;;  %v3877_v54 = vld [vmem:[#allocation5 + $0x198] sm:$0xff]  ;;  %v7369_v0 = vpack.c.bf16 %v3870_v29, %v3866_v10 }
 0x8e1   :  { %7362 = vmatpush1.bf16.msra.mxu0 %v7361_v43  ;;  %v3879_v7 = vld [vmem:[#allocation5 + $0x1a8] sm:$0xff]  ;;  %v3881_v49 = vld [vmem:[#allocation5 + $0x1b8] sm:$0xff]  ;;  %v7433_v6 = vpack.c.bf16 %v3872_v2, %v3868_v11  ;;  %v3874_v25 = vld [vmem:[#allocation5 + $0x180] sm:$0xff] }
 0x8e2   :  { %7426 = vmatpush1.bf16.msra.mxu1 %v7425_v38  ;;  %7364 = vmatprep.subr.bf16.mxu0 %v7363_v20  ;;  %v7371_v15 = vpack.c.bf16 %v3879_v7, %v3875_v37  ;;  %v3878_v17 = vld [vmem:[#allocation5 + $0x1a0] sm:$0xff]  ;;  %v3876_v34 = vld [vmem:[#allocation5 + $0x190] sm:$0xff]  ;;  %v7435_v44 = vpack.c.bf16 %v3881_v49, %v3877_v54  ;;  %v3883_v14 = vld [vmem:[#allocation5 + $0x1c8] sm:$0xff] }
 0x8e3   :  { %7428 = vmatprep.subr.bf16.mxu1 %v7427_v30  ;;  %v3880_v57 = vld [vmem:[#allocation5 + $0x1b0] sm:$0xff]  ;;  %v3887_v24 = vld [vmem:[#allocation5 + $0x1e8] sm:$0xff]  ;;  %v3885_v26 = vld [vmem:[#allocation5 + $0x1d8] sm:$0xff]  ;;  %v7373_v59 = vpack.c.bf16 %v3878_v17, %v3874_v25 }
 0x8e4   :  { %v3889_v41 = vld [vmem:[#allocation5 + $0x1f8] sm:$0xff]  ;;  %v7437_v12 = vpack.c.bf16 %v3880_v57, %v3876_v34  ;;  %v7375_v21 = vpack.c.bf16 %v3887_v24, %v3883_v14  ;;  %v3882_v42 = vld [vmem:[#allocation5 + $0x1c0] sm:$0xff]  ;;  %v3884_v47 = vld [vmem:[#allocation5 + $0x1d0] sm:$0xff] }
 0x8e5   :  { %7366 = vmatpush1.bf16.msra.mxu0 %v7365_v27  ;;  %v3886_v61 = vld [vmem:[#allocation5 + $0x1e0] sm:$0xff]  ;;  %v7439_v16 = vpack.c.bf16 %v3889_v41, %v3885_v26  ;;  %v3888_v33 = vld [vmem:[#allocation5 + $0x1f0] sm:$0xff]  ;;  %v3891_v51 = vld [vmem:[#allocation5 + $0x208] sm:$0xff] }
 0x8e6   :  { %7430 = vmatpush1.bf16.msra.mxu1 %v7429_v35  ;;  %7368 = vmatprep.subr.bf16.mxu0 %v7367_v22  ;;  %v3895_v40 = vld [vmem:[#allocation5 + $0x228] sm:$0xff]  ;;  %v3893_v13 = vld [vmem:[#allocation5 + $0x218] sm:$0xff]  ;;  %v7377_v52 = vpack.c.bf16 %v3886_v61, %v3882_v42  ;;  %v7441_v39 = vpack.c.bf16 %v3888_v33, %v3884_v47  ;;  %v3890_v4 = vld [vmem:[#allocation5 + $0x200] sm:$0xff] }
 0x8e7   :  { %7432 = vmatprep.subr.bf16.mxu1 %v7431_v9  ;;  %v3897_v48 = vld [vmem:[#allocation5 + $0x238] sm:$0xff]  ;;  %v7379_v19 = vpack.c.bf16 %v3895_v40, %v3891_v51  ;;  %v3894_v8 = vld [vmem:[#allocation5 + $0x220] sm:$0xff]  ;;  %v3892_v36 = vld [vmem:[#allocation5 + $0x210] sm:$0xff] }
 0x8e8   :  { %v7443_v56 = vpack.c.bf16 %v3897_v48, %v3893_v13  ;;  %v3896_v23 = vld [vmem:[#allocation5 + $0x230] sm:$0xff]  ;;  %v3899_v1 = vld [vmem:[#allocation5 + $0x248] sm:$0xff]  ;;  %v3901_v43 = vld [vmem:[#allocation5 + $0x258] sm:$0xff]  ;;  %v7381_v20 = vpack.c.bf16 %v3894_v8, %v3890_v4 }
 0x8e9   :  { %7370 = vmatpush1.bf16.msra.mxu0 %v7369_v0  ;;  %v3903_v45 = vld [vmem:[#allocation5 + $0x268] sm:$0xff]  ;;  %v3905_v38 = vld [vmem:[#allocation5 + $0x278] sm:$0xff]  ;;  %v7445_v58 = vpack.c.bf16 %v3896_v23, %v3892_v36  ;;  %v3898_v32 = vld [vmem:[#allocation5 + $0x240] sm:$0xff] }
 0x8ea   :  { %7434 = vmatpush1.bf16.msra.mxu1 %v7433_v6  ;;  %7372 = vmatprep.subr.bf16.mxu0 %v7371_v15  ;;  %v7383_v63 = vpack.c.bf16 %v3903_v45, %v3899_v1  ;;  %v3902_v30 = vld [vmem:[#allocation5 + $0x260] sm:$0xff]  ;;  %v3900_v46 = vld [vmem:[#allocation5 + $0x250] sm:$0xff]  ;;  %v7447_v53 = vpack.c.bf16 %v3905_v38, %v3901_v43  ;;  %v3907_v5 = vld [vmem:[#allocation5 + $0x288] sm:$0xff] }
 0x8eb   :  { %7436 = vmatprep.subr.bf16.mxu1 %v7435_v44  ;;  %v3904_v55 = vld [vmem:[#allocation5 + $0x270] sm:$0xff]  ;;  %v3911_v50 = vld [vmem:[#allocation5 + $0x2a8] sm:$0xff]  ;;  %v3909_v27 = vld [vmem:[#allocation5 + $0x298] sm:$0xff]  ;;  %v7385_v22 = vpack.c.bf16 %v3902_v30, %v3898_v32 }
 0x8ec   :  { %v3913_v35 = vld [vmem:[#allocation5 + $0x2b8] sm:$0xff]  ;;  %v7449_v10 = vpack.c.bf16 %v3904_v55, %v3900_v46  ;;  %v7387_v29 = vpack.c.bf16 %v3911_v50, %v3907_v5  ;;  %v3906_v11 = vld [vmem:[#allocation5 + $0x280] sm:$0xff]  ;;  %v3908_v2 = vld [vmem:[#allocation5 + $0x290] sm:$0xff] }
 0x8ed   :  { %7374 = vmatpush1.bf16.msra.mxu0 %v7373_v59  ;;  %v3910_v9 = vld [vmem:[#allocation5 + $0x2a0] sm:$0xff]  ;;  %v7451_v37 = vpack.c.bf16 %v3913_v35, %v3909_v27  ;;  %v3912_v7 = vld [vmem:[#allocation5 + $0x2b0] sm:$0xff]  ;;  %v3915_v54 = vld [vmem:[#allocation5 + $0x2c8] sm:$0xff] }
 0x8ee   :  { %7438 = vmatpush1.bf16.msra.mxu1 %v7437_v12  ;;  %7376 = vmatprep.subr.bf16.mxu0 %v7375_v21  ;;  %v3919_v49 = vld [vmem:[#allocation5 + $0x2e8] sm:$0xff]  ;;  %v3917_v0 = vld [vmem:[#allocation5 + $0x2d8] sm:$0xff]  ;;  %v7389_v15 = vpack.c.bf16 %v3910_v9, %v3906_v11  ;;  %v7453_v25 = vpack.c.bf16 %v3912_v7, %v3908_v2  ;;  %v3914_v34 = vld [vmem:[#allocation5 + $0x2c0] sm:$0xff] }
 0x8ef   :  { %7440 = vmatprep.subr.bf16.mxu1 %v7439_v16  ;;  %v3921_v6 = vld [vmem:[#allocation5 + $0x2f8] sm:$0xff]  ;;  %v7391_v17 = vpack.c.bf16 %v3919_v49, %v3915_v54  ;;  %v3918_v44 = vld [vmem:[#allocation5 + $0x2e0] sm:$0xff]  ;;  %v3916_v57 = vld [vmem:[#allocation5 + $0x2d0] sm:$0xff] }
 0x8f0   :  { %v7455_v14 = vpack.c.bf16 %v3921_v6, %v3917_v0  ;;  %v3920_v24 = vld [vmem:[#allocation5 + $0x2f0] sm:$0xff]  ;;  %v3923_v26 = vld [vmem:[#allocation5 + $0x308] sm:$0xff]  ;;  %v3925_v59 = vld [vmem:[#allocation5 + $0x318] sm:$0xff]  ;;  %v7393_v21 = vpack.c.bf16 %v3918_v44, %v3914_v34 }
 0x8f1   :  { %7378 = vmatpush1.bf16.msra.mxu0 %v7377_v52  ;;  %v3927_v41 = vld [vmem:[#allocation5 + $0x328] sm:$0xff]  ;;  %v3929_v12 = vld [vmem:[#allocation5 + $0x338] sm:$0xff]  ;;  %v7457_v42 = vpack.c.bf16 %v3920_v24, %v3916_v57  ;;  %v3922_v47 = vld [vmem:[#allocation5 + $0x300] sm:$0xff] }
 0x8f2   :  { %7442 = vmatpush1.bf16.msra.mxu1 %v7441_v39  ;;  %7380 = vmatprep.subr.bf16.mxu0 %v7379_v19  ;;  %v7395_v61 = vpack.c.bf16 %v3927_v41, %v3923_v26  ;;  %v3926_v16 = vld [vmem:[#allocation5 + $0x320] sm:$0xff]  ;;  %v3924_v33 = vld [vmem:[#allocation5 + $0x310] sm:$0xff]  ;;  %v7459_v51 = vpack.c.bf16 %v3929_v12, %v3925_v59  ;;  %v3931_v13 = vld [vmem:[#allocation5 + $0x348] sm:$0xff] }
 0x8f3   :  { %7444 = vmatprep.subr.bf16.mxu1 %v7443_v56  ;;  %v3928_v40 = vld [vmem:[#allocation5 + $0x330] sm:$0xff]  ;;  %v3935_v48 = vld [vmem:[#allocation5 + $0x368] sm:$0xff]  ;;  %v3933_v52 = vld [vmem:[#allocation5 + $0x358] sm:$0xff]  ;;  %v7397_v19 = vpack.c.bf16 %v3926_v16, %v3922_v47 }
 0x8f4   :  { %v3937_v39 = vld [vmem:[#allocation5 + $0x378] sm:$0xff]  ;;  %v7461_v4 = vpack.c.bf16 %v3928_v40, %v3924_v33  ;;  %v7399_v8 = vpack.c.bf16 %v3935_v48, %v3931_v13  ;;  %v3930_v36 = vld [vmem:[#allocation5 + $0x340] sm:$0xff]  ;;  %v3932_v23 = vld [vmem:[#allocation5 + $0x350] sm:$0xff] }
 0x8f5   :  { %7382 = vmatpush1.bf16.msra.mxu0 %v7381_v20  ;;  %v3934_v56 = vld [vmem:[#allocation5 + $0x360] sm:$0xff]  ;;  %v7463_v1 = vpack.c.bf16 %v3937_v39, %v3933_v52  ;;  %v3936_v45 = vld [vmem:[#allocation5 + $0x370] sm:$0xff]  ;;  %v3939_v43 = vld [vmem:[#allocation5 + $0x388] sm:$0xff] }
 0x8f6   :  { %7446 = vmatpush1.bf16.msra.mxu1 %v7445_v58  ;;  %7384 = vmatprep.subr.bf16.mxu0 %v7383_v63  ;;  %v3943_v38 = vld [vmem:[#allocation5 + $0x3a8] sm:$0xff]  ;;  %v3941_v20 = vld [vmem:[#allocation5 + $0x398] sm:$0xff]  ;;  %v7401_v63 = vpack.c.bf16 %v3934_v56, %v3930_v36  ;;  %v7465_v32 = vpack.c.bf16 %v3936_v45, %v3932_v23  ;;  %v3938_v46 = vld [vmem:[#allocation5 + $0x380] sm:$0xff] }
 0x8f7   :  { %7448 = vmatprep.subr.bf16.mxu1 %v7447_v53  ;;  %v3945_v58 = vld [vmem:[#allocation5 + $0x3b8] sm:$0xff]  ;;  %v7403_v30 = vpack.c.bf16 %v3943_v38, %v3939_v43  ;;  %v3942_v53 = vld [vmem:[#allocation5 + $0x3a0] sm:$0xff]  ;;  %v3940_v55 = vld [vmem:[#allocation5 + $0x390] sm:$0xff] }
 0x8f8   :  { %v7467_v5 = vpack.c.bf16 %v3945_v58, %v3941_v20  ;;  %v3944_v50 = vld [vmem:[#allocation5 + $0x3b0] sm:$0xff]  ;;  %v3947_v27 = vld [vmem:[#allocation5 + $0x3c8] sm:$0xff]  ;;  %v3946_v2 = vld [vmem:[#allocation5 + $0x3c0] sm:$0xff] }
 0x8f9   :  { %7386 = vmatpush1.bf16.msra.mxu0 %v7385_v22  ;;  %v3951_v35 = vld [vmem:[#allocation5 + $0x3e8] sm:$0xff]  ;;  %v3949_v22 = vld [vmem:[#allocation5 + $0x3d8] sm:$0xff]  ;;  %v7469_v11 = vpack.c.bf16 %v3944_v50, %v3940_v55  ;;  %v3948_v7 = vld [vmem:[#allocation5 + $0x3d0] sm:$0xff] }
 0x8fa   :  { %7450 = vmatpush1.bf16.msra.mxu1 %v7449_v10  ;;  %7388 = vmatprep.subr.bf16.mxu0 %v7387_v29  ;;  %v3953_v10 = vld [vmem:[#allocation5 + $0x3f8] sm:$0xff]  ;;  %v7405_v29 = vpack.c.bf16 %v3942_v53, %v3938_v46  ;;  %v7407_v9 = vpack.c.bf16 %v3951_v35, %v3947_v27  ;;  %v3952_v49 = vld [vmem:[#allocation5 + $0x3f0] sm:$0xff]  ;;  %v4237_v0 = vld [vmem:[#allocation6 + $0x8] sm:$0xff] }
 0x8fb   :  { %7452 = vmatprep.subr.bf16.mxu1 %v7451_v37  ;;  %v3950_v37 = vld [vmem:[#allocation5 + $0x3e0] sm:$0xff]  ;;  %v7471_v54 = vpack.c.bf16 %v3953_v10, %v3949_v22  ;;  %v4241_v6 = vld [vmem:[#allocation6 + $0x28] sm:$0xff]  ;;  %v7473_v34 = vpack.c.bf16 %v3952_v49, %v3948_v7  ;;  %v4238_v24 = vld [vmem:[#allocation6 + $0x10] sm:$0xff] }
 0x8fc   :  { %v7475_v44 = vpack.c.bf16 %v4241_v6, %v4237_v0  ;;  %v4236_v57 = vld [vmem:[#allocation6] sm:$0xff]  ;;  %v4242_v41 = vld [vmem:[#allocation6 + $0x30] sm:$0xff]  ;;  %v4245_v59 = vld [vmem:[#allocation6 + $0x48] sm:$0xff] }
 0x8fd   :  { %7390 = vmatpush1.bf16.msra.mxu0 %v7389_v15  ;;  %v4239_v15 = vld [vmem:[#allocation6 + $0x18] sm:$0xff]  ;;  %v4249_v12 = vld [vmem:[#allocation6 + $0x68] sm:$0xff]  ;;  %v7541_v47 = vpack.c.bf16 %v4242_v41, %v4238_v24  ;;  %v4244_v33 = vld [vmem:[#allocation6 + $0x40] sm:$0xff] }
 0x8fe   :  { %7454 = vmatpush1.bf16.msra.mxu1 %v7453_v25  ;;  %7392 = vmatprep.subr.bf16.mxu0 %v7391_v17  ;;  %v4243_v25 = vld [vmem:[#allocation6 + $0x38] sm:$0xff]  ;;  %v7409_v17 = vpack.c.bf16 %v3950_v37, %v3946_v2  ;;  %v7479_v16 = vpack.c.bf16 %v4249_v12, %v4245_v59  ;;  %v4246_v40 = vld [vmem:[#allocation6 + $0x50] sm:$0xff]  ;;  %v4253_v52 = vld [vmem:[#allocation6 + $0x88] sm:$0xff] }
 0x8ff   :  { %7456 = vmatprep.subr.bf16.mxu1 %v7455_v14  ;;  %v4240_v14 = vld [vmem:[#allocation6 + $0x20] sm:$0xff]  ;;  %v7539_v26 = vpack.c.bf16 %v4243_v25, %v4239_v15  ;;  %v4250_v48 = vld [vmem:[#allocation6 + $0x70] sm:$0xff]  ;;  %v4257_v39 = vld [vmem:[#allocation6 + $0xa8] sm:$0xff] }
 0x900   :  { %v7545_v56 = vpack.c.bf16 %v4250_v48, %v4246_v40  ;;  %v7483_v23 = vpack.c.bf16 %v4257_v39, %v4253_v52  ;;  %v4256_v45 = vld [vmem:[#allocation6 + $0xa0] sm:$0xff]  ;;  %v4254_v43 = vld [vmem:[#allocation6 + $0x90] sm:$0xff]  ;;  %v4261_v58 = vld [vmem:[#allocation6 + $0xc8] sm:$0xff] }
 0x901   :  { %7394 = vmatpush1.bf16.msra.mxu0 %v7393_v21  ;;  %v4247_v21 = vld [vmem:[#allocation6 + $0x58] sm:$0xff]  ;;  %v4258_v20 = vld [vmem:[#allocation6 + $0xb0] sm:$0xff]  ;;  %v11150_v46 = vld [vmem:[#allocation26_spill] sm:$0xff] }
 0x902   :  { %7458 = vmatpush1.bf16.msra.mxu1 %v7457_v42  ;;  %7396 = vmatprep.subr.bf16.mxu0 %v7395_v61  ;;  %v4251_v42 = vld [vmem:[#allocation6 + $0x78] sm:$0xff]  ;;  %v7477_v61 = vpack.c.bf16 %v4240_v14, %v4236_v57  ;;  %v7549_v55 = vpack.c.bf16 %v4258_v20, %v4254_v43  ;;  %v4260_v50 = vld [vmem:[#allocation6 + $0xc0] sm:$0xff]  ;;  %v4262_v35 = vld [vmem:[#allocation6 + $0xd0] sm:$0xff] }
 0x903   :  { %7460 = vmatprep.subr.bf16.mxu1 %v7459_v51  ;;  %v4248_v51 = vld [vmem:[#allocation6 + $0x60] sm:$0xff]  ;;  %v7543_v13 = vpack.c.bf16 %v4251_v42, %v4247_v21  ;;  %v4266_v10 = vld [vmem:[#allocation6 + $0xf0] sm:$0xff]  ;;  %v4279_v57 = vld [vmem:[#allocation6 + $0x158] sm:$0xff] }
 0x904   :  { %v7481_v36 = vpack.c.bf16 %v4248_v51, %v4244_v33  ;;  %v4264_v27 = vld [vmem:[#allocation6 + $0xe0] sm:$0xff]  ;;  %v7553_v7 = vpack.c.bf16 %v4266_v10, %v4262_v35  ;;  %v4270_v6 = vld [vmem:[#allocation6 + $0x110] sm:$0xff]  ;;  %v11154_v33 = vld [vmem:[#allocation70_spill] sm:$0xff] }
 0x905   :  { %7398 = vmatpush1.bf16.msra.mxu0 %v7397_v19  ;;  %v11149_v19 = vld [vmem:[#allocation72_spill] sm:$0xff]  ;;  %v11151_v2 = vld [vmem:[#allocation65_spill] sm:$0xff]  ;;  %v7489_v37 = vpack.c.bf16 %v4264_v27, %v4260_v50  ;;  %v4274_v25 = vld [vmem:[#allocation6 + $0x130] sm:$0xff] }
 0x906   :  { %7462 = vmatpush1.bf16.msra.mxu1 %v7461_v4  ;;  %7400 = vmatprep.subr.bf16.mxu0 %v7399_v8  ;;  %v4255_v4 = vld [vmem:[#allocation6 + $0x98] sm:$0xff]  ;;  %v4268_v49 = vld [vmem:[#allocation6 + $0x100] sm:$0xff]  ;;  %v4278_v21 = vld [vmem:[#allocation6 + $0x150] sm:$0xff] }
 0x907   :  { %7464 = vmatprep.subr.bf16.mxu1 %v7463_v1  ;;  %v4259_v8 = vld [vmem:[#allocation6 + $0xb8] sm:$0xff]  ;;  %v4252_v1 = vld [vmem:[#allocation6 + $0x80] sm:$0xff]  ;;  %v4305_v50 = vld [vmem:[#allocation6 + $0x228] sm:$0xff] }
 0x908   :  { %v7547_v38 = vpack.c.bf16 %v4259_v8, %v4255_v4  ;;  %v7485_v53 = vpack.c.bf16 %v4256_v45, %v4252_v1  ;;  %v4272_v0 = vld [vmem:[#allocation6 + $0x120] sm:$0xff]  ;;  %v4287_v51 = vld [vmem:[#allocation6 + $0x198] sm:$0xff]  ;;  %v4286_v8 = vld [vmem:[#allocation6 + $0x190] sm:$0xff] }
 0x909   :  { %7402 = vmatpush1.bf16.msra.mxu0 %v7401_v63  ;;  %v4265_v63 = vld [vmem:[#allocation6 + $0xe8] sm:$0xff]  ;;  %v11153_v14 = vld [vmem:[#allocation69_spill] sm:$0xff]  ;;  %v7493_v24 = vpack.c.bf16 %v4272_v0, %v4268_v49  ;;  %v4291_v40 = vld [vmem:[#allocation6 + $0x1b8] sm:$0xff] }
 0x90a   :  { %7466 = vmatpush1.bf16.msra.mxu1 %v7465_v32  ;;  %7404 = vmatprep.subr.bf16.mxu0 %v7403_v30  ;;  %v4263_v32 = vld [vmem:[#allocation6 + $0xd8] sm:$0xff]  ;;  %v4276_v59 = vld [vmem:[#allocation6 + $0x140] sm:$0xff]  ;;  %v4297_v1 = vld [vmem:[#allocation6 + $0x1e8] sm:$0xff] }
 0x90b   :  { %7468 = vmatprep.subr.bf16.mxu1 %v7467_v5  ;;  %v4267_v30 = vld [vmem:[#allocation6 + $0xf8] sm:$0xff]  ;;  %v7487_v5 = vpack.c.bf16 %v4265_v63, %v4261_v58  ;;  %v4280_v12 = vld [vmem:[#allocation6 + $0x160] sm:$0xff]  ;;  %v11156_v45 = vld [vmem:[#allocation71_spill] sm:$0xff] }
 0x90c   :  { %v7551_v22 = vpack.c.bf16 %v4267_v30, %v4263_v32  ;;  %v7497_v48 = vpack.c.bf16 %v4280_v12, %v4276_v59  ;;  %v4288_v4 = vld [vmem:[#allocation6 + $0x1a0] sm:$0xff]  ;;  %v4295_v43 = vld [vmem:[#allocation6 + $0x1d8] sm:$0xff]  ;;  %v11157_v27 = vld [vmem:[#allocation27_spill] sm:$0xff] }
 0x90d   :  { %7406 = vmatpush1.bf16.msra.mxu0 %v7405_v29  ;;  %v4269_v29 = vld [vmem:[#allocation6 + $0x108] sm:$0xff]  ;;  %v4292_v32 = vld [vmem:[#allocation6 + $0x1c0] sm:$0xff]  ;;  %v4303_v35 = vld [vmem:[#allocation6 + $0x218] sm:$0xff] }
 0x90e   :  { %7470 = vmatpush1.bf16.msra.mxu1 %v7469_v11  ;;  %7408 = vmatprep.subr.bf16.mxu0 %v7407_v9  ;;  %v4273_v11 = vld [vmem:[#allocation6 + $0x128] sm:$0xff]  ;;  %v4271_v9 = vld [vmem:[#allocation6 + $0x118] sm:$0xff]  ;;  %v4296_v30 = vld [vmem:[#allocation6 + $0x1e0] sm:$0xff] }
 0x90f   :  { %7472 = vmatprep.subr.bf16.mxu1 %v7471_v54  ;;  %v7491_v54 = vpack.c.bf16 %v4273_v11, %v4269_v29  ;;  %v4300_v11 = vld [vmem:[#allocation6 + $0x200] sm:$0xff]  ;;  %v4311_v0 = vld [vmem:[#allocation6 + $0x258] sm:$0xff] }
 0x910   :  { %v11158_v49 = vld [vmem:[#allocation73_spill] sm:$0xff] }
 0x911   :  { %7410 = vmatpush1.bf16.msra.mxu0 %v7409_v17  ;;  %v4277_v17 = vld [vmem:[#allocation6 + $0x148] sm:$0xff] }
 0x912   :  { %7474 = vmatpush1.bf16.msra.mxu1 %v7473_v34  ;;  %7476 = vmatprep.subr.bf16.mxu0 %v7475_v44  ;;  %v4281_v34 = vld [vmem:[#allocation6 + $0x168] sm:$0xff]  ;;  %v11152_v44 = vld [vmem:[#allocation56_spill] sm:$0xff] }
 0x913   :  { %7540 = vmatprep.subr.bf16.mxu1 %v7539_v26  ;;  %v7557_v26 = vpack.c.bf16 %v4274_v25, %v4270_v6  ;;  %v7495_v41 = vpack.c.bf16 %v4281_v34, %v4277_v17  ;;  %v4315_v6 = vld [vmem:[#allocation6 + $0x278] sm:$0xff]  ;;  %v4308_v17 = vld [vmem:[#allocation6 + $0x240] sm:$0xff] }
 0x914   :  { %4041 = vmatmul.mubr.f32.vlgmr.msra.gmra.mrb[64].mxu0 %v11149_v19  ;;  %v4312_v34 = vld [vmem:[#allocation6 + $0x260] sm:$0xff] }
 0x915   :  { %4154 = vmatmul.mubr.f32.vlgmr.msra.gmra.mrb[72].mxu1 %v11149_v19  ;;  %7478 = vmatpush1.bf16.msra.mxu0 %v7477_v61  ;;  %v4282_v61 = vld [vmem:[#allocation6 + $0x170] sm:$0xff]  ;;  %v4284_v19 = vld [vmem:[#allocation6 + $0x180] sm:$0xff]  ;;  %v7513_v59 = vpack.c.bf16 %v4312_v34, %v4308_v17 }
 0x916   :  { %7542 = vmatpush1.bf16.msra.mxu1 %v7541_v47  ;;  %7480 = vmatprep.subr.bf16.mxu0 %v7479_v16  ;;  %v4285_v47 = vld [vmem:[#allocation6 + $0x188] sm:$0xff]  ;;  %v7561_v52 = vpack.c.bf16 %v4282_v61, %v4278_v21  ;;  %v7501_v20 = vpack.c.bf16 %v4288_v4, %v4284_v19  ;;  %v4320_v61 = vld [vmem:[#allocation6 + $0x2a0] sm:$0xff]  ;;  %v4350_v17 = vld [vmem:[#allocation6 + $0x390] sm:$0xff] }
 0x917   :  { %7544 = vmatprep.subr.bf16.mxu1 %v7543_v13  ;;  %4046 = vmatprep.mubr.f32.mxu0 %v10176_v62  ;;  %v4289_v16 = vld [vmem:[#allocation6 + $0x1a8] sm:$0xff]  ;;  %v11155_v13 = vld [vmem:[#allocation55_spill] sm:$0xff]  ;;  %v4324_v4 = vld [vmem:[#allocation6 + $0x2c0] sm:$0xff] }
 0x918   :  { %4047 = vmatmul.mubr.f32.gmra.mrb[66].mxu0 %v11150_v46  ;;  %4159 = vmatprep.mubr.f32.mxu1 %v10176_v62  ;;  %v4275_v62 = vld [vmem:[#allocation6 + $0x138] sm:$0xff]  ;;  %v7499_v39 = vpack.c.bf16 %v4289_v16, %v4285_v47  ;;  %v4318_v47 = vld [vmem:[#allocation6 + $0x290] sm:$0xff] }
 0x919   :  { %7482 = vmatpush1.bf16.msra.mxu0 %v7481_v36  ;;  %4160 = vmatmul.mubr.f32.gmra.mrb[74].mxu1 %v11150_v46  ;;  %v7555_v15 = vpack.c.bf16 %v4275_v62, %v4271_v9  ;;  %v7563_v36 = vpack.c.bf16 %v4291_v40, %v4287_v51  ;;  %v4294_v46 = vld [vmem:[#allocation6 + $0x1d0] sm:$0xff]  ;;  %v4304_v9 = vld [vmem:[#allocation6 + $0x220] sm:$0xff]  ;;  %v4325_v51 = vld [vmem:[#allocation6 + $0x2c8] sm:$0xff] }
 0x91a   :  { %7546 = vmatpush1.bf16.msra.mxu1 %v7545_v56  ;;  %7484 = vmatprep.subr.bf16.mxu0 %v7483_v23  ;;  %v4290_v56 = vld [vmem:[#allocation6 + $0x1b0] sm:$0xff]  ;;  %v4293_v23 = vld [vmem:[#allocation6 + $0x1c8] sm:$0xff] }
 0x91b   :  { %7548 = vmatprep.subr.bf16.mxu1 %v7547_v38  ;;  %4052 = vmatprep.mubr.f32.mxu0 %v10076_v60  ;;  %v4299_v38 = vld [vmem:[#allocation6 + $0x1f8] sm:$0xff]  ;;  %v7565_v58 = vpack.c.bf16 %v4290_v56, %v4286_v8  ;;  %v7503_v63 = vpack.c.bf16 %v4297_v1, %v4293_v23  ;;  %v4302_v62 = vld [vmem:[#allocation6 + $0x210] sm:$0xff]  ;;  %v4329_v40 = vld [vmem:[#allocation6 + $0x2e8] sm:$0xff] }
 0x91c   :  { %4053 = vmatmul.mubr.f32.gmra.mrb[68].mxu0 %v11151_v2  ;;  %4165 = vmatprep.mubr.f32.mxu1 %v10076_v60  ;;  %v4283_v60 = vld [vmem:[#allocation6 + $0x178] sm:$0xff]  ;;  %v7519_v19 = vpack.c.bf16 %v4329_v40, %v4325_v51  ;;  %v4328_v8 = vld [vmem:[#allocation6 + $0x2e0] sm:$0xff]  ;;  %v4330_v23 = vld [vmem:[#allocation6 + $0x2f0] sm:$0xff] }
 0x91d   :  { %7486 = vmatpush1.bf16.msra.mxu0 %v7485_v53  ;;  %4166 = vmatmul.mubr.f32.gmra.mrb[76].mxu1 %v11151_v2  ;;  %v7559_v42 = vpack.c.bf16 %v4283_v60, %v4279_v57  ;;  %v7567_v53 = vpack.c.bf16 %v4299_v38, %v4295_v43  ;;  %v7575_v57 = vpack.c.bf16 %v4315_v6, %v4311_v0  ;;  %v4314_v60 = vld [vmem:[#allocation6 + $0x270] sm:$0xff]  ;;  %v4333_v1 = vld [vmem:[#allocation6 + $0x308] sm:$0xff]  ;;  %v4335_v43 = vld [vmem:[#allocation6 + $0x318] sm:$0xff] }
 0x91e   :  { %7550 = vmatpush1.bf16.msra.mxu1 %v7549_v55  ;;  %7488 = vmatprep.subr.bf16.mxu0 %v7487_v5  ;;  %v4298_v55 = vld [vmem:[#allocation6 + $0x1f0] sm:$0xff]  ;;  %v4301_v5 = vld [vmem:[#allocation6 + $0x208] sm:$0xff]  ;;  %v4339_v38 = vld [vmem:[#allocation6 + $0x338] sm:$0xff] }
 0x91f   :  { %7552 = vmatprep.subr.bf16.mxu1 %v7551_v22  ;;  %4058 = vmatprep.mubr.f32.mxu0 %v11152_v44  ;;  %v4307_v22 = vld [vmem:[#allocation6 + $0x238] sm:$0xff]  ;;  %v7569_v10 = vpack.c.bf16 %v4298_v55, %v4294_v46  ;;  %v7507_v29 = vpack.c.bf16 %v4305_v50, %v4301_v5  ;;  %v4334_v46 = vld [vmem:[#allocation6 + $0x310] sm:$0xff]  ;;  %v4341_v5 = vld [vmem:[#allocation6 + $0x348] sm:$0xff] }
 0x920   :  { %4059 = vmatmul.mubr.f32.gmra.mrb[70].mxu0 %v11153_v14  ;;  %4171 = vmatprep.mubr.f32.mxu1 %v11152_v44  ;;  %v7571_v2 = vpack.c.bf16 %v4307_v22, %v4303_v35  ;;  %v4310_v44 = vld [vmem:[#allocation6 + $0x250] sm:$0xff]  ;;  %v4345_v50 = vld [vmem:[#allocation6 + $0x368] sm:$0xff]  ;;  %v4347_v35 = vld [vmem:[#allocation6 + $0x378] sm:$0xff] }
 0x921   :  { %7490 = vmatpush1.bf16.msra.mxu0 %v7489_v37  ;;  %4172 = vmatmul.mubr.f32.gmra.mrb[78].mxu1 %v11153_v14  ;;  %v4306_v37 = vld [vmem:[#allocation6 + $0x230] sm:$0xff]  ;;  %v4317_v14 = vld [vmem:[#allocation6 + $0x288] sm:$0xff]  ;;  %v7577_v12 = vpack.c.bf16 %v4314_v60, %v4310_v44  ;;  %v4531_v51 = vld [vmem:[#allocation7 + $0x18] sm:$0xff] }
 0x922   :  { %7554 = vmatpush1.bf16.msra.mxu1 %v7553_v7  ;;  %7492 = vmatprep.subr.bf16.mxu0 %v7491_v54  ;;  %v4309_v7 = vld [vmem:[#allocation6 + $0x248] sm:$0xff]  ;;  %v4338_v55 = vld [vmem:[#allocation6 + $0x330] sm:$0xff]  ;;  %v4535_v40 = vld [vmem:[#allocation7 + $0x38] sm:$0xff] }
 0x923   :  { %7556 = vmatprep.subr.bf16.mxu1 %v7555_v15  ;;  %4064 = vmatprep.mubr.f32.mxu0 %v11154_v33  ;;  %v4313_v54 = vld [vmem:[#allocation6 + $0x268] sm:$0xff]  ;;  %v7573_v15 = vpack.c.bf16 %v4306_v37, %v4302_v62  ;;  %v4354_v44 = vld [vmem:[#allocation6 + $0x3b0] sm:$0xff] }
 0x924   :  { %4065 = vmatmul.mubr.f32.gmra.mrb[72].mxu0 %v11155_v13  ;;  %4177 = vmatprep.mubr.f32.mxu1 %v11154_v33  ;;  %v7511_v25 = vpack.c.bf16 %v4313_v54, %v4309_v7  ;;  %v4322_v33 = vld [vmem:[#allocation6 + $0x2b0] sm:$0xff]  ;;  %v4349_v37 = vld [vmem:[#allocation6 + $0x388] sm:$0xff]  ;;  %v4351_v54 = vld [vmem:[#allocation6 + $0x398] sm:$0xff] }
 0x925   :  { %7494 = vmatpush1.bf16.msra.mxu0 %v7493_v24  ;;  %4178 = vmatmul.mubr.f32.gmra.mrb[80].mxu1 %v11155_v13  ;;  %v4321_v24 = vld [vmem:[#allocation6 + $0x2a8] sm:$0xff]  ;;  %v4327_v13 = vld [vmem:[#allocation6 + $0x2d8] sm:$0xff] }
 0x926   :  { %7558 = vmatpush1.bf16.msra.mxu1 %v7557_v26  ;;  %7496 = vmatprep.subr.bf16.mxu0 %v7495_v41  ;;  %v4319_v26 = vld [vmem:[#allocation6 + $0x298] sm:$0xff]  ;;  %v7515_v21 = vpack.c.bf16 %v4321_v24, %v4317_v14  ;;  %v4353_v7 = vld [vmem:[#allocation6 + $0x3a8] sm:$0xff] }
 0x927   :  { %7560 = vmatprep.subr.bf16.mxu1 %v7559_v42  ;;  %4070 = vmatprep.mubr.f32.mxu0 %v11156_v45  ;;  %v4323_v41 = vld [vmem:[#allocation6 + $0x2b8] sm:$0xff]  ;;  %v4316_v42 = vld [vmem:[#allocation6 + $0x280] sm:$0xff]  ;;  %v4361_v60 = vld [vmem:[#allocation6 + $0x3e8] sm:$0xff] }
 0x928   :  { %4071 = vmatmul.mubr.f32.gmra.mrb[74].mxu0 %v10030_v28  ;;  %4183 = vmatprep.mubr.f32.mxu1 %v11156_v45  ;;  %v7579_v16 = vpack.c.bf16 %v4323_v41, %v4319_v26  ;;  %v4337_v45 = vld [vmem:[#allocation6 + $0x328] sm:$0xff]  ;;  %v4359_v14 = vld [vmem:[#allocation6 + $0x3d8] sm:$0xff]  ;;  %v7597_v41 = vpack.c.bf16 %v4354_v44, %v4350_v17 }
 0x929   :  { %7498 = vmatpush1.bf16.msra.mxu0 %v7497_v48  ;;  %4184 = vmatmul.mubr.f32.gmra.mrb[82].mxu1 %v10030_v28  ;;  %v7505_v28 = vpack.c.bf16 %v4296_v30, %v4292_v32  ;;  %v4331_v48 = vld [vmem:[#allocation6 + $0x2f8] sm:$0xff]  ;;  %v4332_v32 = vld [vmem:[#allocation6 + $0x300] sm:$0xff]  ;;  %v4561_v17 = vld [vmem:[#allocation7 + $0x108] sm:$0xff] }
 0x92a   :  { %7562 = vmatpush1.bf16.msra.mxu1 %v7561_v52  ;;  %7500 = vmatprep.subr.bf16.mxu0 %v7499_v39  ;;  %v7517_v52 = vpack.c.bf16 %v4320_v61, %v4316_v42  ;;  %v7581_v39 = vpack.c.bf16 %v4322_v33, %v4318_v47  ;;  %v7583_v56 = vpack.c.bf16 %v4331_v48, %v4327_v13  ;;  %v4336_v30 = vld [vmem:[#allocation6 + $0x320] sm:$0xff]  ;;  %v4363_v24 = vld [vmem:[#allocation6 + $0x3f8] sm:$0xff]  ;;  %v4358_v42 = vld [vmem:[#allocation6 + $0x3d0] sm:$0xff] }
 0x92b   :  { %7564 = vmatprep.subr.bf16.mxu1 %v7563_v36  ;;  %4076 = vmatprep.mubr.f32.mxu0 %v11157_v27  ;;  %v4326_v36 = vld [vmem:[#allocation6 + $0x2d0] sm:$0xff]  ;;  %v7525_v22 = vpack.c.bf16 %v4336_v30, %v4332_v32  ;;  %v7599_v61 = vpack.c.bf16 %v4363_v24, %v4359_v14  ;;  %v4533_v33 = vld [vmem:[#allocation7 + $0x28] sm:$0xff]  ;;  %v4563_v44 = vld [vmem:[#allocation7 + $0x118] sm:$0xff] }
 0x92c   :  { %4077 = vmatmul.mubr.f32.gmra.mrb[76].mxu0 %v10132_v31  ;;  %4189 = vmatprep.mubr.f32.mxu1 %v11157_v27  ;;  %v4343_v27 = vld [vmem:[#allocation6 + $0x358] sm:$0xff]  ;;  %v4362_v47 = vld [vmem:[#allocation6 + $0x3f0] sm:$0xff] }
 0x92d   :  { %7502 = vmatpush1.bf16.msra.mxu0 %v7501_v20  ;;  %4190 = vmatmul.mubr.f32.gmra.mrb[84].mxu1 %v10132_v31  ;;  %v7509_v31 = vpack.c.bf16 %v4304_v9, %v4300_v11  ;;  %v7521_v20 = vpack.c.bf16 %v4328_v8, %v4324_v4  ;;  %v4344_v11 = vld [vmem:[#allocation6 + $0x360] sm:$0xff]  ;;  %v4342_v9 = vld [vmem:[#allocation6 + $0x350] sm:$0xff]  ;;  %v7591_v62 = vpack.c.bf16 %v4347_v35, %v4343_v27 }
 0x92e   :  { %7566 = vmatpush1.bf16.msra.mxu1 %v7565_v58  ;;  %7504 = vmatprep.subr.bf16.mxu0 %v7503_v63  ;;  %v7585_v58 = vpack.c.bf16 %v4330_v23, %v4326_v36  ;;  %v7523_v63 = vpack.c.bf16 %v4337_v45, %v4333_v1  ;;  %v7601_v48 = vpack.c.bf16 %v4362_v47, %v4358_v42  ;;  %v4530_v4 = vld [vmem:[#allocation7 + $0x10] sm:$0xff]  ;;  %v4541_v23 = vld [vmem:[#allocation7 + $0x68] sm:$0xff]  ;;  %v4539_v1 = vld [vmem:[#allocation7 + $0x58] sm:$0xff] }
 0x92f   :  { %7568 = vmatprep.subr.bf16.mxu1 %v7567_v53  ;;  %4082 = vmatprep.mubr.f32.mxu0 %v11158_v49  ;;  %v7587_v53 = vpack.c.bf16 %v4339_v38, %v4335_v43  ;;  %v10272_v8 = vpack.c.bf16 %v4535_v40, %v4531_v51  ;;  %v4534_v36 = vld [vmem:[#allocation7 + $0x30] sm:$0xff]  ;;  %v4543_v45 = vld [vmem:[#allocation7 + $0x78] sm:$0xff]  ;;  %v4569_v42 = vld [vmem:[#allocation7 + $0x148] sm:$0xff] }
 0x930   :  { %4083 = vmatmul.mubr.f32.gmra.mrb[78].mxu0 %v10231_v3  ;;  %4195 = vmatprep.mubr.f32.mxu1 %v11158_v49  ;;  %v10277_v38 = vpack.c.bf16 %v4534_v36, %v4530_v4  ;;  %v4538_v32 = vld [vmem:[#allocation7 + $0x50] sm:$0xff]  ;;  %v10282_v30 = vpack.c.bf16 %v4543_v45, %v4539_v1  ;;  %v4571_v47 = vld [vmem:[#allocation7 + $0x158] sm:$0xff]  ;;  %v4577_v36 = vld [vmem:[#allocation7 + $0x188] sm:$0xff] }
 0x931   :  { %7506 = vmatpush1.bf16.msra.mxu0 %v7505_v28  ;;  %4196 = vmatmul.mubr.f32.gmra.mrb[86].mxu1 %v10231_v3  ;;  %v7589_v28 = vpack.c.bf16 %v4338_v55, %v4334_v46  ;;  %v4542_v46 = vld [vmem:[#allocation7 + $0x70] sm:$0xff]  ;;  %v4549_v55 = vld [vmem:[#allocation7 + $0xa8] sm:$0xff]  ;;  %v4583_v1 = vld [vmem:[#allocation7 + $0x1b8] sm:$0xff] }
 0x932   :  { %7570 = vmatpush1.bf16.msra.mxu1 %v7569_v10  ;;  %7508 = vmatprep.subr.bf16.mxu0 %v7507_v29  ;;  %v7527_v10 = vpack.c.bf16 %v4345_v50, %v4341_v5  ;;  %v4340_v29 = vld [vmem:[#allocation6 + $0x340] sm:$0xff]  ;;  %v4547_v5 = vld [vmem:[#allocation7 + $0x98] sm:$0xff]  ;;  %v10291_v35 = vpack.c.bf16 %v4542_v46, %v4538_v32  ;;  %v4574_v4 = vld [vmem:[#allocation7 + $0x170] sm:$0xff] }
 0x933   :  { %7572 = vmatprep.subr.bf16.mxu1 %v7571_v2  ;;  %4450 = vmatprep.mubr.f32.mxu0 %v11158_v49  ;;  %v4346_v2 = vld [vmem:[#allocation6 + $0x370] sm:$0xff]  ;;  %v7529_v0 = vpack.c.bf16 %v4344_v11, %v4340_v29  ;;  %v4551_v50 = vld [vmem:[#allocation7 + $0xb8] sm:$0xff]  ;;  %v4576_v32 = vld [vmem:[#allocation7 + $0x180] sm:$0xff] }
 0x934   :  { %4521 = vmatprep.mubr.f32.mxu1 %v11158_v49  ;;  %v4355_v49 = vld [vmem:[#allocation6 + $0x3b8] sm:$0xff]  ;;  %v7593_v6 = vpack.c.bf16 %v4346_v2, %v4342_v9  ;;  %v4546_v29 = vld [vmem:[#allocation7 + $0x90] sm:$0xff]  ;;  %v10296_v11 = vpack.c.bf16 %v4551_v50, %v4547_v5  ;;  %v4553_v9 = vld [vmem:[#allocation7 + $0xc8] sm:$0xff] }
 0x935   :  { %7510 = vmatpush1.bf16.msra.mxu0 %v7509_v31  ;;  %v7531_v31 = vpack.c.bf16 %v4353_v7, %v4349_v37  ;;  %v7595_v34 = vpack.c.bf16 %v4355_v49, %v4351_v54  ;;  %v4555_v2 = vld [vmem:[#allocation7 + $0xd8] sm:$0xff]  ;;  %v4580_v46 = vld [vmem:[#allocation7 + $0x1a0] sm:$0xff]  ;;  %v4582_v5 = vld [vmem:[#allocation7 + $0x1b0] sm:$0xff] }
 0x936   :  { %7574 = vmatpush1.bf16.msra.mxu1 %v7573_v15  ;;  %7512 = vmatprep.subr.bf16.mxu0 %v7511_v25  ;;  %v4348_v15 = vld [vmem:[#allocation6 + $0x380] sm:$0xff]  ;;  %v4559_v37 = vld [vmem:[#allocation7 + $0xf8] sm:$0xff]  ;;  %v4585_v50 = vld [vmem:[#allocation7 + $0x1c8] sm:$0xff] }
 0x937   :  { %7576 = vmatprep.subr.bf16.mxu1 %v7575_v57  ;;  %v4352_v25 = vld [vmem:[#allocation6 + $0x3a0] sm:$0xff]  ;;  %v4357_v57 = vld [vmem:[#allocation6 + $0x3c8] sm:$0xff] }
 0x938   :  { %v7533_v26 = vpack.c.bf16 %v4352_v25, %v4348_v15  ;;  %v10310_v15 = vpack.c.bf16 %v4559_v37, %v4555_v2  ;;  %v4558_v25 = vld [vmem:[#allocation7 + $0xf0] sm:$0xff]  ;;  %v4584_v2 = vld [vmem:[#allocation7 + $0x1c0] sm:$0xff] }
 0x939   :  { %7514 = vmatpush1.bf16.msra.mxu0 %v7513_v59  ;;  %v7535_v59 = vpack.c.bf16 %v4361_v60, %v4357_v57  ;;  %v4567_v57 = vld [vmem:[#allocation7 + $0x138] sm:$0xff]  ;;  %v4588_v37 = vld [vmem:[#allocation7 + $0x1e0] sm:$0xff] }
 0x93a   :  { %7578 = vmatpush1.bf16.msra.mxu1 %v7577_v12  ;;  %7516 = vmatprep.subr.bf16.mxu0 %v7515_v21  ;;  %v4356_v12 = vld [vmem:[#allocation6 + $0x3c0] sm:$0xff] }
 0x93b   :  { %7580 = vmatprep.subr.bf16.mxu1 %v7579_v16  ;;  %v4360_v21 = vld [vmem:[#allocation6 + $0x3e0] sm:$0xff]  ;;  %v4529_v16 = vld [vmem:[#allocation7 + $0x8] sm:$0xff] }
 0x93c   :  { %v7537_v13 = vpack.c.bf16 %v4360_v21, %v4356_v12  ;;  %v10322_v12 = vpack.c.bf16 %v4567_v57, %v4563_v44  ;;  %v4566_v21 = vld [vmem:[#allocation7 + $0x130] sm:$0xff]  ;;  %v11159_v44 = vld [vmem:[#allocation64_spill] sm:$0xff] }
 0x93d   :  { %7518 = vmatpush1.bf16.msra.mxu0 %v7517_v52  ;;  %v10270_v52 = vpack.c.bf16 %v4533_v33, %v4529_v16  ;;  %v4575_v16 = vld [vmem:[#allocation7 + $0x178] sm:$0xff] }
 0x93e   :  { %7582 = vmatpush1.bf16.msra.mxu1 %v7581_v39  ;;  %7520 = vmatprep.subr.bf16.mxu0 %v7519_v19  ;;  %v4528_v39 = vld [vmem:[#allocation7] sm:$0xff] }
 0x93f   :  { %7584 = vmatprep.subr.bf16.mxu1 %v7583_v56  ;;  %v4532_v19 = vld [vmem:[#allocation7 + $0x20] sm:$0xff]  ;;  %v4537_v56 = vld [vmem:[#allocation7 + $0x48] sm:$0xff] }
 0x940   :  { %v10274_v43 = vpack.c.bf16 %v4532_v19, %v4528_v39  ;;  %v4570_v39 = vld [vmem:[#allocation7 + $0x150] sm:$0xff]  ;;  %v10334_v19 = vpack.c.bf16 %v4575_v16, %v4571_v47 }
 0x941   :  { %7522 = vmatpush1.bf16.msra.mxu0 %v7521_v20  ;;  %v10279_v20 = vpack.c.bf16 %v4541_v23, %v4537_v56  ;;  %v4581_v56 = vld [vmem:[#allocation7 + $0x1a8] sm:$0xff]  ;;  %v4579_v23 = vld [vmem:[#allocation7 + $0x198] sm:$0xff] }
 0x942   :  { %7586 = vmatpush1.bf16.msra.mxu1 %v7585_v58  ;;  %7524 = vmatprep.subr.bf16.mxu0 %v7523_v63  ;;  %v4536_v58 = vld [vmem:[#allocation7 + $0x40] sm:$0xff] }
 0x943   :  { %7588 = vmatprep.subr.bf16.mxu1 %v7587_v53  ;;  %v4540_v63 = vld [vmem:[#allocation7 + $0x60] sm:$0xff]  ;;  %v4545_v53 = vld [vmem:[#allocation7 + $0x88] sm:$0xff] }
 0x944   :  { %v10287_v27 = vpack.c.bf16 %v4540_v63, %v4536_v58  ;;  %v10341_v58 = vpack.c.bf16 %v4574_v4, %v4570_v39  ;;  %v10343_v63 = vpack.c.bf16 %v4581_v56, %v4577_v36  ;;  %v11162_v56 = vld [vmem:[#allocation68_spill] sm:$0xff] }
 0x945   :  { %7526 = vmatpush1.bf16.msra.mxu0 %v7525_v22  ;;  %v10293_v22 = vpack.c.bf16 %v4549_v55, %v4545_v53  ;;  %v4578_v53 = vld [vmem:[#allocation7 + $0x190] sm:$0xff]  ;;  %v10346_v55 = vpack.c.bf16 %v4583_v1, %v4579_v23 }
 0x946   :  { %7590 = vmatpush1.bf16.msra.mxu1 %v7589_v28  ;;  %7528 = vmatprep.subr.bf16.mxu0 %v7527_v10  ;;  %v4544_v28 = vld [vmem:[#allocation7 + $0x80] sm:$0xff] }
 0x947   :  { %7592 = vmatprep.subr.bf16.mxu1 %v7591_v62  ;;  %v4548_v10 = vld [vmem:[#allocation7 + $0xa0] sm:$0xff]  ;;  %v4557_v62 = vld [vmem:[#allocation7 + $0xe8] sm:$0xff] }
 0x948   :  { %v10301_v7 = vpack.c.bf16 %v4548_v10, %v4544_v28  ;;  %v10307_v49 = vpack.c.bf16 %v4557_v62, %v4553_v9  ;;  %v4589_v28 = vld [vmem:[#allocation7 + $0x1e8] sm:$0xff]  ;;  %v4587_v10 = vld [vmem:[#allocation7 + $0x1d8] sm:$0xff]  ;;  %v10353_v9 = vpack.c.bf16 %v4582_v5, %v4578_v53 }
 0x949   :  { %7530 = vmatpush1.bf16.msra.mxu0 %v7529_v0  ;;  %v4552_v0 = vld [vmem:[#allocation7 + $0xc0] sm:$0xff]  ;;  %v10355_v62 = vpack.c.bf16 %v4589_v28, %v4585_v50 }
 0x94a   :  { %7594 = vmatpush1.bf16.msra.mxu1 %v7593_v6  ;;  %7532 = vmatprep.subr.bf16.mxu0 %v7531_v31  ;;  %v4556_v6 = vld [vmem:[#allocation7 + $0xe0] sm:$0xff]  ;;  %v4554_v31 = vld [vmem:[#allocation7 + $0xd0] sm:$0xff] }
 0x94b   :  { %7596 = vmatprep.subr.bf16.mxu1 %v7595_v34  ;;  %v4565_v34 = vld [vmem:[#allocation7 + $0x128] sm:$0xff]  ;;  %v10313_v60 = vpack.c.bf16 %v4556_v6, %v4552_v0  ;;  %v10317_v14 = vpack.c.bf16 %v4558_v25, %v4554_v31  ;;  %v4586_v6 = vld [vmem:[#allocation7 + $0x1d0] sm:$0xff]  ;;  %v10361_v25 = vpack.c.bf16 %v4588_v37, %v4584_v2 }
 0x94c   :  { %v10319_v24 = vpack.c.bf16 %v4565_v34, %v4561_v17  ;;  %v4590_v31 = vld [vmem:[#allocation7 + $0x1f0] sm:$0xff]  ;;  %v4364_v34 = vld [vmem:[%s10814_s8] sm:$0xf] }
 0x94d   :  { %7534 = vmatpush1.bf16.msra.mxu0 %v7533_v26  ;;  %v4560_v26 = vld [vmem:[#allocation7 + $0x100] sm:$0xff]  ;;  %v10365_v17 = vpack.c.bf16 %v4590_v31, %v4586_v6  ;;  %v4369_v57 = vrot.slane %v4364_v34, %v11159_v44  ;;  %v4381_v23 = vrot.slane %v4364_v34, %v11162_v56 }
 0x94e   :  { %7598 = vmatpush1.bf16.msra.mxu1 %v7597_v41  ;;  %7536 = vmatprep.subr.bf16.mxu0 %v7535_v59  ;;  %v4564_v41 = vld [vmem:[#allocation7 + $0x120] sm:$0xff]  ;;  %v4562_v59 = vld [vmem:[#allocation7 + $0x110] sm:$0xff] }
 0x94f   :  { %7600 = vmatprep.subr.bf16.mxu1 %v7599_v61  ;;  %v4573_v61 = vld [vmem:[#allocation7 + $0x168] sm:$0xff]  ;;  %v10325_v33 = vpack.c.bf16 %v4564_v41, %v4560_v26  ;;  %v10329_v51 = vpack.c.bf16 %v4566_v21, %v4562_v59  ;;  %v11160_v26 = vld [vmem:[#allocation63_spill] sm:$0xff] }
 0x950   :  { %v10331_v40 = vpack.c.bf16 %v4573_v61, %v4569_v42  ;;  %v4373_v41 = vrot.slane %v4364_v34, %v11160_v26 }
 0x951   :  { %7538 = vmatpush1.bf16.msra.mxu0 %v7537_v13  ;;  %v4568_v13 = vld [vmem:[#allocation7 + $0x140] sm:$0xff] }
 0x952   :  { %7602 = vmatpush1.bf16.msra.mxu1 %v7601_v48  ;;  %7604 = vmatprep.subr.bf16.mxu0 %v10270_v52  ;;  %v4572_v48 = vld [vmem:[#allocation7 + $0x160] sm:$0xff] }
 0x953   :  { %7636 = vmatprep.subr.bf16.mxu1 %v10272_v8  ;;  %v10337_v45 = vpack.c.bf16 %v4572_v48, %v4568_v13  ;;  %v11161_v48 = vld [vmem:[#allocation67_spill] sm:$0xff] }
 0x954   :  { %4451 = vmatmul.mubr.f32.vlgmr.msra.gmra.mrb[80].mxu0 %v10231_v3  ;;  %v4377_v39 = vrot.slane %v4364_v34, %v11161_v48 }
 0x955   :  { %4522 = vmatmul.mubr.f32.vlgmr.msra.gmra.mrb[88].mxu1 %v10231_v3  ;;  %7606 = vmatpush1.bf16.msra.mxu0 %v10274_v43  ;;  %v4550_v3 = vld [vmem:[#allocation7 + $0xb0] sm:$0xff] }
 0x956   :  { %7638 = vmatpush1.bf16.msra.mxu1 %v10277_v38  ;;  %7608 = vmatprep.subr.bf16.mxu0 %v10279_v20  ;;  %v10305_v54 = vpack.c.bf16 %v4550_v3, %v4546_v29  ;;  %v4591_v29 = vld [vmem:[#allocation7 + $0x1f8] sm:$0xff]  ;;  %v10349_v3 = vpack.c.bf16 %v4580_v46, %v4576_v32 }
 0x957   :  { %7640 = vmatprep.subr.bf16.mxu1 %v10282_v30  ;;  %4660 = vmatprep.mubr.f32.mxu0 %v10948_v18  ;;  %v10358_v0 = vpack.c.bf16 %v4591_v29, %v4587_v10  ;;  %v3954_v29 = vld [vmem:[%s10813_s7] sm:$0xf] }
 0x958   :  { %4731 = vmatprep.mubr.f32.mxu1 %v10948_v18  ;;  %v10419_v34 = vrot.slane %v3954_v29, %v11159_v44 }
 0x959   :  { %7610 = vmatpush1.bf16.msra.mxu0 %v10287_v27 }
 0x95a   :  { %7642 = vmatpush1.bf16.msra.mxu1 %v10291_v35  ;;  %7612 = vmatprep.subr.bf16.mxu0 %v10293_v22 }
 0x95b   :  { %7644 = vmatprep.subr.bf16.mxu1 %v10296_v11 }
 0x95d   :  { %7614 = vmatpush1.bf16.msra.mxu0 %v10301_v7 }
 0x95e   :  { %7646 = vmatpush1.bf16.msra.mxu1 %v10305_v54  ;;  %7616 = vmatprep.subr.bf16.mxu0 %v10307_v49 }
 0x95f   :  { %7648 = vmatprep.subr.bf16.mxu1 %v10310_v15 }
 0x961   :  { %7618 = vmatpush1.bf16.msra.mxu0 %v10313_v60 }
 0x962   :  { %7650 = vmatpush1.bf16.msra.mxu1 %v10317_v14  ;;  %7620 = vmatprep.subr.bf16.mxu0 %v10319_v24 }
 0x963   :  { %7652 = vmatprep.subr.bf16.mxu1 %v10322_v12 }
 0x965   :  { %7622 = vmatpush1.bf16.msra.mxu0 %v10325_v33 }
 0x966   :  { %7654 = vmatpush1.bf16.msra.mxu1 %v10329_v51  ;;  %7624 = vmatprep.subr.bf16.mxu0 %v10331_v40 }
 0x967   :  { %7656 = vmatprep.subr.bf16.mxu1 %v10334_v19 }
 0x969   :  { %7626 = vmatpush1.bf16.msra.mxu0 %v10337_v45 }
 0x96a   :  { %7658 = vmatpush1.bf16.msra.mxu1 %v10341_v58  ;;  %7628 = vmatprep.subr.bf16.mxu0 %v10343_v63 }
 0x96b   :  { %7660 = vmatprep.subr.bf16.mxu1 %v10346_v55 }
 0x96d   :  { %7630 = vmatpush1.bf16.msra.mxu0 %v10349_v3 }
 0x96e   :  { %7662 = vmatpush1.bf16.msra.mxu1 %v10353_v9  ;;  %7632 = vmatprep.subr.bf16.mxu0 %v10355_v62 }
 0x96f   :  { %7664 = vmatprep.subr.bf16.mxu1 %v10358_v0 }
 0x971   :  { %7634 = vmatpush1.bf16.msra.mxu0 %v10361_v25 }
 0x972   :  { %7666 = vmatpush1.bf16.msra.mxu1 %v10365_v17  ;;  %7668 = vmatprep.subr.bf16.mxu0 %v10270_v52 }
 0x973   :  { %7700 = vmatprep.subr.bf16.mxu1 %v10272_v8 }
 0x974   :  { %4661 = vmatmul.mubr.f32.vlgmr.msra.gmra.mrb[64].mxu0 %v10948_v18 }
 0x975   :  { %4732 = vmatmul.mubr.f32.vlgmr.msra.gmra.mrb[72].mxu1 %v10948_v18  ;;  %7670 = vmatpush1.bf16.msra.mxu0 %v10274_v43 }
 0x976   :  { %7702 = vmatpush1.bf16.msra.mxu1 %v10277_v38  ;;  %7672 = vmatprep.subr.bf16.mxu0 %v10279_v20 }
 0x977   :  { %7704 = vmatprep.subr.bf16.mxu1 %v10282_v30  ;;  %4831 = vmatprep.mubr.f32.mxu0 %v10948_v18 }
 0x978   :  { %4902 = vmatprep.mubr.f32.mxu1 %v10948_v18 }
 0x979   :  { %7674 = vmatpush1.bf16.msra.mxu0 %v10287_v27 }
 0x97a   :  { %7706 = vmatpush1.bf16.msra.mxu1 %v10291_v35  ;;  %7676 = vmatprep.subr.bf16.mxu0 %v10293_v22 }
 0x97b   :  { %7708 = vmatprep.subr.bf16.mxu1 %v10296_v11 }
 0x97d   :  { %7678 = vmatpush1.bf16.msra.mxu0 %v10301_v7 }
 0x97e   :  { %7710 = vmatpush1.bf16.msra.mxu1 %v10305_v54  ;;  %7680 = vmatprep.subr.bf16.mxu0 %v10307_v49 }
 0x97f   :  { %7712 = vmatprep.subr.bf16.mxu1 %v10310_v15 }
 0x981   :  { %7682 = vmatpush1.bf16.msra.mxu0 %v10313_v60 }
 0x982   :  { %7714 = vmatpush1.bf16.msra.mxu1 %v10317_v14  ;;  %7684 = vmatprep.subr.bf16.mxu0 %v10319_v24 }
 0x983   :  { %7716 = vmatprep.subr.bf16.mxu1 %v10322_v12 }
 0x985   :  { %7686 = vmatpush1.bf16.msra.mxu0 %v10325_v33 }
 0x986   :  { %7718 = vmatpush1.bf16.msra.mxu1 %v10329_v51  ;;  %7688 = vmatprep.subr.bf16.mxu0 %v10331_v40 }
 0x987   :  { %7720 = vmatprep.subr.bf16.mxu1 %v10334_v19 }
 0x989   :  { %7690 = vmatpush1.bf16.msra.mxu0 %v10337_v45 }
 0x98a   :  { %7722 = vmatpush1.bf16.msra.mxu1 %v10341_v58  ;;  %7692 = vmatprep.subr.bf16.mxu0 %v10343_v63 }
 0x98b   :  { %7724 = vmatprep.subr.bf16.mxu1 %v10346_v55 }
 0x98d   :  { %7694 = vmatpush1.bf16.msra.mxu0 %v10349_v3 }
 0x98e   :  { %7726 = vmatpush1.bf16.msra.mxu1 %v10353_v9  ;;  %7696 = vmatprep.subr.bf16.mxu0 %v10355_v62 }
 0x98f   :  { %7728 = vmatprep.subr.bf16.mxu1 %v10358_v0 }
 0x991   :  { %7698 = vmatpush1.bf16.msra.mxu0 %v10361_v25 }
 0x992   :  { %7730 = vmatpush1.bf16.msra.mxu1 %v10365_v17  ;;  %7732 = vmatprep.subr.bf16.mxu0 %v10270_v52 }
 0x993   :  { %7764 = vmatprep.subr.bf16.mxu1 %v10272_v8 }
 0xa27   :  { %v4452_v59 = vpop.f32.mrb[80].mxu0 }
 0xa28   :  { %v4453_v21 = vadd.f32 %v4452_v59, %v4369_v57  ;;  %v4454_v42 = vpop.f32.mrb[81].mxu0  ;;  %v4523_v61 = vpop.f32.mrb[88].mxu1 }
 0xa29   :  { %v4455_v47 = vadd.f32 %v4454_v42, %v4373_v41  ;;  %v4525_v16 = vpop.f32.mrb[89].mxu1  ;;  %v4524_v36 = vadd.f32 %v4523_v61, %v4377_v39  ;;  %v10422_v41 = vrot.slane %v3954_v29, %v11160_v26 }
 0xa2a   :  { %v6241_v13 = vmul.f32 -1.442695, %v4453_v21  ;;  %v4526_v32 = vadd.f32 %v4525_v16, %v4381_v23 }
 0xa2b   :  { %v6242_v4 = vmul.f32 -1.442695, %v4455_v47  ;;  %v6243_v1 = vmul.f32 -1.442695, %v4524_v36  ;;  %v10431_v36 = vrot.slane %v3954_v29, %v11162_v56 }
 0xa2c   :  { %8608 = vpow2.f32 %v6241_v13 }
 0xa2d   :  { %8610 = vpow2.f32 %v6242_v4  ;;  %v10427_v4 = vrot.slane %v3954_v29, %v11161_v48 }
 0xa2e   :  { %8612 = vpow2.f32 %v6243_v1 }
 0xa2f   :  { %8614 = vtanh.f32 %v4526_v32 }
 0xa36   :  { %v8609_v46 = vpop.eup %8608 }
 0xa37   :  { %v8611_v53 = vpop.eup %8610  ;;  %v5968_v5 = vadd.f32 1.0, %v8609_v46 }
 0xa38   :  { %v5969_v50 = vadd.f32 1.0, %v8611_v53  ;;  %v8613_v28 = vpop.eup %8612 }
 0xa39   :  { %8616 = vrcp.f32 %v5968_v5  ;;  %v8615_v10 = vpop.eup %8614  ;;  %v5970_v37 = vadd.f32 1.0, %v8613_v28 }
 0xa3a   :  { %8618 = vrcp.f32 %v5969_v50 }
 0xa3b   :  { %8620 = vrcp.f32 %v5970_v37 }
 0xa43   :  { %v8617_v2 = vpop.eup %8616 }
 0xa44   :  { %v8619_v6 = vpop.eup %8618  ;;  %v5979_v31 = vmul.f32 %v8617_v2, %v8615_v10 }
 0xa45   :  { %v5978_v57 = vmul.f32 0.0, %v8619_v6  ;;  %v8621_v23 = vpop.eup %8620 }
 0xa47   :  { %v5980_v59 = vadd.f32 %v5979_v31, %v5978_v57  ;;  %v4662_v21 = vpop.f32.mrb[64].mxu0 }
 0xa48   :  { %v8223_v42 = vadd.f32 %v4662_v21, %v10419_v34  ;;  %v4733_v61 = vpop.f32.mrb[72].mxu1  ;;  %v4664_v47 = vpop.f32.mrb[65].mxu0 }
 0xa49   :  { %8622 = vtanh.f32 %v5980_v59  ;;  %v8224_v16 = vadd.f32 %v4664_v47, %v10422_v41  ;;  %v4735_v13 = vpop.f32.mrb[73].mxu1  ;;  %v8239_v26 = vadd.f32 %v4733_v61, %v10427_v4 }
 0xa4a   :  { %v6217_v39 = vmul.f32 -1.442695, %v8223_v42  ;;  %v8240_v46 = vadd.f32 %v4735_v13, %v10431_v36 }
 0xa4b   :  { %v6218_v44 = vmul.f32 -1.442695, %v8224_v16  ;;  %v6219_v32 = vmul.f32 -1.442695, %v8239_v26 }
 0xa4c   :  { %8624 = vpow2.f32 %v6217_v39 }
 0xa4d   :  { %8626 = vpow2.f32 %v6218_v44 }
 0xa4e   :  { %8628 = vpow2.f32 %v6219_v32 }
 0xa4f   :  { %8630 = vtanh.f32 %v8240_v46 }
 0xa53   :  { %v8623_v1 = vpop.eup %8622 }
 0xa54   :  { %v10434_v53 = vmul.f32 %v8623_v1, %v8621_v23 }
 0xa56   :  { %v8625_v5 = vpop.eup %8624 }
 0xa57   :  { %v4747_v50 = vadd.f32 1.0, %v8625_v5  ;;  %v8627_v48 = vpop.eup %8626 }
 0xa58   :  { %v4748_v28 = vadd.f32 1.0, %v8627_v48  ;;  %v8629_v10 = vpop.eup %8628 }
 0xa59   :  { %8632 = vrcp.f32 %v4747_v50  ;;  %v8631_v2 = vpop.eup %8630  ;;  %v4749_v6 = vadd.f32 1.0, %v8629_v10 }
 0xa5a   :  { %8634 = vrcp.f32 %v4748_v28 }
 0xa5b   :  { %8636 = vrcp.f32 %v4749_v6 }
 0xa63   :  { %v8633_v37 = vpop.eup %8632 }
 0xa64   :  { %v4758_v56 = vmul.f32 %v8633_v37, %v8631_v2  ;;  %v8635_v29 = vpop.eup %8634 }
 0xa65   :  { %v4757_v31 = vmul.f32 0.0, %v8635_v29  ;;  %v8637_v59 = vpop.eup %8636 }
 0xa67   :  { %v10436_v57 = vadd.f32 %v4758_v56, %v4757_v31 }
 0xa69   :  { %8638 = vtanh.f32 %v10436_v57 }
 0xa73   :  { %v8639_v21 = vpop.eup %8638 }
 0xa74   :  { %v4761_v42 = vmul.f32 %v8639_v21, %v8637_v59 }
 0xa76   :  { %4832 = vmatmul.mubr.f32.vlgmr.msra.gmra.mrb[66].mxu0 %v4761_v42  ;;  %4903 = vmatmul.mubr.f32.vlgmr.msra.gmra.mrb[74].mxu1 %v4761_v42 }
 0xa77   :  { %7734 = vmatpush1.bf16.msra.mxu0 %v10274_v43  ;;  %7766 = vmatpush1.bf16.msra.mxu1 %v10277_v38 }
 0xa78   :  { %7736 = vmatprep.subr.bf16.mxu0 %v10279_v20  ;;  %7768 = vmatprep.subr.bf16.mxu1 %v10282_v30 }
 0xa79   :  { %5002 = vmatprep.mubr.f32.mxu0 %v10948_v18  ;;  %5073 = vmatprep.mubr.f32.mxu1 %v10948_v18 }
 0xa7b   :  { %7738 = vmatpush1.bf16.msra.mxu0 %v10287_v27  ;;  %7770 = vmatpush1.bf16.msra.mxu1 %v10291_v35 }
 0xa7c   :  { %7740 = vmatprep.subr.bf16.mxu0 %v10293_v22  ;;  %7772 = vmatprep.subr.bf16.mxu1 %v10296_v11 }
 0xa7f   :  { %7742 = vmatpush1.bf16.msra.mxu0 %v10301_v7  ;;  %7774 = vmatpush1.bf16.msra.mxu1 %v10305_v54 }
 0xa80   :  { %7744 = vmatprep.subr.bf16.mxu0 %v10307_v49  ;;  %7776 = vmatprep.subr.bf16.mxu1 %v10310_v15 }
 0xa83   :  { %7746 = vmatpush1.bf16.msra.mxu0 %v10313_v60  ;;  %7778 = vmatpush1.bf16.msra.mxu1 %v10317_v14 }
 0xa84   :  { %7748 = vmatprep.subr.bf16.mxu0 %v10319_v24  ;;  %7780 = vmatprep.subr.bf16.mxu1 %v10322_v12 }
 0xa87   :  { %7750 = vmatpush1.bf16.msra.mxu0 %v10325_v33  ;;  %7782 = vmatpush1.bf16.msra.mxu1 %v10329_v51 }
 0xa88   :  { %7752 = vmatprep.subr.bf16.mxu0 %v10331_v40  ;;  %7784 = vmatprep.subr.bf16.mxu1 %v10334_v19 }
 0xa8b   :  { %7754 = vmatpush1.bf16.msra.mxu0 %v10337_v45  ;;  %7786 = vmatpush1.bf16.msra.mxu1 %v10341_v58 }
 0xa8c   :  { %7756 = vmatprep.subr.bf16.mxu0 %v10343_v63  ;;  %7788 = vmatprep.subr.bf16.mxu1 %v10346_v55 }
 0xa8f   :  { %7758 = vmatpush1.bf16.msra.mxu0 %v10349_v3  ;;  %7790 = vmatpush1.bf16.msra.mxu1 %v10353_v9 }
 0xa90   :  { %7760 = vmatprep.subr.bf16.mxu0 %v10355_v62  ;;  %7792 = vmatprep.subr.bf16.mxu1 %v10358_v0 }
 0xa93   :  { %7762 = vmatpush1.bf16.msra.mxu0 %v10361_v25  ;;  %7794 = vmatpush1.bf16.msra.mxu1 %v10365_v17 }
 0xa94   :  { %7796 = vmatprep.subr.bf16.mxu0 %v10270_v52  ;;  %7828 = vmatprep.subr.bf16.mxu1 %v10272_v8 }
 0xb49   :  { %v4833_v61 = vpop.f32.mrb[66].mxu0  ;;  %v4904_v47 = vpop.f32.mrb[74].mxu1 }
 0xb4a   :  { %v8225_v16 = vadd.f32 %v4833_v61, %v10419_v34  ;;  %v4835_v13 = vpop.f32.mrb[67].mxu0  ;;  %v4906_v39 = vpop.f32.mrb[75].mxu1  ;;  %v8241_v1 = vadd.f32 %v4904_v47, %v10427_v4 }
 0xb4b   :  { %v8226_v44 = vadd.f32 %v4835_v13, %v10422_v41  ;;  %v8242_v32 = vadd.f32 %v4906_v39, %v10431_v36 }
 0xb4c   :  { %v6220_v26 = vmul.f32 -1.442695, %v8225_v16  ;;  %v6222_v46 = vmul.f32 -1.442695, %v8241_v1 }
 0xb4d   :  { %v6221_v23 = vmul.f32 -1.442695, %v8226_v44 }
 0xb4e   :  { %8640 = vpow2.f32 %v6220_v26 }
 0xb4f   :  { %8642 = vpow2.f32 %v6221_v23 }
 0xb50   :  { %8644 = vtanh.f32 %v8242_v32 }
 0xb51   :  { %8646 = vpow2.f32 %v6222_v46 }
 0xb58   :  { %v8641_v5 = vpop.eup %8640 }
 0xb59   :  { %v4918_v50 = vadd.f32 1.0, %v8641_v5  ;;  %v8643_v48 = vpop.eup %8642 }
 0xb5a   :  { %v4919_v28 = vadd.f32 1.0, %v8643_v48  ;;  %v8645_v10 = vpop.eup %8644 }
 0xb5b   :  { %8648 = vrcp.f32 %v4918_v50  ;;  %v8647_v2 = vpop.eup %8646 }
 0xb5c   :  { %8650 = vrcp.f32 %v4919_v28  ;;  %v4920_v6 = vadd.f32 1.0, %v8647_v2 }
 0xb5e   :  { %8652 = vrcp.f32 %v4920_v6 }
 0xb65   :  { %v8649_v37 = vpop.eup %8648 }
 0xb66   :  { %v4929_v56 = vmul.f32 %v8649_v37, %v8645_v10  ;;  %v8651_v29 = vpop.eup %8650 }
 0xb67   :  { %v4928_v31 = vmul.f32 %v8651_v29, %v10436_v57 }
 0xb68   :  { %v8653_v21 = vpop.eup %8652 }
 0xb69   :  { %v10478_v59 = vadd.f32 %v4929_v56, %v4928_v31 }
 0xb6b   :  { %8654 = vtanh.f32 %v10478_v59 }
 0xb75   :  { %v8655_v42 = vpop.eup %8654 }
 0xb76   :  { %v4932_v61 = vmul.f32 %v8655_v42, %v8653_v21 }
 0xb78   :  { %5003 = vmatmul.mubr.f32.vlgmr.msra.gmra.mrb[68].mxu0 %v4932_v61  ;;  %5074 = vmatmul.mubr.f32.vlgmr.msra.gmra.mrb[76].mxu1 %v4932_v61 }
 0xb79   :  { %7798 = vmatpush1.bf16.msra.mxu0 %v10274_v43  ;;  %7830 = vmatpush1.bf16.msra.mxu1 %v10277_v38 }
 0xb7a   :  { %7800 = vmatprep.subr.bf16.mxu0 %v10279_v20  ;;  %7832 = vmatprep.subr.bf16.mxu1 %v10282_v30 }
 0xb7b   :  { %5173 = vmatprep.mubr.f32.mxu0 %v10948_v18  ;;  %5244 = vmatprep.mubr.f32.mxu1 %v10948_v18 }
 0xb7d   :  { %7802 = vmatpush1.bf16.msra.mxu0 %v10287_v27  ;;  %7834 = vmatpush1.bf16.msra.mxu1 %v10291_v35 }
 0xb7e   :  { %7804 = vmatprep.subr.bf16.mxu0 %v10293_v22  ;;  %7836 = vmatprep.subr.bf16.mxu1 %v10296_v11 }
 0xb81   :  { %7806 = vmatpush1.bf16.msra.mxu0 %v10301_v7  ;;  %7838 = vmatpush1.bf16.msra.mxu1 %v10305_v54 }
 0xb82   :  { %7808 = vmatprep.subr.bf16.mxu0 %v10307_v49  ;;  %7840 = vmatprep.subr.bf16.mxu1 %v10310_v15 }
 0xb85   :  { %7810 = vmatpush1.bf16.msra.mxu0 %v10313_v60  ;;  %7842 = vmatpush1.bf16.msra.mxu1 %v10317_v14 }
 0xb86   :  { %7812 = vmatprep.subr.bf16.mxu0 %v10319_v24  ;;  %7844 = vmatprep.subr.bf16.mxu1 %v10322_v12 }
 0xb89   :  { %7814 = vmatpush1.bf16.msra.mxu0 %v10325_v33  ;;  %7846 = vmatpush1.bf16.msra.mxu1 %v10329_v51 }
 0xb8a   :  { %7816 = vmatprep.subr.bf16.mxu0 %v10331_v40  ;;  %7848 = vmatprep.subr.bf16.mxu1 %v10334_v19 }
 0xb8d   :  { %7818 = vmatpush1.bf16.msra.mxu0 %v10337_v45  ;;  %7850 = vmatpush1.bf16.msra.mxu1 %v10341_v58 }
 0xb8e   :  { %7820 = vmatprep.subr.bf16.mxu0 %v10343_v63  ;;  %7852 = vmatprep.subr.bf16.mxu1 %v10346_v55 }
 0xb91   :  { %7822 = vmatpush1.bf16.msra.mxu0 %v10349_v3  ;;  %7854 = vmatpush1.bf16.msra.mxu1 %v10353_v9 }
 0xb92   :  { %7824 = vmatprep.subr.bf16.mxu0 %v10355_v62  ;;  %7856 = vmatprep.subr.bf16.mxu1 %v10358_v0 }
 0xb95   :  { %7826 = vmatpush1.bf16.msra.mxu0 %v10361_v25  ;;  %7858 = vmatpush1.bf16.msra.mxu1 %v10365_v17 }
 0xb96   :  { %7860 = vmatprep.subr.bf16.mxu0 %v10270_v52  ;;  %7892 = vmatprep.subr.bf16.mxu1 %v10272_v8 }
 0xc4b   :  { %v5004_v57 = vpop.f32.mrb[68].mxu0  ;;  %v5075_v47 = vpop.f32.mrb[76].mxu1 }
 0xc4c   :  { %v8227_v16 = vadd.f32 %v5004_v57, %v10419_v34  ;;  %v5006_v13 = vpop.f32.mrb[69].mxu0  ;;  %v5077_v39 = vpop.f32.mrb[77].mxu1  ;;  %v8243_v1 = vadd.f32 %v5075_v47, %v10427_v4 }
 0xc4d   :  { %v8228_v44 = vadd.f32 %v5006_v13, %v10422_v41  ;;  %v8244_v32 = vadd.f32 %v5077_v39, %v10431_v36 }
 0xc4e   :  { %v6223_v26 = vmul.f32 -1.442695, %v8227_v16  ;;  %v6225_v46 = vmul.f32 -1.442695, %v8243_v1 }
 0xc4f   :  { %v6224_v23 = vmul.f32 -1.442695, %v8228_v44 }
 0xc50   :  { %8656 = vpow2.f32 %v6223_v26 }
 0xc51   :  { %8658 = vpow2.f32 %v6224_v23 }
 0xc52   :  { %8660 = vtanh.f32 %v8244_v32 }
 0xc53   :  { %8662 = vpow2.f32 %v6225_v46 }
 0xc5a   :  { %v8657_v5 = vpop.eup %8656 }
 0xc5b   :  { %v5089_v50 = vadd.f32 1.0, %v8657_v5  ;;  %v8659_v48 = vpop.eup %8658 }
 0xc5c   :  { %v5090_v28 = vadd.f32 1.0, %v8659_v48  ;;  %v8661_v10 = vpop.eup %8660 }
 0xc5d   :  { %8664 = vrcp.f32 %v5089_v50  ;;  %v8663_v2 = vpop.eup %8662 }
 0xc5e   :  { %8666 = vrcp.f32 %v5090_v28  ;;  %v5091_v6 = vadd.f32 1.0, %v8663_v2 }
 0xc60   :  { %8668 = vrcp.f32 %v5091_v6 }
 0xc67   :  { %v8665_v37 = vpop.eup %8664 }
 0xc68   :  { %v5100_v56 = vmul.f32 %v8665_v37, %v8661_v10  ;;  %v8667_v29 = vpop.eup %8666 }
 0xc69   :  { %v5099_v31 = vmul.f32 %v8667_v29, %v10478_v59 }
 0xc6a   :  { %v8669_v42 = vpop.eup %8668 }
 0xc6b   :  { %v10520_v21 = vadd.f32 %v5100_v56, %v5099_v31 }
 0xc6d   :  { %8670 = vtanh.f32 %v10520_v21 }
 0xc77   :  { %v8671_v61 = vpop.eup %8670 }
 0xc78   :  { %v5103_v57 = vmul.f32 %v8671_v61, %v8669_v42 }
 0xc7a   :  { %5174 = vmatmul.mubr.f32.vlgmr.msra.gmra.mrb[70].mxu0 %v5103_v57  ;;  %5245 = vmatmul.mubr.f32.vlgmr.msra.gmra.mrb[78].mxu1 %v5103_v57 }
 0xc7b   :  { %7862 = vmatpush1.bf16.msra.mxu0 %v10274_v43  ;;  %7894 = vmatpush1.bf16.msra.mxu1 %v10277_v38 }
 0xc7c   :  { %7864 = vmatprep.subr.bf16.mxu0 %v10279_v20  ;;  %7896 = vmatprep.subr.bf16.mxu1 %v10282_v30 }
 0xc7d   :  { %5344 = vmatprep.mubr.f32.mxu0 %v10948_v18  ;;  %5415 = vmatprep.mubr.f32.mxu1 %v10948_v18 }
 0xc7f   :  { %7866 = vmatpush1.bf16.msra.mxu0 %v10287_v27  ;;  %7898 = vmatpush1.bf16.msra.mxu1 %v10291_v35 }
 0xc80   :  { %7868 = vmatprep.subr.bf16.mxu0 %v10293_v22  ;;  %7900 = vmatprep.subr.bf16.mxu1 %v10296_v11 }
 0xc83   :  { %7870 = vmatpush1.bf16.msra.mxu0 %v10301_v7  ;;  %7902 = vmatpush1.bf16.msra.mxu1 %v10305_v54 }
 0xc84   :  { %7872 = vmatprep.subr.bf16.mxu0 %v10307_v49  ;;  %7904 = vmatprep.subr.bf16.mxu1 %v10310_v15 }
 0xc87   :  { %7874 = vmatpush1.bf16.msra.mxu0 %v10313_v60  ;;  %7906 = vmatpush1.bf16.msra.mxu1 %v10317_v14 }
 0xc88   :  { %7876 = vmatprep.subr.bf16.mxu0 %v10319_v24  ;;  %7908 = vmatprep.subr.bf16.mxu1 %v10322_v12 }
 0xc8b   :  { %7878 = vmatpush1.bf16.msra.mxu0 %v10325_v33  ;;  %7910 = vmatpush1.bf16.msra.mxu1 %v10329_v51 }
 0xc8c   :  { %7880 = vmatprep.subr.bf16.mxu0 %v10331_v40  ;;  %7912 = vmatprep.subr.bf16.mxu1 %v10334_v19 }
 0xc8f   :  { %7882 = vmatpush1.bf16.msra.mxu0 %v10337_v45  ;;  %7914 = vmatpush1.bf16.msra.mxu1 %v10341_v58 }
 0xc90   :  { %7884 = vmatprep.subr.bf16.mxu0 %v10343_v63  ;;  %7916 = vmatprep.subr.bf16.mxu1 %v10346_v55 }
 0xc93   :  { %7886 = vmatpush1.bf16.msra.mxu0 %v10349_v3  ;;  %7918 = vmatpush1.bf16.msra.mxu1 %v10353_v9 }
 0xc94   :  { %7888 = vmatprep.subr.bf16.mxu0 %v10355_v62  ;;  %7920 = vmatprep.subr.bf16.mxu1 %v10358_v0 }
 0xc97   :  { %7890 = vmatpush1.bf16.msra.mxu0 %v10361_v25  ;;  %7922 = vmatpush1.bf16.msra.mxu1 %v10365_v17 }
 0xc98   :  { %7924 = vmatprep.subr.bf16.mxu0 %v10270_v52  ;;  %7956 = vmatprep.subr.bf16.mxu1 %v10272_v8 }
 0xd4d   :  { %v5175_v59 = vpop.f32.mrb[70].mxu0  ;;  %v5246_v47 = vpop.f32.mrb[78].mxu1 }
 0xd4e   :  { %v8229_v16 = vadd.f32 %v5175_v59, %v10419_v34  ;;  %v5177_v13 = vpop.f32.mrb[71].mxu0  ;;  %v5248_v39 = vpop.f32.mrb[79].mxu1  ;;  %v8245_v1 = vadd.f32 %v5246_v47, %v10427_v4 }
 0xd4f   :  { %v8230_v44 = vadd.f32 %v5177_v13, %v10422_v41  ;;  %v8246_v32 = vadd.f32 %v5248_v39, %v10431_v36 }
 0xd50   :  { %v6226_v26 = vmul.f32 -1.442695, %v8229_v16  ;;  %v6228_v46 = vmul.f32 -1.442695, %v8245_v1 }
 0xd51   :  { %v6227_v23 = vmul.f32 -1.442695, %v8230_v44 }
 0xd52   :  { %8672 = vpow2.f32 %v6226_v26 }
 0xd53   :  { %8674 = vpow2.f32 %v6227_v23 }
 0xd54   :  { %8676 = vtanh.f32 %v8246_v32 }
 0xd55   :  { %8678 = vpow2.f32 %v6228_v46 }
 0xd5c   :  { %v8673_v5 = vpop.eup %8672 }
 0xd5d   :  { %v5260_v50 = vadd.f32 1.0, %v8673_v5  ;;  %v8675_v48 = vpop.eup %8674 }
 0xd5e   :  { %v5261_v28 = vadd.f32 1.0, %v8675_v48  ;;  %v8677_v10 = vpop.eup %8676 }
 0xd5f   :  { %8680 = vrcp.f32 %v5260_v50  ;;  %v8679_v2 = vpop.eup %8678 }
 0xd60   :  { %8682 = vrcp.f32 %v5261_v28  ;;  %v5262_v6 = vadd.f32 1.0, %v8679_v2 }
 0xd62   :  { %8684 = vrcp.f32 %v5262_v6 }
 0xd69   :  { %v8681_v37 = vpop.eup %8680 }
 0xd6a   :  { %v5271_v56 = vmul.f32 %v8681_v37, %v8677_v10  ;;  %v8683_v29 = vpop.eup %8682 }
 0xd6b   :  { %v5270_v31 = vmul.f32 %v8683_v29, %v10520_v21 }
 0xd6c   :  { %v8685_v61 = vpop.eup %8684 }
 0xd6d   :  { %v10562_v42 = vadd.f32 %v5271_v56, %v5270_v31 }
 0xd6f   :  { %8686 = vtanh.f32 %v10562_v42 }
 0xd79   :  { %v8687_v57 = vpop.eup %8686 }
 0xd7a   :  { %v5274_v59 = vmul.f32 %v8687_v57, %v8685_v61 }
 0xd7c   :  { %5345 = vmatmul.mubr.f32.vlgmr.msra.gmra.mrb[72].mxu0 %v5274_v59  ;;  %5416 = vmatmul.mubr.f32.vlgmr.msra.gmra.mrb[80].mxu1 %v5274_v59 }
 0xd7d   :  { %7926 = vmatpush1.bf16.msra.mxu0 %v10274_v43  ;;  %7958 = vmatpush1.bf16.msra.mxu1 %v10277_v38 }
 0xd7e   :  { %7928 = vmatprep.subr.bf16.mxu0 %v10279_v20  ;;  %7960 = vmatprep.subr.bf16.mxu1 %v10282_v30 }
 0xd7f   :  { %5515 = vmatprep.mubr.f32.mxu0 %v10948_v18  ;;  %5586 = vmatprep.mubr.f32.mxu1 %v10948_v18 }
 0xd81   :  { %7930 = vmatpush1.bf16.msra.mxu0 %v10287_v27  ;;  %7962 = vmatpush1.bf16.msra.mxu1 %v10291_v35 }
 0xd82   :  { %7932 = vmatprep.subr.bf16.mxu0 %v10293_v22  ;;  %7964 = vmatprep.subr.bf16.mxu1 %v10296_v11 }
 0xd85   :  { %7934 = vmatpush1.bf16.msra.mxu0 %v10301_v7  ;;  %7966 = vmatpush1.bf16.msra.mxu1 %v10305_v54 }
 0xd86   :  { %7936 = vmatprep.subr.bf16.mxu0 %v10307_v49  ;;  %7968 = vmatprep.subr.bf16.mxu1 %v10310_v15 }
 0xd89   :  { %7938 = vmatpush1.bf16.msra.mxu0 %v10313_v60  ;;  %7970 = vmatpush1.bf16.msra.mxu1 %v10317_v14 }
 0xd8a   :  { %7940 = vmatprep.subr.bf16.mxu0 %v10319_v24  ;;  %7972 = vmatprep.subr.bf16.mxu1 %v10322_v12 }
 0xd8d   :  { %7942 = vmatpush1.bf16.msra.mxu0 %v10325_v33  ;;  %7974 = vmatpush1.bf16.msra.mxu1 %v10329_v51 }
 0xd8e   :  { %7944 = vmatprep.subr.bf16.mxu0 %v10331_v40  ;;  %7976 = vmatprep.subr.bf16.mxu1 %v10334_v19 }
 0xd91   :  { %7946 = vmatpush1.bf16.msra.mxu0 %v10337_v45  ;;  %7978 = vmatpush1.bf16.msra.mxu1 %v10341_v58 }
 0xd92   :  { %7948 = vmatprep.subr.bf16.mxu0 %v10343_v63  ;;  %7980 = vmatprep.subr.bf16.mxu1 %v10346_v55 }
 0xd95   :  { %7950 = vmatpush1.bf16.msra.mxu0 %v10349_v3  ;;  %7982 = vmatpush1.bf16.msra.mxu1 %v10353_v9 }
 0xd96   :  { %7952 = vmatprep.subr.bf16.mxu0 %v10355_v62  ;;  %7984 = vmatprep.subr.bf16.mxu1 %v10358_v0 }
 0xd99   :  { %7954 = vmatpush1.bf16.msra.mxu0 %v10361_v25  ;;  %7986 = vmatpush1.bf16.msra.mxu1 %v10365_v17 }
 0xd9a   :  { %7988 = vmatprep.subr.bf16.mxu0 %v10270_v52  ;;  %8020 = vmatprep.subr.bf16.mxu1 %v10272_v8 }
 0xe4f   :  { %v5346_v21 = vpop.f32.mrb[72].mxu0  ;;  %v5417_v47 = vpop.f32.mrb[80].mxu1 }
 0xe50   :  { %v8231_v16 = vadd.f32 %v5346_v21, %v10419_v34  ;;  %v5348_v13 = vpop.f32.mrb[73].mxu0  ;;  %v5419_v39 = vpop.f32.mrb[81].mxu1  ;;  %v8247_v1 = vadd.f32 %v5417_v47, %v10427_v4 }
 0xe51   :  { %v8232_v44 = vadd.f32 %v5348_v13, %v10422_v41  ;;  %v8248_v32 = vadd.f32 %v5419_v39, %v10431_v36 }
 0xe52   :  { %v6229_v26 = vmul.f32 -1.442695, %v8231_v16  ;;  %v6231_v46 = vmul.f32 -1.442695, %v8247_v1 }
 0xe53   :  { %v6230_v23 = vmul.f32 -1.442695, %v8232_v44 }
 0xe54   :  { %8688 = vpow2.f32 %v6229_v26 }
 0xe55   :  { %8690 = vpow2.f32 %v6230_v23 }
 0xe56   :  { %8692 = vtanh.f32 %v8248_v32 }
 0xe57   :  { %8694 = vpow2.f32 %v6231_v46 }
 0xe5e   :  { %v8689_v5 = vpop.eup %8688 }
 0xe5f   :  { %v5431_v50 = vadd.f32 1.0, %v8689_v5  ;;  %v8691_v48 = vpop.eup %8690 }
 0xe60   :  { %v5432_v28 = vadd.f32 1.0, %v8691_v48  ;;  %v8693_v10 = vpop.eup %8692 }
 0xe61   :  { %8696 = vrcp.f32 %v5431_v50  ;;  %v8695_v2 = vpop.eup %8694 }
 0xe62   :  { %8698 = vrcp.f32 %v5432_v28  ;;  %v5433_v6 = vadd.f32 1.0, %v8695_v2 }
 0xe64   :  { %8700 = vrcp.f32 %v5433_v6 }
 0xe6b   :  { %v8697_v37 = vpop.eup %8696 }
 0xe6c   :  { %v5442_v56 = vmul.f32 %v8697_v37, %v8693_v10  ;;  %v8699_v29 = vpop.eup %8698 }
 0xe6d   :  { %v5441_v31 = vmul.f32 %v8699_v29, %v10562_v42 }
 0xe6e   :  { %v8701_v57 = vpop.eup %8700 }
 0xe6f   :  { %v10604_v61 = vadd.f32 %v5442_v56, %v5441_v31 }
 0xe71   :  { %8702 = vtanh.f32 %v10604_v61 }
 0xe7b   :  { %v8703_v59 = vpop.eup %8702 }
 0xe7c   :  { %v5445_v21 = vmul.f32 %v8703_v59, %v8701_v57 }
 0xe7e   :  { %5516 = vmatmul.mubr.f32.vlgmr.msra.gmra.mrb[74].mxu0 %v5445_v21  ;;  %5587 = vmatmul.mubr.f32.vlgmr.msra.gmra.mrb[82].mxu1 %v5445_v21  ;;  %v6002_v21 = vld [vmem:[%s10815_s9 + $0x98] sm:$0xff] }
 0xe7f   :  { %7990 = vmatpush1.bf16.msra.mxu0 %v10274_v43  ;;  %8022 = vmatpush1.bf16.msra.mxu1 %v10277_v38 }
 0xe80   :  { %7992 = vmatprep.subr.bf16.mxu0 %v10279_v20  ;;  %8024 = vmatprep.subr.bf16.mxu1 %v10282_v30 }
 0xe81   :  { %5686 = vmatprep.mubr.f32.mxu0 %v10948_v18  ;;  %5757 = vmatprep.mubr.f32.mxu1 %v10948_v18 }
 0xe83   :  { %7994 = vmatpush1.bf16.msra.mxu0 %v10287_v27  ;;  %8026 = vmatpush1.bf16.msra.mxu1 %v10291_v35 }
 0xe84   :  { %7996 = vmatprep.subr.bf16.mxu0 %v10293_v22  ;;  %8028 = vmatprep.subr.bf16.mxu1 %v10296_v11 }
 0xe87   :  { %7998 = vmatpush1.bf16.msra.mxu0 %v10301_v7  ;;  %8030 = vmatpush1.bf16.msra.mxu1 %v10305_v54 }
 0xe88   :  { %8000 = vmatprep.subr.bf16.mxu0 %v10307_v49  ;;  %8032 = vmatprep.subr.bf16.mxu1 %v10310_v15 }
 0xe8b   :  { %8002 = vmatpush1.bf16.msra.mxu0 %v10313_v60  ;;  %8034 = vmatpush1.bf16.msra.mxu1 %v10317_v14 }
 0xe8c   :  { %8004 = vmatprep.subr.bf16.mxu0 %v10319_v24  ;;  %8036 = vmatprep.subr.bf16.mxu1 %v10322_v12 }
 0xe8f   :  { %8006 = vmatpush1.bf16.msra.mxu0 %v10325_v33  ;;  %8038 = vmatpush1.bf16.msra.mxu1 %v10329_v51 }
 0xe90   :  { %8008 = vmatprep.subr.bf16.mxu0 %v10331_v40  ;;  %8040 = vmatprep.subr.bf16.mxu1 %v10334_v19 }
 0xe93   :  { %8010 = vmatpush1.bf16.msra.mxu0 %v10337_v45  ;;  %8042 = vmatpush1.bf16.msra.mxu1 %v10341_v58 }
 0xe94   :  { %8012 = vmatprep.subr.bf16.mxu0 %v10343_v63  ;;  %8044 = vmatprep.subr.bf16.mxu1 %v10346_v55 }
 0xe97   :  { %8014 = vmatpush1.bf16.msra.mxu0 %v10349_v3  ;;  %8046 = vmatpush1.bf16.msra.mxu1 %v10353_v9 }
 0xe98   :  { %8016 = vmatprep.subr.bf16.mxu0 %v10355_v62  ;;  %8048 = vmatprep.subr.bf16.mxu1 %v10358_v0 }
 0xe9b   :  { %8018 = vmatpush1.bf16.msra.mxu0 %v10361_v25  ;;  %8050 = vmatpush1.bf16.msra.mxu1 %v10365_v17 }
 0xe9c   :  { %8052 = vmatprep.subr.bf16.mxu0 %v10270_v52  ;;  %8084 = vmatprep.subr.bf16.mxu1 %v10272_v8 }
 0xf51   :  { %v5517_v42 = vpop.f32.mrb[74].mxu0  ;;  %v5588_v47 = vpop.f32.mrb[82].mxu1 }
 0xf52   :  { %v8233_v16 = vadd.f32 %v5517_v42, %v10419_v34  ;;  %v5519_v13 = vpop.f32.mrb[75].mxu0  ;;  %v5590_v39 = vpop.f32.mrb[83].mxu1  ;;  %v8249_v1 = vadd.f32 %v5588_v47, %v10427_v4  ;;  %v5985_v47 = vld [vmem:[%s10815_s9 + $0x10] sm:$0xff] }
 0xf53   :  { %v8234_v44 = vadd.f32 %v5519_v13, %v10422_v41  ;;  %v8250_v32 = vadd.f32 %v5590_v39, %v10431_v36  ;;  %v6003_v39 = vld [vmem:[%s10815_s9 + $0xa0] sm:$0xff] }
 0xf54   :  { %v6232_v26 = vmul.f32 -1.442695, %v8233_v16  ;;  %v6234_v46 = vmul.f32 -1.442695, %v8249_v1  ;;  %v5986_v16 = vld [vmem:[%s10815_s9 + $0x18] sm:$0xff]  ;;  %v5988_v1 = vld [vmem:[%s10815_s9 + $0x28] sm:$0xff] }
 0xf55   :  { %v6233_v23 = vmul.f32 -1.442695, %v8234_v44  ;;  %v8121_v13 = vpack.c.bf16 %v5986_v16, %v5985_v47  ;;  %v6004_v44 = vld [vmem:[%s10815_s9 + $0xa8] sm:$0xff] }
 0xf56   :  { %8704 = vpow2.f32 %v6232_v26  ;;  %v8123_v26 = vpack.c.bf16 %v6004_v44, %v6003_v39  ;;  %v6244_v39 = vld [vmem:[%s10816_s10] ss:$0 sm:$0xff] }
 0xf57   :  { %8706 = vpow2.f32 %v6233_v23  ;;  %v5987_v23 = vld [vmem:[%s10815_s9 + $0x20] sm:$0xff] }
 0xf58   :  { %8708 = vtanh.f32 %v8250_v32  ;;  %v8125_v32 = vpack.c.bf16 %v5988_v1, %v5987_v23 }
 0xf59   :  { %8710 = vpow2.f32 %v6234_v46  ;;  %v6005_v46 = vld [vmem:[%s10815_s9 + $0xb0] sm:$0xff] }
 0xf60   :  { %v8705_v52 = vpop.eup %8704 }
 0xf61   :  { %v5602_v5 = vadd.f32 1.0, %v8705_v52  ;;  %v8707_v8 = vpop.eup %8706  ;;  %v6006_v52 = vld [vmem:[%s10815_s9 + $0xb8] sm:$0xff] }
 0xf62   :  { %v5603_v50 = vadd.f32 1.0, %v8707_v8  ;;  %v8709_v48 = vpop.eup %8708  ;;  %v5989_v8 = vld [vmem:[%s10815_s9 + $0x30] sm:$0xff] }
 0xf63   :  { %8712 = vrcp.f32 %v5602_v5  ;;  %v8711_v28 = vpop.eup %8710  ;;  %v8127_v5 = vpack.c.bf16 %v6006_v52, %v6005_v46 }
 0xf64   :  { %8714 = vrcp.f32 %v5603_v50  ;;  %v5604_v56 = vadd.f32 1.0, %v8711_v28  ;;  %v5990_v50 = vld [vmem:[%s10815_s9 + $0x38] sm:$0xff]  ;;  %v6007_v28 = vld [vmem:[%s10815_s9 + $0xc0] sm:$0xff] }
 0xf66   :  { %8716 = vrcp.f32 %v5604_v56  ;;  %v5992_v56 = vld [vmem:[%s10815_s9 + $0x48] sm:$0xff] }
 0xf6d   :  { %v8713_v10 = vpop.eup %8712 }
 0xf6e   :  { %v5613_v2 = vmul.f32 %v8713_v10, %v8709_v48  ;;  %v8715_v37 = vpop.eup %8714  ;;  %v8129_v48 = vpack.c.bf16 %v5990_v50, %v5989_v8  ;;  %v6008_v10 = vld [vmem:[%s10815_s9 + $0xc8] sm:$0xff] }
 0xf6f   :  { %v5612_v29 = vmul.f32 %v8715_v37, %v10604_v61  ;;  %v5991_v37 = vld [vmem:[%s10815_s9 + $0x40] sm:$0xff] }
 0xf70   :  { %v8717_v31 = vpop.eup %8716 }
 0xf71   :  { %v10646_v6 = vadd.f32 %v5613_v2, %v5612_v29  ;;  %v8131_v2 = vpack.c.bf16 %v6008_v10, %v6007_v28  ;;  %v8133_v29 = vpack.c.bf16 %v5992_v56, %v5991_v37 }
 0xf73   :  { %8718 = vtanh.f32 %v10646_v6 }
 0xf7d   :  { %v8719_v57 = vpop.eup %8718 }
 0xf7e   :  { %v5616_v59 = vmul.f32 %v8719_v57, %v8717_v31  ;;  %v6010_v31 = vld [vmem:[%s10815_s9 + $0xd8] sm:$0xff] }
 0xf80   :  { %5687 = vmatmul.mubr.f32.vlgmr.msra.gmra.mrb[76].mxu0 %v5616_v59  ;;  %5758 = vmatmul.mubr.f32.vlgmr.msra.gmra.mrb[84].mxu1 %v5616_v59  ;;  %v5993_v59 = vld [vmem:[%s10815_s9 + $0x50] sm:$0xff] }
 0xf81   :  { %8054 = vmatpush1.bf16.msra.mxu0 %v10274_v43  ;;  %8086 = vmatpush1.bf16.msra.mxu1 %v10277_v38 }
 0xf82   :  { %8056 = vmatprep.subr.bf16.mxu0 %v10279_v20  ;;  %8088 = vmatprep.subr.bf16.mxu1 %v10282_v30 }
 0xf83   :  { %5857 = vmatprep.mubr.f32.mxu0 %v10948_v18  ;;  %5928 = vmatprep.mubr.f32.mxu1 %v10948_v18 }
 0xf85   :  { %8058 = vmatpush1.bf16.msra.mxu0 %v10287_v27  ;;  %8090 = vmatpush1.bf16.msra.mxu1 %v10291_v35 }
 0xf86   :  { %8060 = vmatprep.subr.bf16.mxu0 %v10293_v22  ;;  %8092 = vmatprep.subr.bf16.mxu1 %v10296_v11 }
 0xf89   :  { %8062 = vmatpush1.bf16.msra.mxu0 %v10301_v7  ;;  %8094 = vmatpush1.bf16.msra.mxu1 %v10305_v54 }
 0xf8a   :  { %8064 = vmatprep.subr.bf16.mxu0 %v10307_v49  ;;  %8096 = vmatprep.subr.bf16.mxu1 %v10310_v15 }
 0xf8d   :  { %8066 = vmatpush1.bf16.msra.mxu0 %v10313_v60  ;;  %8098 = vmatpush1.bf16.msra.mxu1 %v10317_v14 }
 0xf8e   :  { %8068 = vmatprep.subr.bf16.mxu0 %v10319_v24  ;;  %8100 = vmatprep.subr.bf16.mxu1 %v10322_v12 }
 0xf91   :  { %8070 = vmatpush1.bf16.msra.mxu0 %v10325_v33  ;;  %8102 = vmatpush1.bf16.msra.mxu1 %v10329_v51 }
 0xf92   :  { %8072 = vmatprep.subr.bf16.mxu0 %v10331_v40  ;;  %8104 = vmatprep.subr.bf16.mxu1 %v10334_v19 }
 0xf95   :  { %8074 = vmatpush1.bf16.msra.mxu0 %v10337_v45  ;;  %8106 = vmatpush1.bf16.msra.mxu1 %v10341_v58 }
 0xf96   :  { %8076 = vmatprep.subr.bf16.mxu0 %v10343_v63  ;;  %8108 = vmatprep.subr.bf16.mxu1 %v10346_v55 }
 0xf99   :  { %8078 = vmatpush1.bf16.msra.mxu0 %v10349_v3  ;;  %8110 = vmatpush1.bf16.msra.mxu1 %v10353_v9  ;;  %v5999_v9 = vld [vmem:[%s10815_s9 + $0x80] sm:$0xff] }
 0xf9a   :  { %8080 = vmatprep.subr.bf16.mxu0 %v10355_v62  ;;  %8112 = vmatprep.subr.bf16.mxu1 %v10358_v0  ;;  %v6000_v62 = vld [vmem:[%s10815_s9 + $0x88] sm:$0xff] }
 0xf9b   :  { %v8115_v0 = vpack.c.bf16 %v6000_v62, %v5999_v9 }
 0xf9d   :  { %8082 = vmatpush1.bf16.msra.mxu0 %v10361_v25  ;;  %8114 = vmatpush1.bf16.msra.mxu1 %v10365_v17  ;;  %v5983_v25 = vld [vmem:[%s10815_s9] sm:$0xff]  ;;  %v5984_v17 = vld [vmem:[%s10815_s9 + $0x8] sm:$0xff] }
 0xf9e   :  { %v8117_v61 = vpack.c.bf16 %v5984_v17, %v5983_v25  ;;  %8116 = vmatprep.subr.bf16.mxu0 %v8115_v0 }
0x1053   :  { %v5688_v18 = vpop.f32.mrb[76].mxu0  ;;  %v5759_v43 = vpop.f32.mrb[84].mxu1 }
0x1054   :  { %v8235_v38 = vadd.f32 %v5688_v18, %v10419_v34  ;;  %v5690_v20 = vpop.f32.mrb[77].mxu0  ;;  %v5761_v30 = vpop.f32.mrb[85].mxu1  ;;  %v8251_v11 = vadd.f32 %v5759_v43, %v10427_v4  ;;  %v5994_v18 = vld [vmem:[%s10815_s9 + $0x58] sm:$0xff] }
0x1055   :  { %v8236_v27 = vadd.f32 %v5690_v20, %v10422_v41  ;;  %v8252_v7 = vadd.f32 %v5761_v30, %v10431_v36  ;;  %v8137_v43 = vpack.c.bf16 %v5994_v18, %v5993_v59  ;;  %v6012_v20 = vld [vmem:[%s10815_s9 + $0xe8] sm:$0xff]  ;;  %v5995_v30 = vld [vmem:[%s10815_s9 + $0x60] sm:$0xff] }
0x1056   :  { %v6235_v35 = vmul.f32 -1.442695, %v8235_v38  ;;  %v6237_v54 = vmul.f32 -1.442695, %v8251_v11  ;;  %v6011_v38 = vld [vmem:[%s10815_s9 + $0xe0] sm:$0xff]  ;;  %v6014_v11 = vld [vmem:[%s10815_s9 + $0xf8] sm:$0xff] }
0x1057   :  { %v6236_v22 = vmul.f32 -1.442695, %v8236_v27  ;;  %v8139_v27 = vpack.c.bf16 %v6012_v20, %v6011_v38 }
0x1058   :  { %8720 = vpow2.f32 %v6235_v35  ;;  %v5996_v35 = vld [vmem:[%s10815_s9 + $0x68] sm:$0xff] }
0x1059   :  { %8722 = vpow2.f32 %v6236_v22  ;;  %v6013_v22 = vld [vmem:[%s10815_s9 + $0xf0] sm:$0xff] }
0x105a   :  { %8724 = vtanh.f32 %v8252_v7  ;;  %v8141_v7 = vpack.c.bf16 %v5996_v35, %v5995_v30 }
0x105b   :  { %8726 = vpow2.f32 %v6237_v54  ;;  %v8143_v54 = vpack.c.bf16 %v6014_v11, %v6013_v22 }
0x1062   :  { %v8721_v49 = vpop.eup %8720 }
0x1063   :  { %v5773_v15 = vadd.f32 1.0, %v8721_v49  ;;  %v8723_v60 = vpop.eup %8722  ;;  %v5997_v49 = vld [vmem:[%s10815_s9 + $0x70] sm:$0xff] }
0x1064   :  { %v5774_v14 = vadd.f32 1.0, %v8723_v60  ;;  %v8725_v24 = vpop.eup %8724 }
0x1065   :  { %8728 = vrcp.f32 %v5773_v15  ;;  %v8727_v12 = vpop.eup %8726  ;;  %v5998_v15 = vld [vmem:[%s10815_s9 + $0x78] sm:$0xff] }
0x1066   :  { %8730 = vrcp.f32 %v5774_v14  ;;  %v5775_v19 = vadd.f32 1.0, %v8727_v12  ;;  %v8145_v60 = vpack.c.bf16 %v5998_v15, %v5997_v49 }
0x1068   :  { %8732 = vrcp.f32 %v5775_v19 }
0x106f   :  { %v8729_v33 = vpop.eup %8728 }
0x1070   :  { %v5784_v51 = vmul.f32 %v8729_v33, %v8725_v24  ;;  %v8731_v40 = vpop.eup %8730 }
0x1071   :  { %v5783_v45 = vmul.f32 %v8731_v40, %v10646_v6  ;;  %v6009_v6 = vld [vmem:[%s10815_s9 + $0xd0] sm:$0xff] }
0x1072   :  { %v8733_v63 = vpop.eup %8732  ;;  %v8135_v57 = vpack.c.bf16 %v6010_v31, %v6009_v6 }
0x1073   :  { %v10686_v58 = vadd.f32 %v5784_v51, %v5783_v45 }
0x1075   :  { %8734 = vtanh.f32 %v10686_v58 }
0x107f   :  { %v8735_v55 = vpop.eup %8734 }
0x1080   :  { %v5787_v3 = vmul.f32 %v8735_v55, %v8733_v63 }
0x1082   :  { %5858 = vmatmul.mubr.f32.vlgmr.msra.gmra.mrb[78].mxu0 %v5787_v3  ;;  %5929 = vmatmul.mubr.f32.vlgmr.msra.gmra.mrb[86].mxu1 %v5787_v3 }
0x1083   :  { %6086 = vmatprep.mubr.f32.mxu0 %v10434_v53  ;;  %8118 = vmatpush3.bf16.msra.mxu0 %v8117_v61  ;;  %v6001_v53 = vld [vmem:[%s10815_s9 + $0x90] sm:$0xff] }
0x1084   :  { %v8119_v42 = vpack.c.bf16 %v6002_v21, %v6001_v53 }
0x1086   :  { %8120 = vmatprep.subr.bf16.mxu0 %v8119_v42 }
0x1087   :  { %8122 = vmatpush3.bf16.msra.mxu0 %v8121_v13 }
0x1088   :  { %8124 = vmatprep.subr.bf16.mxu0 %v8123_v26 }
0x108b   :  { %8126 = vmatpush3.bf16.msra.mxu0 %v8125_v32 }
0x108c   :  { %8128 = vmatprep.subr.bf16.mxu0 %v8127_v5 }
0x108f   :  { %8130 = vmatpush3.bf16.msra.mxu0 %v8129_v48 }
0x1090   :  { %8132 = vmatprep.subr.bf16.mxu0 %v8131_v2 }
0x1093   :  { %8134 = vmatpush3.bf16.msra.mxu0 %v8133_v29 }
0x1094   :  { %8136 = vmatprep.subr.bf16.mxu0 %v8135_v57 }
0x1097   :  { %8138 = vmatpush3.bf16.msra.mxu0 %v8137_v43 }
0x1098   :  { %8140 = vmatprep.subr.bf16.mxu0 %v8139_v27 }
0x109b   :  { %8142 = vmatpush3.bf16.msra.mxu0 %v8141_v7 }
0x109c   :  { %8144 = vmatprep.subr.bf16.mxu0 %v8143_v54 }
0x109f   :  { %8146 = vmatpush3.bf16.msra.mxu0 %v8145_v60 }
0x1155   :  { %v5859_v14 = vpop.f32.mrb[78].mxu0  ;;  %v5930_v24 = vpop.f32.mrb[86].mxu1 }
0x1156   :  { %v8237_v12 = vadd.f32 %v5859_v14, %v10419_v34  ;;  %v5861_v33 = vpop.f32.mrb[79].mxu0  ;;  %v5932_v51 = vpop.f32.mrb[87].mxu1  ;;  %v8253_v63 = vadd.f32 %v5930_v24, %v10427_v4 }
0x1157   :  { %v8238_v40 = vadd.f32 %v5861_v33, %v10422_v41  ;;  %v8254_v55 = vadd.f32 %v5932_v51, %v10431_v36 }
0x1158   :  { %v6238_v19 = vmul.f32 -1.442695, %v8237_v12  ;;  %v6240_v3 = vmul.f32 -1.442695, %v8253_v63 }
0x1159   :  { %v6239_v45 = vmul.f32 -1.442695, %v8238_v40 }
0x115a   :  { %8736 = vpow2.f32 %v6238_v19 }
0x115b   :  { %8738 = vpow2.f32 %v6239_v45 }
0x115c   :  { %8740 = vtanh.f32 %v8254_v55 }
0x115d   :  { %8742 = vpow2.f32 %v6240_v3 }
0x1164   :  { %v8737_v9 = vpop.eup %8736 }
0x1165   :  { %v5944_v62 = vadd.f32 1.0, %v8737_v9  ;;  %v8739_v0 = vpop.eup %8738 }
0x1166   :  { %v5945_v34 = vadd.f32 1.0, %v8739_v0  ;;  %v8741_v25 = vpop.eup %8740 }
0x1167   :  { %8744 = vrcp.f32 %v5944_v62  ;;  %v8743_v17 = vpop.eup %8742 }
0x1168   :  { %8746 = vrcp.f32 %v5945_v34  ;;  %v5946_v21 = vadd.f32 1.0, %v8743_v17 }
0x116a   :  { %8748 = vrcp.f32 %v5946_v21 }
0x1171   :  { %v8745_v41 = vpop.eup %8744 }
0x1172   :  { %v5955_v61 = vmul.f32 %v8745_v41, %v8741_v25  ;;  %v8747_v53 = vpop.eup %8746 }
0x1173   :  { %v5954_v42 = vmul.f32 %v8747_v53, %v10686_v58 }
0x1174   :  { %v8749_v36 = vpop.eup %8748 }
0x1175   :  { %v5956_v4 = vadd.f32 %v5955_v61, %v5954_v42 }
0x1177   :  { %8750 = vtanh.f32 %v5956_v4 }
0x1181   :  { %v8751_v47 = vpop.eup %8750 }
0x1182   :  { %v5958_v16 = vmul.f32 %v8751_v47, %v8749_v36 }
0x1184   :  { %6087 = vmatmul.mubr.f32.vlgmr.msra.gmra.mrb[82].mxu0 %v5958_v16 }
0x1257   :  { %v6280_v13 = vpop.f32.mrb[82].mxu0 }
0x1258   :  { %v6281_v44 = vpop.f32.mrb[83].mxu0 }
0x1259   :  { %v6282_v26 = vadd.f32 %v6281_v44, %v6280_v13 }
0x125b   :  { %v6089_v23 = vadd.f32 %v6282_v26, %v6244_v39 }
0x125d   :  { %6093 = vst.msk [vmem:[#allocation12] sm:$0xff] %vm6092_vm4, %v6089_v23 }
0x125e   :  { %8851 = shalt.err (!%p8848_p8)
}
0x125f   :  { %s8852_s13 = scalar_lea.hbm %s10817_s11, 128 }
0x1260   :  { %p8853_p9 = scmp.ne.s32.totalorder %s10817_s11, %s8852_s13  ;;  %p8856_p10 = scmp.lt.u32.totalorder %s8852_s13, %s10817_s11 }
0x1262   :  { %p8858_p11 = pnand %p8856_p10, %p8853_p9 }
0x1264   :  { %8861 = shalt.err (!%p8858_p11)
}
0x1265   :  { %6103 = dma.vmem_to_hbm [thread:$0]  %s6101_s4, 128, %s10817_s11, [#allocation11]  }
0x1266   :  { %8870 = dma.done.wait [#allocation11], 128  }
0x1267   :  { %8871 = vsyncadd [#allocation11], 4294967168 }
0x1268   :  { %6107 = vsyncpa [#allocation10], 1 }
0x1269   :  { %6108 = vsyncpa [#allocation11], 1 }
0x126a   :  { %6109 = vsyncmov [#allocation8] }
0x126d   :  { %s6110_s19 = vpop.sfrf %6109 }
0x126e   :  { %p6245_p12 = scmp.ne.s32.totalorder %s6110_s19, 0 }
0x1270   :  { %6114 = shalt.err (%p6245_p12)  }
0x1271   :  { %6116 = vsyncmov [#allocation8 + $0x1] }
0x1274   :  { %s6117_s5 = vpop.sfrf %6116 }
0x1275   :  { %p6246_p13 = scmp.ne.s32.totalorder %s6117_s5, 0 }
0x1277   :  { %6121 = shalt.err (%p6246_p13)  }
0x1278   :  { %6123 = vsyncmov [#allocation8 + $0x2] }
0x127b   :  { %s6124_s14 = vpop.sfrf %6123 }
0x127c   :  { %p6247_p0 = scmp.ne.s32.totalorder %s6124_s14, 0 }
0x127e   :  { %6128 = shalt.err (%p6247_p0)  }

</bundles_post_ra>
